<compile_context>
chip_gen: v6e
topology: v6e:2x2x1
jax: 0.10.0
libtpu: 0.0.40
codegen_flags: <defaults>
</compile_context>

<pallas_src>
import functools

import numpy as np

import jax
import jax.numpy as jnp
from jax.experimental import pallas as pl
from jax.experimental.pallas import tpu as pltpu


LN_EPS = 1e-6  # pre_transformer_layer LayerNorm eps (explicit in the reference).
               # TODO(synk): block-internal LayerNorm eps not given; 1e-6 assumed.


def _layernorm(x, w, b, eps=LN_EPS):
    mu = jnp.mean(x, axis=-1, keepdims=True)
    var = jnp.mean((x - mu) ** 2, axis=-1, keepdims=True)
    return (x - mu) * jax.lax.rsqrt(var + eps) * w + b


# ---------------------- fused transformer-stack kernel ----------------------

def stack_kernel(x_in, attn_bias, preln_w, preln_b,
                 ln1w, ln1b, wqkv, bqkv, bk, bv, wo, bo,
                 ln2w, ln2b, w1, b1, w2, b2,
                 x_out,
                 *, num_heads):
    layer = pl.program_id(0)
    N, D = x_out.shape
    hd = D // num_heads
    scale = 1.0 / float(hd) ** 0.5

    @pl.when(layer == 0)
    def _():
        # pre_transformer_layer: LayerNorm(eps=1e-6) (+ Identity / rearrange,
        # which are layout-only) folded into the first layer iteration.  The
        # activation is carried across layers in the resident output block.
        x_out[...] = _layernorm(x_in[...], preln_w[...], preln_b[...])

    x = x_out[...]                                       # (N, D) f32, VMEM-resident

    # ---- pre-LN multi-head self-attention with add_bias_kv ----
    xn = _layernorm(x, ln1w[0], ln1b[0])
    qkv = jnp.dot(xn.astype(jnp.bfloat16), wqkv[0],
                  preferred_element_type=jnp.float32) + bqkv[0]      # (N, 3D) f32
    q = qkv[:, :D] * scale                               # scale folded into q once
    k = qkv[:, D:2 * D]
    v = qkv[:, 2 * D:]
    qb = q.astype(jnp.bfloat16)
    kb = k.astype(jnp.bfloat16)
    vb = v.astype(jnp.bfloat16)
    bkr = bk[0]                                          # (1, D) learned key bias
    bvr = bv[0]                                          # (1, D) learned value bias
    bias = attn_bias[...]                                # (N, N) hoisted out of loop

    head_outs = []
    for h in range(num_heads):                           # static unroll, few heads
        sl = slice(h * hd, (h + 1) * hd)
        # (N, N) scores over the whole slab; cross-sample entries are killed by
        # the -1e30 entries of `bias`, real keys get +mask_add from the same bias.
        s = jax.lax.dot_general(qb[:, sl], kb[:, sl],
                                (((1,), (1,)), ((), ())),
                                preferred_element_type=jnp.float32) + bias
        # add_bias_kv: extra key/value handled as a separate logit column so the
        # score matrix keeps an (8,128)-friendly shape (no (L+1, D) concat).
        sb = jnp.sum(q[:, sl] * bkr[:, sl], axis=-1, keepdims=True)      # (N, 1)
        m = jnp.maximum(jnp.max(s, axis=-1, keepdims=True), sb)
        p = jnp.exp(s - m)
        pb = jnp.exp(sb - m)
        inv = pl.reciprocal(jnp.sum(p, axis=-1, keepdims=True) + pb, approx=True)
        o = jnp.dot(p.astype(jnp.bfloat16), vb[:, sl],
                    preferred_element_type=jnp.float32)                  # (N, hd)
        head_outs.append((o + pb * bvr[:, sl]) * inv)

    attn_all = jnp.concatenate(head_outs, axis=-1)       # (N, D) in-register concat
    attn = jnp.dot(attn_all.astype(jnp.bfloat16), wo[0],
                   preferred_element_type=jnp.float32) + bo[0]
    x = x + attn

    # ---- FFN ----
    # TODO(synk): SimpleTransformer FFN activation not provided; GELU assumed.
    xn2 = _layernorm(x, ln2w[0], ln2b[0])
    h1 = jnp.dot(xn2.astype(jnp.bfloat16), w1[0],
                 preferred_element_type=jnp.float32) + b1[0]
    h1 = jax.nn.gelu(h1)
    h2 = jnp.dot(h1.astype(jnp.bfloat16), w2[0],
                 preferred_element_type=jnp.float32) + b2[0]

    x_out[...] = x + h2        # carried activation; written to HBM after last layer


def _attn_bias(B, L, mask_add):
    """Additive attention bias: +mask_add on same-sample real keys, -1e30 across samples."""
    idx = np.arange(B * L) // L
    same = idx[:, None] == idx[None, :]
    return jnp.asarray(np.where(same, np.float32(mask_add), np.float32(-1e30)),
                       dtype=jnp.float32)


def run_stack(x2d, preln_w, preln_b, layers, *, B, L, num_heads, mask_add):
    N, D = x2d.shape
    assert N == B * L
    NL = layers["wqkv"].shape[0]
    F = layers["w1"].shape[-1]
    attn_bias = _attn_bias(B, L, mask_add)

    def full(shape):
        return pl.BlockSpec(shape, lambda l, n=len(shape): (0,) * n)

    def per_layer(shape):
        return pl.BlockSpec((1,) + shape, lambda l, n=len(shape): (l,) + (0,) * n)

    kernel = functools.partial(stack_kernel, num_heads=num_heads)
    return pl.pallas_call(
        kernel,
        out_shape=jax.ShapeDtypeStruct((N, D), jnp.float32),
        grid=(NL,),
        in_specs=[
            full((N, D)), full((N, N)),                  # x slab, attention bias
            full((1, D)), full((1, D)),                  # pre-LN w, b
            per_layer((1, D)), per_layer((1, D)),        # ln1 w, b
            per_layer((D, 3 * D)), per_layer((1, 3 * D)),  # wqkv, bqkv
            per_layer((1, D)), per_layer((1, D)),        # bias_k, bias_v
            per_layer((D, D)), per_layer((1, D)),        # wo, bo
            per_layer((1, D)), per_layer((1, D)),        # ln2 w, b
            per_layer((D, F)), per_layer((1, F)),        # ffn w1, b1
            per_layer((F, D)), per_layer((1, D)),        # ffn w2, b2
        ],
        out_specs=pl.BlockSpec((N, D), lambda l: (0, 0)),
        compiler_params=pltpu.CompilerParams(
            dimension_semantics=("arbitrary",)),           # layer axis is sequential
    )(x2d, attn_bias, preln_w, preln_b,
      layers["ln1_w"], layers["ln1_b"], layers["wqkv"], layers["bqkv"],
      layers["bias_k"], layers["bias_v"], layers["wo"], layers["bo"],
      layers["ln2_w"], layers["ln2_b"], layers["w1"], layers["b1"],
      layers["w2"], layers["b2"])


# ----------------------- whole-batch single-shot kernels ---------------------

def matmul_kernel(x_ref, w_ref, o_ref):
    o_ref[...] = jnp.dot(x_ref[...].astype(jnp.bfloat16), w_ref[...],
                         preferred_element_type=jnp.float32)


def pallas_matmul(x, w):
    """Single-invocation (no grid) [M, K] @ [K, N] with bf16 MXU inputs."""
    M, _ = x.shape
    N = w.shape[1]
    return pl.pallas_call(
        matmul_kernel,
        out_shape=jax.ShapeDtypeStruct((M, N), jnp.float32),
    )(x, w)


def score_heads_kernel(x_ref, w1_ref, b1_ref, w2_ref, b2_ref, o_ref):
    # Both score heads in one launch via block-diagonal weights: (B, 2D) -> (B, 2).
    h = jnp.dot(x_ref[...].astype(jnp.bfloat16), w1_ref[...],
                preferred_element_type=jnp.float32) + b1_ref[...]
    h = jnp.maximum(h, 0.0)
    o_ref[...] = jnp.dot(h.astype(jnp.bfloat16), w2_ref[...],
                         preferred_element_type=jnp.float32) + b2_ref[...]


def pallas_score_heads(x, p):
    B = x.shape[0]
    return pl.pallas_call(
        score_heads_kernel,
        out_shape=jax.ShapeDtypeStruct((B, 2), jnp.float32),
    )(x, p["w1"], p["b1"], p["w2"], p["b2"])


# ------------------------------ parameter init -------------------------------

def init_layer_stack(key, num_layers, D, F, std=0.02):
    def one(k):
        ks = jax.random.split(k, 6)
        return dict(
            ln1_w=jnp.ones((1, D), jnp.float32),
            ln1_b=jnp.zeros((1, D), jnp.float32),
            wqkv=(jax.random.normal(ks[0], (D, 3 * D)) * std).astype(jnp.bfloat16),
            bqkv=jnp.zeros((1, 3 * D), jnp.float32),
            bias_k=(jax.random.normal(ks[1], (1, D)) * std).astype(jnp.float32),
            bias_v=(jax.random.normal(ks[2], (1, D)) * std).astype(jnp.float32),
            wo=(jax.random.normal(ks[3], (D, D)) * std).astype(jnp.bfloat16),
            bo=jnp.zeros((1, D), jnp.float32),
            ln2_w=jnp.ones((1, D), jnp.float32),
            ln2_b=jnp.zeros((1, D), jnp.float32),
            w1=(jax.random.normal(ks[4], (D, F)) * std).astype(jnp.bfloat16),
            b1=jnp.zeros((1, F), jnp.float32),
            w2=(jax.random.normal(ks[5], (F, D)) * std).astype(jnp.bfloat16),
            b2=jnp.zeros((1, D), jnp.float32),
        )
    per = [one(k) for k in jax.random.split(key, num_layers)]
    return {name: jnp.stack([p[name] for p in per], axis=0) for name in per[0]}


def init_score_heads(key, D, std=0.02):
    Dh = D // 2
    k1, k2, k3, k4 = jax.random.split(key, 4)
    w1_t = jax.random.normal(k1, (D, Dh)) * std
    w1_p = jax.random.normal(k2, (D, Dh)) * std
    w2_t = jax.random.normal(k3, (Dh, 1)) * std
    w2_p = jax.random.normal(k4, (Dh, 1)) * std
    zdd = jnp.zeros((D, Dh), jnp.float32)
    zd1 = jnp.zeros((Dh, 1), jnp.float32)
    return dict(
        w1=jnp.block([[w1_t, zdd], [zdd, w1_p]]).astype(jnp.bfloat16),  # (2D, 2*Dh)
        b1=jnp.zeros((1, 2 * Dh), jnp.float32),
        w2=jnp.block([[w2_t, zd1], [zd1, w2_p]]).astype(jnp.bfloat16),  # (2*Dh, 2)
        b2=jnp.zeros((1, 2), jnp.float32),
    )


def init_params(key, cfg):
    D, L, V = cfg["D"], cfg["L"], cfg["V"]
    F = 4 * D
    ks = jax.random.split(key, 8)
    # TODO(synk): AGL internals not provided; stubbed with per-modality linear
    # projections packed into one block-diagonal matmul weight.
    agl_wv = jax.random.normal(ks[2], (D, D)) * 0.02
    agl_wa = jax.random.normal(ks[3], (D, D)) * 0.02
    zdd = jnp.zeros((D, D), jnp.float32)
    return dict(
        token_embedding=jax.random.normal(ks[0], (V, D)) * 0.02,
        pos_embed=jax.random.normal(ks[1], (1, L, D)) * 0.01,
        agl_w=jnp.block([[agl_wv, zdd], [zdd, agl_wa]]).astype(jnp.bfloat16),
        vaf_preln_w=jnp.ones((1, D), jnp.float32),
        vaf_preln_b=jnp.zeros((1, D), jnp.float32),
        mllm_preln_w=jnp.ones((1, D), jnp.float32),
        mllm_preln_b=jnp.zeros((1, D), jnp.float32),
        lm_head_w=(jax.random.normal(ks[4], (D, V)) * 0.02).astype(jnp.bfloat16),
        score_heads=init_score_heads(ks[5], D),
        vaf_layers=init_layer_stack(ks[6], cfg["vaf_num_blocks"], D, F),
        mllm_layers=init_layer_stack(ks[7], cfg["num_blocks"], D, F),
    )


# ---------------------------------- forward ----------------------------------

def forward(params, video_features, audio_features, input_ids, prompt_ids, pad_ids, cfg):
    bs = video_features.shape[0]
    D, L, nos, V = cfg["D"], cfg["L"], cfg["nos"], cfg["V"]

    # ---- AGL (stub): project the first `nos` frames of each modality ----
    # TODO(synk): AGL segment-localisation logic not provided in the source.
    v_in = video_features[:, :nos, :].reshape(bs * nos, D)
    a_in = audio_features[:, :nos, :].reshape(bs * nos, D)
    agl_out = pallas_matmul(jnp.concatenate([v_in, a_in], axis=-1), params["agl_w"])
    located = jnp.zeros((bs, nos), jnp.float32)

    # ---- vaf: fuse each (video, audio) segment pair, all pairs in one slab ----
    # TODO(synk): Cross_MultiheadAttention internals not provided; approximated
    # by self-attention over the 2-token [video, audio] pair.
    pair = agl_out.reshape(bs * nos * 2, D)            # row 2i = video_i, 2i+1 = audio_i
    pair = run_stack(pair, params["vaf_preln_w"], params["vaf_preln_b"],
                     params["vaf_layers"], B=bs * nos, L=2,
                     num_heads=cfg["vaf_num_heads"], mask_add=0.0)
    fused_segs = pair.reshape(bs, nos, 2, D)[:, :, 0, :]           # (bs, nos, D)

    # ---- assemble fused_features [bs, L, D] (embedding gathers stay in JAX) ----
    emb = params["token_embedding"]
    tes_e = emb[cfg["tes_token"]]
    pcs_e = emb[cfg["pcs_token"]]
    text = emb[jnp.concatenate([prompt_ids, input_ids], axis=1)][0]  # (t_len, D)
    pad = emb[pad_ids]                                               # (n_pad, D)
    t_len = text.shape[0]

    fused = jnp.zeros((bs, L, D), jnp.float32)
    fused = fused.at[:, :nos, :].set(fused_segs)
    fused = fused.at[:, nos, :].set(tes_e)
    fused = fused.at[:, nos + 1, :].set(pcs_e)
    fused = fused.at[:, nos + 2:nos + 2 + t_len, :].set(text)
    fused = fused.at[:, nos + 2 + t_len:, :].set(pad)
    fused = fused + params["pos_embed"]

    # ---- mllm: pre-LN + all blocks fused into one pallas_call ----
    x = run_stack(fused.reshape(bs * L, D),
                  params["mllm_preln_w"], params["mllm_preln_b"],
                  params["mllm_layers"], B=bs, L=L,
                  num_heads=cfg["num_heads"], mask_add=1.0)
    x3 = x.reshape(bs, L, D)

    # score heads read straight from x3 (no double transpose on this path)
    heads_in = jnp.concatenate([x3[:, nos, :], x3[:, nos + 1, :]], axis=-1)
    scores = pallas_score_heads(heads_in, params["score_heads"])     # (bs, 2)
    tes = scores[:, 0]
    pcs = scores[:, 1]

    hidden_state = jnp.transpose(x3, (0, 2, 1))        # 'l b d -> b d l' => (bs, D, L)

    # lm head only on the positions that survive the [:, :-1, :] shift
    n_lm = L - nos - 3
    lm_in = x3[:, nos + 2:L - 1, :].reshape(bs * n_lm, D)
    shift_logits = pallas_matmul(lm_in, params["lm_head_w"]).reshape(bs, n_lm, V)

    return tes, pcs, hidden_state, located.reshape(-1), shift_logits


# ------------------------------------ main ------------------------------------

if __name__ == "__main__":
    cfg = dict(
        D=128,              # embed_dim
        L=16,               # context_length
        V=256,              # vocab_size
        num_blocks=2, num_heads=4,
        vaf_num_blocks=2, vaf_num_heads=4,
        nos=4,              # number of fused video/audio segments
        tes_token=250, pcs_token=251,
    )

    key = jax.random.PRNGKey(0)
    kp, kv, ka, ki, kpr = jax.random.split(key, 5)
    params = init_params(kp, cfg)

    bs, t_feat = 2, 8
    video_features = jax.random.normal(kv, (bs, t_feat, cfg["D"]), jnp.float32)
    audio_features = jax.random.normal(ka, (bs, t_feat, cfg["D"]), jnp.float32)
    prompt_ids = jax.random.randint(kpr, (1, 3), 0, cfg["V"], dtype=jnp.int32)
    input_ids = jax.random.randint(ki, (1, 4), 0, cfg["V"], dtype=jnp.int32)
    pad_ids = jnp.zeros((cfg["L"] - cfg["nos"] - 2 - 7,), jnp.int32)   # 3 pad positions

    fwd = jax.jit(functools.partial(forward, cfg=cfg))
    outs = fwd(params, video_features, audio_features, input_ids, prompt_ids, pad_ids)
    jax.block_until_ready(outs)

    tes, pcs, hidden_state, located, shift_logits = outs
    assert tes.shape == (bs,) and pcs.shape == (bs,)
    assert hidden_state.shape == (bs, cfg["D"], cfg["L"])
    assert located.shape == (bs * cfg["nos"],)
    assert shift_logits.shape == (bs, cfg["L"] - cfg["nos"] - 3, cfg["V"])
    print("KERNEL_OK")
</pallas_src>

<mosaic_0001>
module attributes {stable_mosaic.version = 11 : i64} {
  func.func @matmul_kernel(%arg0: memref<8x256xf32, #tpu.memory_space<vmem>>, %arg1: memref<256x256xbf16, #tpu.memory_space<vmem>>, %arg2: memref<8x256xf32, #tpu.memory_space<vmem>>) attributes {dimension_semantics = [], scalar_prefetch = 0 : i64, scratch_operands = 0 : i64, tpu.core_type = #tpu.core_type<tc>} {
    %c0 = arith.constant 0 : index
    %c0_0 = arith.constant 0 : index
    %0 = vector.load %arg0[%c0, %c0_0] : memref<8x256xf32, #tpu.memory_space<vmem>>, vector<8x256xf32>
    %1 = arith.truncf %0 : vector<8x256xf32> to vector<8x256xbf16>
    %c0_1 = arith.constant 0 : index
    %c0_2 = arith.constant 0 : index
    %2 = vector.load %arg1[%c0_1, %c0_2] : memref<256x256xbf16, #tpu.memory_space<vmem>>, vector<256x256xbf16>
    %cst = arith.constant dense<0.000000e+00> : vector<8x256xf32>
    %3 = tpu.matmul %1, %2, %cst {dimension_numbers = #tpu.dot_dimension_numbers<[1], [0], [0], [1], [0, 0, 1, 1], [], []>} : vector<8x256xbf16>, vector<256x256xbf16>, vector<8x256xf32> -> vector<8x256xf32>
    %c0_3 = arith.constant 0 : index
    %c0_4 = arith.constant 0 : index
    %4 = vector.load %arg2[%c0_3, %c0_4] : memref<8x256xf32, #tpu.memory_space<vmem>>, vector<8x256xf32>
    tpu.vector_store %arg2[%c0_3, %c0_4], %3 {strides = array<i32>} : memref<8x256xf32, #tpu.memory_space<vmem>>, vector<8x256xf32>,
    return
  }
}

module attributes {stable_mosaic.version = 11 : i64} {
  func.func @stack_kernel(%arg0: i32, %arg1: memref<16x128xf32, #tpu.memory_space<vmem>>, %arg2: memref<16x16xf32, #tpu.memory_space<vmem>>, %arg3: memref<1x128xf32, #tpu.memory_space<vmem>>, %arg4: memref<1x128xf32, #tpu.memory_space<vmem>>, %arg5: memref<1x1x128xf32, #tpu.memory_space<vmem>>, %arg6: memref<1x1x128xf32, #tpu.memory_space<vmem>>, %arg7: memref<1x128x384xbf16, #tpu.memory_space<vmem>>, %arg8: memref<1x1x384xf32, #tpu.memory_space<vmem>>, %arg9: memref<1x1x128xf32, #tpu.memory_space<vmem>>, %arg10: memref<1x1x128xf32, #tpu.memory_space<vmem>>, %arg11: memref<1x128x128xbf16, #tpu.memory_space<vmem>>, %arg12: memref<1x1x128xf32, #tpu.memory_space<vmem>>, %arg13: memref<1x1x128xf32, #tpu.memory_space<vmem>>, %arg14: memref<1x1x128xf32, #tpu.memory_space<vmem>>, %arg15: memref<1x128x512xbf16, #tpu.memory_space<vmem>>, %arg16: memref<1x1x512xf32, #tpu.memory_space<vmem>>, %arg17: memref<1x512x128xbf16, #tpu.memory_space<vmem>>, %arg18: memref<1x1x128xf32, #tpu.memory_space<vmem>>, %arg19: memref<16x128xf32, #tpu.memory_space<vmem>>) attributes {dimension_semantics = [#tpu.dimension_semantics<arbitrary>], iteration_bounds = array<i64: 2>, scalar_prefetch = 0 : i64, scratch_operands = 0 : i64, tpu.core_type = #tpu.core_type<tc>, window_params = [{pipeline_mode = #tpu.pipeline_mode<synchronous>, transform_indices = @transform_0, window_bounds = array<i64: 16, 128>}, {pipeline_mode = #tpu.pipeline_mode<synchronous>, transform_indices = @transform_1, window_bounds = array<i64: 16, 16>}, {pipeline_mode = #tpu.pipeline_mode<synchronous>, transform_indices = @transform_2, window_bounds = array<i64: 1, 128>}, {pipeline_mode = #tpu.pipeline_mode<synchronous>, transform_indices = @transform_3, window_bounds = array<i64: 1, 128>}, {transform_indices = @transform_4, window_bounds = array<i64: 1, 1, 128>}, {transform_indices = @transform_5, window_bounds = array<i64: 1, 1, 128>}, {transform_indices = @transform_6, window_bounds = array<i64: 1, 128, 384>}, {transform_indices = @transform_7, window_bounds = array<i64: 1, 1, 384>}, {transform_indices = @transform_8, window_bounds = array<i64: 1, 1, 128>}, {transform_indices = @transform_9, window_bounds = array<i64: 1, 1, 128>}, {transform_indices = @transform_10, window_bounds = array<i64: 1, 128, 128>}, {transform_indices = @transform_11, window_bounds = array<i64: 1, 1, 128>}, {transform_indices = @transform_12, window_bounds = array<i64: 1, 1, 128>}, {transform_indices = @transform_13, window_bounds = array<i64: 1, 1, 128>}, {transform_indices = @transform_14, window_bounds = array<i64: 1, 128, 512>}, {transform_indices = @transform_15, window_bounds = array<i64: 1, 1, 512>}, {transform_indices = @transform_16, window_bounds = array<i64: 1, 512, 128>}, {transform_indices = @transform_17, window_bounds = array<i64: 1, 1, 128>}, {pipeline_mode = #tpu.pipeline_mode<synchronous>, transform_indices = @transform_18, window_bounds = array<i64: 16, 128>}]} {
    %c0_i32 = arith.constant 0 : i32
    %0 = arith.cmpi eq, %arg0, %c0_i32 : i32
    %1 = arith.extui %0 : i1 to i32
    %c0_i32_0 = arith.constant 0 : i32
    %2 = arith.cmpi ne, %1, %c0_i32_0 : i32
    scf.if %2 {
      %c0_86 = arith.constant 0 : index
      %c0_87 = arith.constant 0 : index
      %246 = vector.load %arg1[%c0_86, %c0_87] : memref<16x128xf32, #tpu.memory_space<vmem>>, vector<16x128xf32>
      %c0_88 = arith.constant 0 : index
      %c0_89 = arith.constant 0 : index
      %247 = vector.load %arg3[%c0_88, %c0_89] : memref<1x128xf32, #tpu.memory_space<vmem>>, vector<1x128xf32>
      %c0_90 = arith.constant 0 : index
      %c0_91 = arith.constant 0 : index
      %248 = vector.load %arg4[%c0_90, %c0_91] : memref<1x128xf32, #tpu.memory_space<vmem>>, vector<1x128xf32>
      %cst_92 = arith.constant dense<0.000000e+00> : vector<16xf32>
      %249 = vector.multi_reduction <add>, %246, %cst_92 [1] : vector<16x128xf32> to vector<16xf32>
      %250 = vector.shape_cast %249 : vector<16xf32> to vector<16x1xf32>
      %cst_93 = arith.constant 1.280000e+02 : f32
      %251 = vector.broadcast %cst_93 : f32 to vector<16x1xf32>
      %252 = arith.divf %250, %251 : vector<16x1xf32>
      %253 = vector.broadcast %252 : vector<16x1xf32> to vector<16x128xf32>
      %254 = arith.subf %246, %253 : vector<16x128xf32>
      %255 = arith.mulf %254, %254 : vector<16x128xf32>
      %cst_94 = arith.constant dense<0.000000e+00> : vector<16xf32>
      %256 = vector.multi_reduction <add>, %255, %cst_94 [1] : vector<16x128xf32> to vector<16xf32>
      %257 = vector.shape_cast %256 : vector<16xf32> to vector<16x1xf32>
      %cst_95 = arith.constant 1.280000e+02 : f32
      %258 = vector.broadcast %cst_95 : f32 to vector<16x1xf32>
      %259 = arith.divf %257, %258 : vector<16x1xf32>
      %260 = vector.broadcast %252 : vector<16x1xf32> to vector<16x128xf32>
      %261 = arith.subf %246, %260 : vector<16x128xf32>
      %cst_96 = arith.constant 9.99999997E-7 : f32
      %262 = vector.broadcast %cst_96 : f32 to vector<16x1xf32>
      %263 = arith.addf %259, %262 : vector<16x1xf32>
      %264 = math.rsqrt %263 : vector<16x1xf32>
      %265 = vector.broadcast %264 : vector<16x1xf32> to vector<16x128xf32>
      %266 = arith.mulf %261, %265 : vector<16x128xf32>
      %267 = vector.broadcast %247 : vector<1x128xf32> to vector<16x128xf32>
      %268 = arith.mulf %266, %267 : vector<16x128xf32>
      %269 = vector.broadcast %248 : vector<1x128xf32> to vector<16x128xf32>
      %270 = arith.addf %268, %269 : vector<16x128xf32>
      %c0_97 = arith.constant 0 : index
      %c0_98 = arith.constant 0 : index
      %271 = vector.load %arg19[%c0_97, %c0_98] : memref<16x128xf32, #tpu.memory_space<vmem>>, vector<16x128xf32>
      tpu.vector_store %arg19[%c0_97, %c0_98], %270 {strides = array<i32>} : memref<16x128xf32, #tpu.memory_space<vmem>>, vector<16x128xf32>,
    } else {
    }
    %c0 = arith.constant 0 : index
    %c0_1 = arith.constant 0 : index
    %3 = vector.load %arg19[%c0, %c0_1] : memref<16x128xf32, #tpu.memory_space<vmem>>, vector<16x128xf32>
    %c0_2 = arith.constant 0 : index
    %c0_3 = arith.constant 0 : index
    %c0_4 = arith.constant 0 : index
    %4 = vector.load %arg5[%c0_2, %c0_3, %c0_4] : memref<1x1x128xf32, #tpu.memory_space<vmem>>, vector<1x1x128xf32>
    %5 = vector.shape_cast %4 : vector<1x1x128xf32> to vector<1x128xf32>
    %c0_5 = arith.constant 0 : index
    %c0_6 = arith.constant 0 : index
    %c0_7 = arith.constant 0 : index
    %6 = vector.load %arg6[%c0_5, %c0_6, %c0_7] : memref<1x1x128xf32, #tpu.memory_space<vmem>>, vector<1x1x128xf32>
    %7 = vector.shape_cast %6 : vector<1x1x128xf32> to vector<1x128xf32>
    %cst = arith.constant dense<0.000000e+00> : vector<16xf32>
    %8 = vector.multi_reduction <add>, %3, %cst [1] : vector<16x128xf32> to vector<16xf32>
    %9 = vector.shape_cast %8 : vector<16xf32> to vector<16x1xf32>
    %cst_8 = arith.constant 1.280000e+02 : f32
    %10 = vector.broadcast %cst_8 : f32 to vector<16x1xf32>
    %11 = arith.divf %9, %10 : vector<16x1xf32>
    %12 = vector.broadcast %11 : vector<16x1xf32> to vector<16x128xf32>
    %13 = arith.subf %3, %12 : vector<16x128xf32>
    %14 = arith.mulf %13, %13 : vector<16x128xf32>
    %cst_9 = arith.constant dense<0.000000e+00> : vector<16xf32>
    %15 = vector.multi_reduction <add>, %14, %cst_9 [1] : vector<16x128xf32> to vector<16xf32>
    %16 = vector.shape_cast %15 : vector<16xf32> to vector<16x1xf32>
    %cst_10 = arith.constant 1.280000e+02 : f32
    %17 = vector.broadcast %cst_10 : f32 to vector<16x1xf32>
    %18 = arith.divf %16, %17 : vector<16x1xf32>
    %19 = vector.broadcast %11 : vector<16x1xf32> to vector<16x128xf32>
    %20 = arith.subf %3, %19 : vector<16x128xf32>
    %cst_11 = arith.constant 9.99999997E-7 : f32
    %21 = vector.broadcast %cst_11 : f32 to vector<16x1xf32>
    %22 = arith.addf %18, %21 : vector<16x1xf32>
    %23 = math.rsqrt %22 : vector<16x1xf32>
    %24 = vector.broadcast %23 : vector<16x1xf32> to vector<16x128xf32>
    %25 = arith.mulf %20, %24 : vector<16x128xf32>
    %26 = vector.broadcast %5 : vector<1x128xf32> to vector<16x128xf32>
    %27 = arith.mulf %25, %26 : vector<16x128xf32>
    %28 = vector.broadcast %7 : vector<1x128xf32> to vector<16x128xf32>
    %29 = arith.addf %27, %28 : vector<16x128xf32>
    %30 = arith.truncf %29 : vector<16x128xf32> to vector<16x128xbf16>
    %c0_12 = arith.constant 0 : index
    %c0_13 = arith.constant 0 : index
    %c0_14 = arith.constant 0 : index
    %31 = vector.load %arg7[%c0_12, %c0_13, %c0_14] : memref<1x128x384xbf16, #tpu.memory_space<vmem>>, vector<1x128x384xbf16>
    %32 = vector.shape_cast %31 : vector<1x128x384xbf16> to vector<128x384xbf16>
    %cst_15 = arith.constant dense<0.000000e+00> : vector<16x384xf32>
    %33 = tpu.matmul %30, %32, %cst_15 {dimension_numbers = #tpu.dot_dimension_numbers<[1], [0], [0], [1], [0, 0, 1, 1], [], []>} : vector<16x128xbf16>, vector<128x384xbf16>, vector<16x384xf32> -> vector<16x384xf32>
    %c0_16 = arith.constant 0 : index
    %c0_17 = arith.constant 0 : index
    %c0_18 = arith.constant 0 : index
    %34 = vector.load %arg8[%c0_16, %c0_17, %c0_18] : memref<1x1x384xf32, #tpu.memory_space<vmem>>, vector<1x1x384xf32>
    %35 = vector.shape_cast %34 : vector<1x1x384xf32> to vector<1x384xf32>
    %36 = vector.broadcast %35 : vector<1x384xf32> to vector<16x384xf32>
    %37 = arith.addf %33, %36 : vector<16x384xf32>
    %38 = vector.extract_strided_slice %37 {offsets = [0, 0], sizes = [16, 128], strides = [1, 1]} : vector<16x384xf32> to vector<16x128xf32>
    %cst_19 = arith.constant 0.176776692 : f32
    %39 = vector.broadcast %cst_19 : f32 to vector<16x128xf32>
    %40 = arith.mulf %38, %39 : vector<16x128xf32>
    %41 = vector.extract_strided_slice %37 {offsets = [0, 128], sizes = [16, 128], strides = [1, 1]} : vector<16x384xf32> to vector<16x128xf32>
    %42 = vector.extract_strided_slice %37 {offsets = [0, 256], sizes = [16, 128], strides = [1, 1]} : vector<16x384xf32> to vector<16x128xf32>
    %43 = arith.truncf %40 : vector<16x128xf32> to vector<16x128xbf16>
    %44 = arith.truncf %41 : vector<16x128xf32> to vector<16x128xbf16>
    %45 = arith.truncf %42 : vector<16x128xf32> to vector<16x128xbf16>
    %c0_20 = arith.constant 0 : index
    %c0_21 = arith.constant 0 : index
    %c0_22 = arith.constant 0 : index
    %46 = vector.load %arg9[%c0_20, %c0_21, %c0_22] : memref<1x1x128xf32, #tpu.memory_space<vmem>>, vector<1x1x128xf32>
    %47 = vector.shape_cast %46 : vector<1x1x128xf32> to vector<1x128xf32>
    %c0_23 = arith.constant 0 : index
    %c0_24 = arith.constant 0 : index
    %c0_25 = arith.constant 0 : index
    %48 = vector.load %arg10[%c0_23, %c0_24, %c0_25] : memref<1x1x128xf32, #tpu.memory_space<vmem>>, vector<1x1x128xf32>
    %49 = vector.shape_cast %48 : vector<1x1x128xf32> to vector<1x128xf32>
    %c0_26 = arith.constant 0 : index
    %c0_27 = arith.constant 0 : index
    %50 = vector.load %arg2[%c0_26, %c0_27] : memref<16x16xf32, #tpu.memory_space<vmem>>, vector<16x16xf32>
    %51 = vector.extract_strided_slice %43 {offsets = [0, 0], sizes = [16, 32], strides = [1, 1]} : vector<16x128xbf16> to vector<16x32xbf16>
    %52 = vector.extract_strided_slice %44 {offsets = [0, 0], sizes = [16, 32], strides = [1, 1]} : vector<16x128xbf16> to vector<16x32xbf16>
    %cst_28 = arith.constant dense<0.000000e+00> : vector<16x16xf32>
    %53 = tpu.matmul %51, %52, %cst_28 {dimension_numbers = #tpu.dot_dimension_numbers<[1], [1], [0], [0], [0, 0, 1, 0], [], []>} : vector<16x32xbf16>, vector<16x32xbf16>, vector<16x16xf32> -> vector<16x16xf32>
    %54 = arith.addf %53, %50 : vector<16x16xf32>
    %55 = vector.extract_strided_slice %40 {offsets = [0, 0], sizes = [16, 32], strides = [1, 1]} : vector<16x128xf32> to vector<16x32xf32>
    %56 = vector.extract_strided_slice %47 {offsets = [0, 0], sizes = [1, 32], strides = [1, 1]} : vector<1x128xf32> to vector<1x32xf32>
    %57 = vector.broadcast %56 : vector<1x32xf32> to vector<16x32xf32>
    %58 = arith.mulf %55, %57 : vector<16x32xf32>
    %cst_29 = arith.constant dense<0.000000e+00> : vector<16xf32>
    %59 = vector.multi_reduction <add>, %58, %cst_29 [1] : vector<16x32xf32> to vector<16xf32>
    %60 = vector.shape_cast %59 : vector<16xf32> to vector<16x1xf32>
    %cst_30 = arith.constant dense<0xFF800000> : vector<16xf32>
    %61 = vector.multi_reduction <maximumf>, %54, %cst_30 [1] : vector<16x16xf32> to vector<16xf32>
    %62 = vector.shape_cast %61 : vector<16xf32> to vector<16x1xf32>
    %63 = arith.maximumf %62, %60 : vector<16x1xf32>
    %64 = vector.broadcast %63 : vector<16x1xf32> to vector<16x16xf32>
    %65 = arith.subf %54, %64 : vector<16x16xf32>
    %66 = math.exp %65 : vector<16x16xf32>
    %67 = arith.subf %60, %63 : vector<16x1xf32>
    %68 = math.exp %67 : vector<16x1xf32>
    %cst_31 = arith.constant dense<0.000000e+00> : vector<16xf32>
    %69 = vector.multi_reduction <add>, %66, %cst_31 [1] : vector<16x16xf32> to vector<16xf32>
    %70 = vector.shape_cast %69 : vector<16xf32> to vector<16x1xf32>
    %71 = arith.addf %70, %68 : vector<16x1xf32>
    %72 = tpu.reciprocal %71 {approx = true} : vector<16x1xf32> -> vector<16x1xf32>
    %73 = arith.truncf %66 : vector<16x16xf32> to vector<16x16xbf16>
    %74 = vector.extract_strided_slice %45 {offsets = [0, 0], sizes = [16, 32], strides = [1, 1]} : vector<16x128xbf16> to vector<16x32xbf16>
    %cst_32 = arith.constant dense<0.000000e+00> : vector<16x32xf32>
    %75 = tpu.matmul %73, %74, %cst_32 {dimension_numbers = #tpu.dot_dimension_numbers<[1], [0], [0], [1], [0, 0, 1, 1], [], []>} : vector<16x16xbf16>, vector<16x32xbf16>, vector<16x32xf32> -> vector<16x32xf32>
    %76 = vector.extract_strided_slice %49 {offsets = [0, 0], sizes = [1, 32], strides = [1, 1]} : vector<1x128xf32> to vector<1x32xf32>
    %77 = vector.broadcast %68 : vector<16x1xf32> to vector<16x32xf32>
    %78 = vector.broadcast %76 : vector<1x32xf32> to vector<16x32xf32>
    %79 = arith.mulf %77, %78 : vector<16x32xf32>
    %80 = arith.addf %75, %79 : vector<16x32xf32>
    %81 = vector.broadcast %72 : vector<16x1xf32> to vector<16x32xf32>
    %82 = arith.mulf %80, %81 : vector<16x32xf32>
    %83 = vector.extract_strided_slice %43 {offsets = [0, 32], sizes = [16, 32], strides = [1, 1]} : vector<16x128xbf16> to vector<16x32xbf16>
    %84 = vector.extract_strided_slice %44 {offsets = [0, 32], sizes = [16, 32], strides = [1, 1]} : vector<16x128xbf16> to vector<16x32xbf16>
    %cst_33 = arith.constant dense<0.000000e+00> : vector<16x16xf32>
    %85 = tpu.matmul %83, %84, %cst_33 {dimension_numbers = #tpu.dot_dimension_numbers<[1], [1], [0], [0], [0, 0, 1, 0], [], []>} : vector<16x32xbf16>, vector<16x32xbf16>, vector<16x16xf32> -> vector<16x16xf32>
    %86 = arith.addf %85, %50 : vector<16x16xf32>
    %87 = vector.extract_strided_slice %40 {offsets = [0, 32], sizes = [16, 32], strides = [1, 1]} : vector<16x128xf32> to vector<16x32xf32>
    %88 = vector.extract_strided_slice %47 {offsets = [0, 32], sizes = [1, 32], strides = [1, 1]} : vector<1x128xf32> to vector<1x32xf32>
    %89 = vector.broadcast %88 : vector<1x32xf32> to vector<16x32xf32>
    %90 = arith.mulf %87, %89 : vector<16x32xf32>
    %cst_34 = arith.constant dense<0.000000e+00> : vector<16xf32>
    %91 = vector.multi_reduction <add>, %90, %cst_34 [1] : vector<16x32xf32> to vector<16xf32>
    %92 = vector.shape_cast %91 : vector<16xf32> to vector<16x1xf32>
    %cst_35 = arith.constant dense<0xFF800000> : vector<16xf32>
    %93 = vector.multi_reduction <maximumf>, %86, %cst_35 [1] : vector<16x16xf32> to vector<16xf32>
    %94 = vector.shape_cast %93 : vector<16xf32> to vector<16x1xf32>
    %95 = arith.maximumf %94, %92 : vector<16x1xf32>
    %96 = vector.broadcast %95 : vector<16x1xf32> to vector<16x16xf32>
    %97 = arith.subf %86, %96 : vector<16x16xf32>
    %98 = math.exp %97 : vector<16x16xf32>
    %99 = arith.subf %92, %95 : vector<16x1xf32>
    %100 = math.exp %99 : vector<16x1xf32>
    %cst_36 = arith.constant dense<0.000000e+00> : vector<16xf32>
    %101 = vector.multi_reduction <add>, %98, %cst_36 [1] : vector<16x16xf32> to vector<16xf32>
    %102 = vector.shape_cast %101 : vector<16xf32> to vector<16x1xf32>
    %103 = arith.addf %102, %100 : vector<16x1xf32>
    %104 = tpu.reciprocal %103 {approx = true} : vector<16x1xf32> -> vector<16x1xf32>
    %105 = arith.truncf %98 : vector<16x16xf32> to vector<16x16xbf16>
    %106 = vector.extract_strided_slice %45 {offsets = [0, 32], sizes = [16, 32], strides = [1, 1]} : vector<16x128xbf16> to vector<16x32xbf16>
    %cst_37 = arith.constant dense<0.000000e+00> : vector<16x32xf32>
    %107 = tpu.matmul %105, %106, %cst_37 {dimension_numbers = #tpu.dot_dimension_numbers<[1], [0], [0], [1], [0, 0, 1, 1], [], []>} : vector<16x16xbf16>, vector<16x32xbf16>, vector<16x32xf32> -> vector<16x32xf32>
    %108 = vector.extract_strided_slice %49 {offsets = [0, 32], sizes = [1, 32], strides = [1, 1]} : vector<1x128xf32> to vector<1x32xf32>
    %109 = vector.broadcast %100 : vector<16x1xf32> to vector<16x32xf32>
    %110 = vector.broadcast %108 : vector<1x32xf32> to vector<16x32xf32>
    %111 = arith.mulf %109, %110 : vector<16x32xf32>
    %112 = arith.addf %107, %111 : vector<16x32xf32>
    %113 = vector.broadcast %104 : vector<16x1xf32> to vector<16x32xf32>
    %114 = arith.mulf %112, %113 : vector<16x32xf32>
    %115 = vector.extract_strided_slice %43 {offsets = [0, 64], sizes = [16, 32], strides = [1, 1]} : vector<16x128xbf16> to vector<16x32xbf16>
    %116 = vector.extract_strided_slice %44 {offsets = [0, 64], sizes = [16, 32], strides = [1, 1]} : vector<16x128xbf16> to vector<16x32xbf16>
    %cst_38 = arith.constant dense<0.000000e+00> : vector<16x16xf32>
    %117 = tpu.matmul %115, %116, %cst_38 {dimension_numbers = #tpu.dot_dimension_numbers<[1], [1], [0], [0], [0, 0, 1, 0], [], []>} : vector<16x32xbf16>, vector<16x32xbf16>, vector<16x16xf32> -> vector<16x16xf32>
    %118 = arith.addf %117, %50 : vector<16x16xf32>
    %119 = vector.extract_strided_slice %40 {offsets = [0, 64], sizes = [16, 32], strides = [1, 1]} : vector<16x128xf32> to vector<16x32xf32>
    %120 = vector.extract_strided_slice %47 {offsets = [0, 64], sizes = [1, 32], strides = [1, 1]} : vector<1x128xf32> to vector<1x32xf32>
    %121 = vector.broadcast %120 : vector<1x32xf32> to vector<16x32xf32>
    %122 = arith.mulf %119, %121 : vector<16x32xf32>
    %cst_39 = arith.constant dense<0.000000e+00> : vector<16xf32>
    %123 = vector.multi_reduction <add>, %122, %cst_39 [1] : vector<16x32xf32> to vector<16xf32>
    %124 = vector.shape_cast %123 : vector<16xf32> to vector<16x1xf32>
    %cst_40 = arith.constant dense<0xFF800000> : vector<16xf32>
    %125 = vector.multi_reduction <maximumf>, %118, %cst_40 [1] : vector<16x16xf32> to vector<16xf32>
    %126 = vector.shape_cast %125 : vector<16xf32> to vector<16x1xf32>
    %127 = arith.maximumf %126, %124 : vector<16x1xf32>
    %128 = vector.broadcast %127 : vector<16x1xf32> to vector<16x16xf32>
    %129 = arith.subf %118, %128 : vector<16x16xf32>
    %130 = math.exp %129 : vector<16x16xf32>
    %131 = arith.subf %124, %127 : vector<16x1xf32>
    %132 = math.exp %131 : vector<16x1xf32>
    %cst_41 = arith.constant dense<0.000000e+00> : vector<16xf32>
    %133 = vector.multi_reduction <add>, %130, %cst_41 [1] : vector<16x16xf32> to vector<16xf32>
    %134 = vector.shape_cast %133 : vector<16xf32> to vector<16x1xf32>
    %135 = arith.addf %134, %132 : vector<16x1xf32>
    %136 = tpu.reciprocal %135 {approx = true} : vector<16x1xf32> -> vector<16x1xf32>
    %137 = arith.truncf %130 : vector<16x16xf32> to vector<16x16xbf16>
    %138 = vector.extract_strided_slice %45 {offsets = [0, 64], sizes = [16, 32], strides = [1, 1]} : vector<16x128xbf16> to vector<16x32xbf16>
    %cst_42 = arith.constant dense<0.000000e+00> : vector<16x32xf32>
    %139 = tpu.matmul %137, %138, %cst_42 {dimension_numbers = #tpu.dot_dimension_numbers<[1], [0], [0], [1], [0, 0, 1, 1], [], []>} : vector<16x16xbf16>, vector<16x32xbf16>, vector<16x32xf32> -> vector<16x32xf32>
    %140 = vector.extract_strided_slice %49 {offsets = [0, 64], sizes = [1, 32], strides = [1, 1]} : vector<1x128xf32> to vector<1x32xf32>
    %141 = vector.broadcast %132 : vector<16x1xf32> to vector<16x32xf32>
    %142 = vector.broadcast %140 : vector<1x32xf32> to vector<16x32xf32>
    %143 = arith.mulf %141, %142 : vector<16x32xf32>
    %144 = arith.addf %139, %143 : vector<16x32xf32>
    %145 = vector.broadcast %136 : vector<16x1xf32> to vector<16x32xf32>
    %146 = arith.mulf %144, %145 : vector<16x32xf32>
    %147 = vector.extract_strided_slice %43 {offsets = [0, 96], sizes = [16, 32], strides = [1, 1]} : vector<16x128xbf16> to vector<16x32xbf16>
    %148 = vector.extract_strided_slice %44 {offsets = [0, 96], sizes = [16, 32], strides = [1, 1]} : vector<16x128xbf16> to vector<16x32xbf16>
    %cst_43 = arith.constant dense<0.000000e+00> : vector<16x16xf32>
    %149 = tpu.matmul %147, %148, %cst_43 {dimension_numbers = #tpu.dot_dimension_numbers<[1], [1], [0], [0], [0, 0, 1, 0], [], []>} : vector<16x32xbf16>, vector<16x32xbf16>, vector<16x16xf32> -> vector<16x16xf32>
    %150 = arith.addf %149, %50 : vector<16x16xf32>
    %151 = vector.extract_strided_slice %40 {offsets = [0, 96], sizes = [16, 32], strides = [1, 1]} : vector<16x128xf32> to vector<16x32xf32>
    %152 = vector.extract_strided_slice %47 {offsets = [0, 96], sizes = [1, 32], strides = [1, 1]} : vector<1x128xf32> to vector<1x32xf32>
    %153 = vector.broadcast %152 : vector<1x32xf32> to vector<16x32xf32>
    %154 = arith.mulf %151, %153 : vector<16x32xf32>
    %cst_44 = arith.constant dense<0.000000e+00> : vector<16xf32>
    %155 = vector.multi_reduction <add>, %154, %cst_44 [1] : vector<16x32xf32> to vector<16xf32>
    %156 = vector.shape_cast %155 : vector<16xf32> to vector<16x1xf32>
    %cst_45 = arith.constant dense<0xFF800000> : vector<16xf32>
    %157 = vector.multi_reduction <maximumf>, %150, %cst_45 [1] : vector<16x16xf32> to vector<16xf32>
    %158 = vector.shape_cast %157 : vector<16xf32> to vector<16x1xf32>
    %159 = arith.maximumf %158, %156 : vector<16x1xf32>
    %160 = vector.broadcast %159 : vector<16x1xf32> to vector<16x16xf32>
    %161 = arith.subf %150, %160 : vector<16x16xf32>
    %162 = math.exp %161 : vector<16x16xf32>
    %163 = arith.subf %156, %159 : vector<16x1xf32>
    %164 = math.exp %163 : vector<16x1xf32>
    %cst_46 = arith.constant dense<0.000000e+00> : vector<16xf32>
    %165 = vector.multi_reduction <add>, %162, %cst_46 [1] : vector<16x16xf32> to vector<16xf32>
    %166 = vector.shape_cast %165 : vector<16xf32> to vector<16x1xf32>
    %167 = arith.addf %166, %164 : vector<16x1xf32>
    %168 = tpu.reciprocal %167 {approx = true} : vector<16x1xf32> -> vector<16x1xf32>
    %169 = arith.truncf %162 : vector<16x16xf32> to vector<16x16xbf16>
    %170 = vector.extract_strided_slice %45 {offsets = [0, 96], sizes = [16, 32], strides = [1, 1]} : vector<16x128xbf16> to vector<16x32xbf16>
    %cst_47 = arith.constant dense<0.000000e+00> : vector<16x32xf32>
    %171 = tpu.matmul %169, %170, %cst_47 {dimension_numbers = #tpu.dot_dimension_numbers<[1], [0], [0], [1], [0, 0, 1, 1], [], []>} : vector<16x16xbf16>, vector<16x32xbf16>, vector<16x32xf32> -> vector<16x32xf32>
    %172 = vector.extract_strided_slice %49 {offsets = [0, 96], sizes = [1, 32], strides = [1, 1]} : vector<1x128xf32> to vector<1x32xf32>
    %173 = vector.broadcast %164 : vector<16x1xf32> to vector<16x32xf32>
    %174 = vector.broadcast %172 : vector<1x32xf32> to vector<16x32xf32>
    %175 = arith.mulf %173, %174 : vector<16x32xf32>
    %176 = arith.addf %171, %175 : vector<16x32xf32>
    %177 = vector.broadcast %168 : vector<16x1xf32> to vector<16x32xf32>
    %178 = arith.mulf %176, %177 : vector<16x32xf32>
    %179 = tpu.concatenate %82, %114, %146, %178 in 1 : vector<16x32xf32>, vector<16x32xf32>, vector<16x32xf32>, vector<16x32xf32> -> vector<16x128xf32>
    %180 = arith.truncf %179 : vector<16x128xf32> to vector<16x128xbf16>
    %c0_48 = arith.constant 0 : index
    %c0_49 = arith.constant 0 : index
    %c0_50 = arith.constant 0 : index
    %181 = vector.load %arg11[%c0_48, %c0_49, %c0_50] : memref<1x128x128xbf16, #tpu.memory_space<vmem>>, vector<1x128x128xbf16>
    %182 = vector.shape_cast %181 : vector<1x128x128xbf16> to vector<128x128xbf16>
    %cst_51 = arith.constant dense<0.000000e+00> : vector<16x128xf32>
    %183 = tpu.matmul %180, %182, %cst_51 {dimension_numbers = #tpu.dot_dimension_numbers<[1], [0], [0], [1], [0, 0, 1, 1], [], []>} : vector<16x128xbf16>, vector<128x128xbf16>, vector<16x128xf32> -> vector<16x128xf32>
    %c0_52 = arith.constant 0 : index
    %c0_53 = arith.constant 0 : index
    %c0_54 = arith.constant 0 : index
    %184 = vector.load %arg12[%c0_52, %c0_53, %c0_54] : memref<1x1x128xf32, #tpu.memory_space<vmem>>, vector<1x1x128xf32>
    %185 = vector.shape_cast %184 : vector<1x1x128xf32> to vector<1x128xf32>
    %186 = vector.broadcast %185 : vector<1x128xf32> to vector<16x128xf32>
    %187 = arith.addf %183, %186 : vector<16x128xf32>
    %188 = arith.addf %3, %187 : vector<16x128xf32>
    %c0_55 = arith.constant 0 : index
    %c0_56 = arith.constant 0 : index
    %c0_57 = arith.constant 0 : index
    %189 = vector.load %arg13[%c0_55, %c0_56, %c0_57] : memref<1x1x128xf32, #tpu.memory_space<vmem>>, vector<1x1x128xf32>
    %190 = vector.shape_cast %189 : vector<1x1x128xf32> to vector<1x128xf32>
    %c0_58 = arith.constant 0 : index
    %c0_59 = arith.constant 0 : index
    %c0_60 = arith.constant 0 : index
    %191 = vector.load %arg14[%c0_58, %c0_59, %c0_60] : memref<1x1x128xf32, #tpu.memory_space<vmem>>, vector<1x1x128xf32>
    %192 = vector.shape_cast %191 : vector<1x1x128xf32> to vector<1x128xf32>
    %cst_61 = arith.constant dense<0.000000e+00> : vector<16xf32>
    %193 = vector.multi_reduction <add>, %188, %cst_61 [1] : vector<16x128xf32> to vector<16xf32>
    %194 = vector.shape_cast %193 : vector<16xf32> to vector<16x1xf32>
    %cst_62 = arith.constant 1.280000e+02 : f32
    %195 = vector.broadcast %cst_62 : f32 to vector<16x1xf32>
    %196 = arith.divf %194, %195 : vector<16x1xf32>
    %197 = vector.broadcast %196 : vector<16x1xf32> to vector<16x128xf32>
    %198 = arith.subf %188, %197 : vector<16x128xf32>
    %199 = arith.mulf %198, %198 : vector<16x128xf32>
    %cst_63 = arith.constant dense<0.000000e+00> : vector<16xf32>
    %200 = vector.multi_reduction <add>, %199, %cst_63 [1] : vector<16x128xf32> to vector<16xf32>
    %201 = vector.shape_cast %200 : vector<16xf32> to vector<16x1xf32>
    %cst_64 = arith.constant 1.280000e+02 : f32
    %202 = vector.broadcast %cst_64 : f32 to vector<16x1xf32>
    %203 = arith.divf %201, %202 : vector<16x1xf32>
    %204 = vector.broadcast %196 : vector<16x1xf32> to vector<16x128xf32>
    %205 = arith.subf %188, %204 : vector<16x128xf32>
    %cst_65 = arith.constant 9.99999997E-7 : f32
    %206 = vector.broadcast %cst_65 : f32 to vector<16x1xf32>
    %207 = arith.addf %203, %206 : vector<16x1xf32>
    %208 = math.rsqrt %207 : vector<16x1xf32>
    %209 = vector.broadcast %208 : vector<16x1xf32> to vector<16x128xf32>
    %210 = arith.mulf %205, %209 : vector<16x128xf32>
    %211 = vector.broadcast %190 : vector<1x128xf32> to vector<16x128xf32>
    %212 = arith.mulf %210, %211 : vector<16x128xf32>
    %213 = vector.broadcast %192 : vector<1x128xf32> to vector<16x128xf32>
    %214 = arith.addf %212, %213 : vector<16x128xf32>
    %215 = arith.truncf %214 : vector<16x128xf32> to vector<16x128xbf16>
    %c0_66 = arith.constant 0 : index
    %c0_67 = arith.constant 0 : index
    %c0_68 = arith.constant 0 : index
    %216 = vector.load %arg15[%c0_66, %c0_67, %c0_68] : memref<1x128x512xbf16, #tpu.memory_space<vmem>>, vector<1x128x512xbf16>
    %217 = vector.shape_cast %216 : vector<1x128x512xbf16> to vector<128x512xbf16>
    %cst_69 = arith.constant dense<0.000000e+00> : vector<16x512xf32>
    %218 = tpu.matmul %215, %217, %cst_69 {dimension_numbers = #tpu.dot_dimension_numbers<[1], [0], [0], [1], [0, 0, 1, 1], [], []>} : vector<16x128xbf16>, vector<128x512xbf16>, vector<16x512xf32> -> vector<16x512xf32>
    %c0_70 = arith.constant 0 : index
    %c0_71 = arith.constant 0 : index
    %c0_72 = arith.constant 0 : index
    %219 = vector.load %arg16[%c0_70, %c0_71, %c0_72] : memref<1x1x512xf32, #tpu.memory_space<vmem>>, vector<1x1x512xf32>
    %220 = vector.shape_cast %219 : vector<1x1x512xf32> to vector<1x512xf32>
    %221 = vector.broadcast %220 : vector<1x512xf32> to vector<16x512xf32>
    %222 = arith.addf %218, %221 : vector<16x512xf32>
    %223 = arith.mulf %222, %222 : vector<16x512xf32>
    %224 = arith.mulf %222, %223 : vector<16x512xf32>
    %cst_73 = arith.constant 4.471500e-02 : f32
    %225 = vector.broadcast %cst_73 : f32 to vector<16x512xf32>
    %226 = arith.mulf %225, %224 : vector<16x512xf32>
    %227 = arith.addf %222, %226 : vector<16x512xf32>
    %cst_74 = arith.constant 0.797884583 : f32
    %228 = vector.broadcast %cst_74 : f32 to vector<16x512xf32>
    %229 = arith.mulf %228, %227 : vector<16x512xf32>
    %230 = math.tanh %229 : vector<16x512xf32>
    %cst_75 = arith.constant 1.000000e+00 : f32
    %231 = vector.broadcast %cst_75 : f32 to vector<16x512xf32>
    %232 = arith.addf %231, %230 : vector<16x512xf32>
    %cst_76 = arith.constant 5.000000e-01 : f32
    %233 = vector.broadcast %cst_76 : f32 to vector<16x512xf32>
    %234 = arith.mulf %233, %232 : vector<16x512xf32>
    %235 = arith.mulf %222, %234 : vector<16x512xf32>
    %236 = arith.truncf %235 : vector<16x512xf32> to vector<16x512xbf16>
    %c0_77 = arith.constant 0 : index
    %c0_78 = arith.constant 0 : index
    %c0_79 = arith.constant 0 : index
    %237 = vector.load %arg17[%c0_77, %c0_78, %c0_79] : memref<1x512x128xbf16, #tpu.memory_space<vmem>>, vector<1x512x128xbf16>
    %238 = vector.shape_cast %237 : vector<1x512x128xbf16> to vector<512x128xbf16>
    %cst_80 = arith.constant dense<0.000000e+00> : vector<16x128xf32>
    %239 = tpu.matmul %236, %238, %cst_80 {dimension_numbers = #tpu.dot_dimension_numbers<[1], [0], [0], [1], [0, 0, 1, 1], [], []>} : vector<16x512xbf16>, vector<512x128xbf16>, vector<16x128xf32> -> vector<16x128xf32>
    %c0_81 = arith.constant 0 : index
    %c0_82 = arith.constant 0 : index
    %c0_83 = arith.constant 0 : index
    %240 = vector.load %arg18[%c0_81, %c0_82, %c0_83] : memref<1x1x128xf32, #tpu.memory_space<vmem>>, vector<1x1x128xf32>
    %241 = vector.shape_cast %240 : vector<1x1x128xf32> to vector<1x128xf32>
    %242 = vector.broadcast %241 : vector<1x128xf32> to vector<16x128xf32>
    %243 = arith.addf %239, %242 : vector<16x128xf32>
    %244 = arith.addf %188, %243 : vector<16x128xf32>
    %c0_84 = arith.constant 0 : index
    %c0_85 = arith.constant 0 : index
    %245 = vector.load %arg19[%c0_84, %c0_85] : memref<16x128xf32, #tpu.memory_space<vmem>>, vector<16x128xf32>
    tpu.vector_store %arg19[%c0_84, %c0_85], %244 {strides = array<i32>} : memref<16x128xf32, #tpu.memory_space<vmem>>, vector<16x128xf32>,
    return
  }
  func.func @transform_0(%arg0: i32) -> (i32, i32) {
    %c0_i32 = arith.constant 0 : i32
    %c0_i32_0 = arith.constant 0 : i32
    %c0_i32_1 = arith.constant 0 : i32
    return %c0_i32, %c0_i32_0 : i32, i32
  }
  func.func @transform_1(%arg0: i32) -> (i32, i32) {
    %c0_i32 = arith.constant 0 : i32
    %c0_i32_0 = arith.constant 0 : i32
    %c0_i32_1 = arith.constant 0 : i32
    return %c0_i32, %c0_i32_0 : i32, i32
  }
  func.func @transform_2(%arg0: i32) -> (i32, i32) {
    %c0_i32 = arith.constant 0 : i32
    %c0_i32_0 = arith.constant 0 : i32
    %c0_i32_1 = arith.constant 0 : i32
    return %c0_i32, %c0_i32_0 : i32, i32
  }
  func.func @transform_3(%arg0: i32) -> (i32, i32) {
    %c0_i32 = arith.constant 0 : i32
    %c0_i32_0 = arith.constant 0 : i32
    %c0_i32_1 = arith.constant 0 : i32
    return %c0_i32, %c0_i32_0 : i32, i32
  }
  func.func @transform_4(%arg0: i32) -> (i32, i32, i32) {
    %c0_i32 = arith.constant 0 : i32
    %c0_i32_0 = arith.constant 0 : i32
    %c0_i32_1 = arith.constant 0 : i32
    return %arg0, %c0_i32, %c0_i32_0 : i32, i32, i32
  }
  func.func @transform_5(%arg0: i32) -> (i32, i32, i32) {
    %c0_i32 = arith.constant 0 : i32
    %c0_i32_0 = arith.constant 0 : i32
    %c0_i32_1 = arith.constant 0 : i32
    return %arg0, %c0_i32, %c0_i32_0 : i32, i32, i32
  }
  func.func @transform_6(%arg0: i32) -> (i32, i32, i32) {
    %c0_i32 = arith.constant 0 : i32
    %c0_i32_0 = arith.constant 0 : i32
    %c0_i32_1 = arith.constant 0 : i32
    return %arg0, %c0_i32, %c0_i32_0 : i32, i32, i32
  }
  func.func @transform_7(%arg0: i32) -> (i32, i32, i32) {
    %c0_i32 = arith.constant 0 : i32
    %c0_i32_0 = arith.constant 0 : i32
    %c0_i32_1 = arith.constant 0 : i32
    return %arg0, %c0_i32, %c0_i32_0 : i32, i32, i32
  }
  func.func @transform_8(%arg0: i32) -> (i32, i32, i32) {
    %c0_i32 = arith.constant 0 : i32
    %c0_i32_0 = arith.constant 0 : i32
    %c0_i32_1 = arith.constant 0 : i32
    return %arg0, %c0_i32, %c0_i32_0 : i32, i32, i32
  }
  func.func @transform_9(%arg0: i32) -> (i32, i32, i32) {
    %c0_i32 = arith.constant 0 : i32
    %c0_i32_0 = arith.constant 0 : i32
    %c0_i32_1 = arith.constant 0 : i32
    return %arg0, %c0_i32, %c0_i32_0 : i32, i32, i32
  }
  func.func @transform_10(%arg0: i32) -> (i32, i32, i32) {
    %c0_i32 = arith.constant 0 : i32
    %c0_i32_0 = arith.constant 0 : i32
    %c0_i32_1 = arith.constant 0 : i32
    return %arg0, %c0_i32, %c0_i32_0 : i32, i32, i32
  }
  func.func @transform_11(%arg0: i32) -> (i32, i32, i32) {
    %c0_i32 = arith.constant 0 : i32
    %c0_i32_0 = arith.constant 0 : i32
    %c0_i32_1 = arith.constant 0 : i32
    return %arg0, %c0_i32, %c0_i32_0 : i32, i32, i32
  }
  func.func @transform_12(%arg0: i32) -> (i32, i32, i32) {
    %c0_i32 = arith.constant 0 : i32
    %c0_i32_0 = arith.constant 0 : i32
    %c0_i32_1 = arith.constant 0 : i32
    return %arg0, %c0_i32, %c0_i32_0 : i32, i32, i32
  }
  func.func @transform_13(%arg0: i32) -> (i32, i32, i32) {
    %c0_i32 = arith.constant 0 : i32
    %c0_i32_0 = arith.constant 0 : i32
    %c0_i32_1 = arith.constant 0 : i32
    return %arg0, %c0_i32, %c0_i32_0 : i32, i32, i32
  }
  func.func @transform_14(%arg0: i32) -> (i32, i32, i32) {
    %c0_i32 = arith.constant 0 : i32
    %c0_i32_0 = arith.constant 0 : i32
    %c0_i32_1 = arith.constant 0 : i32
    return %arg0, %c0_i32, %c0_i32_0 : i32, i32, i32
  }
  func.func @transform_15(%arg0: i32) -> (i32, i32, i32) {
    %c0_i32 = arith.constant 0 : i32
    %c0_i32_0 = arith.constant 0 : i32
    %c0_i32_1 = arith.constant 0 : i32
    return %arg0, %c0_i32, %c0_i32_0 : i32, i32, i32
  }
  func.func @transform_16(%arg0: i32) -> (i32, i32, i32) {
    %c0_i32 = arith.constant 0 : i32
    %c0_i32_0 = arith.constant 0 : i32
    %c0_i32_1 = arith.constant 0 : i32
    return %arg0, %c0_i32, %c0_i32_0 : i32, i32, i32
  }
  func.func @transform_17(%arg0: i32) -> (i32, i32, i32) {
    %c0_i32 = arith.constant 0 : i32
    %c0_i32_0 = arith.constant 0 : i32
    %c0_i32_1 = arith.constant 0 : i32
    return %arg0, %c0_i32, %c0_i32_0 : i32, i32, i32
  }
  func.func @transform_18(%arg0: i32) -> (i32, i32) {
    %c0_i32 = arith.constant 0 : i32
    %c0_i32_0 = arith.constant 0 : i32
    %c0_i32_1 = arith.constant 0 : i32
    return %c0_i32, %c0_i32_0 : i32, i32
  }
}

module attributes {stable_mosaic.version = 11 : i64} {
  func.func @stack_kernel(%arg0: i32, %arg1: memref<32x128xf32, #tpu.memory_space<vmem>>, %arg2: memref<32x32xf32, #tpu.memory_space<vmem>>, %arg3: memref<1x128xf32, #tpu.memory_space<vmem>>, %arg4: memref<1x128xf32, #tpu.memory_space<vmem>>, %arg5: memref<1x1x128xf32, #tpu.memory_space<vmem>>, %arg6: memref<1x1x128xf32, #tpu.memory_space<vmem>>, %arg7: memref<1x128x384xbf16, #tpu.memory_space<vmem>>, %arg8: memref<1x1x384xf32, #tpu.memory_space<vmem>>, %arg9: memref<1x1x128xf32, #tpu.memory_space<vmem>>, %arg10: memref<1x1x128xf32, #tpu.memory_space<vmem>>, %arg11: memref<1x128x128xbf16, #tpu.memory_space<vmem>>, %arg12: memref<1x1x128xf32, #tpu.memory_space<vmem>>, %arg13: memref<1x1x128xf32, #tpu.memory_space<vmem>>, %arg14: memref<1x1x128xf32, #tpu.memory_space<vmem>>, %arg15: memref<1x128x512xbf16, #tpu.memory_space<vmem>>, %arg16: memref<1x1x512xf32, #tpu.memory_space<vmem>>, %arg17: memref<1x512x128xbf16, #tpu.memory_space<vmem>>, %arg18: memref<1x1x128xf32, #tpu.memory_space<vmem>>, %arg19: memref<32x128xf32, #tpu.memory_space<vmem>>) attributes {dimension_semantics = [#tpu.dimension_semantics<arbitrary>], iteration_bounds = array<i64: 2>, scalar_prefetch = 0 : i64, scratch_operands = 0 : i64, tpu.core_type = #tpu.core_type<tc>, window_params = [{pipeline_mode = #tpu.pipeline_mode<synchronous>, transform_indices = @transform_0, window_bounds = array<i64: 32, 128>}, {pipeline_mode = #tpu.pipeline_mode<synchronous>, transform_indices = @transform_1, window_bounds = array<i64: 32, 32>}, {pipeline_mode = #tpu.pipeline_mode<synchronous>, transform_indices = @transform_2, window_bounds = array<i64: 1, 128>}, {pipeline_mode = #tpu.pipeline_mode<synchronous>, transform_indices = @transform_3, window_bounds = array<i64: 1, 128>}, {transform_indices = @transform_4, window_bounds = array<i64: 1, 1, 128>}, {transform_indices = @transform_5, window_bounds = array<i64: 1, 1, 128>}, {transform_indices = @transform_6, window_bounds = array<i64: 1, 128, 384>}, {transform_indices = @transform_7, window_bounds = array<i64: 1, 1, 384>}, {transform_indices = @transform_8, window_bounds = array<i64: 1, 1, 128>}, {transform_indices = @transform_9, window_bounds = array<i64: 1, 1, 128>}, {transform_indices = @transform_10, window_bounds = array<i64: 1, 128, 128>}, {transform_indices = @transform_11, window_bounds = array<i64: 1, 1, 128>}, {transform_indices = @transform_12, window_bounds = array<i64: 1, 1, 128>}, {transform_indices = @transform_13, window_bounds = array<i64: 1, 1, 128>}, {transform_indices = @transform_14, window_bounds = array<i64: 1, 128, 512>}, {transform_indices = @transform_15, window_bounds = array<i64: 1, 1, 512>}, {transform_indices = @transform_16, window_bounds = array<i64: 1, 512, 128>}, {transform_indices = @transform_17, window_bounds = array<i64: 1, 1, 128>}, {pipeline_mode = #tpu.pipeline_mode<synchronous>, transform_indices = @transform_18, window_bounds = array<i64: 32, 128>}]} {
    %c0_i32 = arith.constant 0 : i32
    %0 = arith.cmpi eq, %arg0, %c0_i32 : i32
    %1 = arith.extui %0 : i1 to i32
    %c0_i32_0 = arith.constant 0 : i32
    %2 = arith.cmpi ne, %1, %c0_i32_0 : i32
    scf.if %2 {
      %c0_86 = arith.constant 0 : index
      %c0_87 = arith.constant 0 : index
      %246 = vector.load %arg1[%c0_86, %c0_87] : memref<32x128xf32, #tpu.memory_space<vmem>>, vector<32x128xf32>
      %c0_88 = arith.constant 0 : index
      %c0_89 = arith.constant 0 : index
      %247 = vector.load %arg3[%c0_88, %c0_89] : memref<1x128xf32, #tpu.memory_space<vmem>>, vector<1x128xf32>
      %c0_90 = arith.constant 0 : index
      %c0_91 = arith.constant 0 : index
      %248 = vector.load %arg4[%c0_90, %c0_91] : memref<1x128xf32, #tpu.memory_space<vmem>>, vector<1x128xf32>
      %cst_92 = arith.constant dense<0.000000e+00> : vector<32xf32>
      %249 = vector.multi_reduction <add>, %246, %cst_92 [1] : vector<32x128xf32> to vector<32xf32>
      %250 = vector.shape_cast %249 : vector<32xf32> to vector<32x1xf32>
      %cst_93 = arith.constant 1.280000e+02 : f32
      %251 = vector.broadcast %cst_93 : f32 to vector<32x1xf32>
      %252 = arith.divf %250, %251 : vector<32x1xf32>
      %253 = vector.broadcast %252 : vector<32x1xf32> to vector<32x128xf32>
      %254 = arith.subf %246, %253 : vector<32x128xf32>
      %255 = arith.mulf %254, %254 : vector<32x128xf32>
      %cst_94 = arith.constant dense<0.000000e+00> : vector<32xf32>
      %256 = vector.multi_reduction <add>, %255, %cst_94 [1] : vector<32x128xf32> to vector<32xf32>
      %257 = vector.shape_cast %256 : vector<32xf32> to vector<32x1xf32>
      %cst_95 = arith.constant 1.280000e+02 : f32
      %258 = vector.broadcast %cst_95 : f32 to vector<32x1xf32>
      %259 = arith.divf %257, %258 : vector<32x1xf32>
      %260 = vector.broadcast %252 : vector<32x1xf32> to vector<32x128xf32>
      %261 = arith.subf %246, %260 : vector<32x128xf32>
      %cst_96 = arith.constant 9.99999997E-7 : f32
      %262 = vector.broadcast %cst_96 : f32 to vector<32x1xf32>
      %263 = arith.addf %259, %262 : vector<32x1xf32>
      %264 = math.rsqrt %263 : vector<32x1xf32>
      %265 = vector.broadcast %264 : vector<32x1xf32> to vector<32x128xf32>
      %266 = arith.mulf %261, %265 : vector<32x128xf32>
      %267 = vector.broadcast %247 : vector<1x128xf32> to vector<32x128xf32>
      %268 = arith.mulf %266, %267 : vector<32x128xf32>
      %269 = vector.broadcast %248 : vector<1x128xf32> to vector<32x128xf32>
      %270 = arith.addf %268, %269 : vector<32x128xf32>
      %c0_97 = arith.constant 0 : index
      %c0_98 = arith.constant 0 : index
      %271 = vector.load %arg19[%c0_97, %c0_98] : memref<32x128xf32, #tpu.memory_space<vmem>>, vector<32x128xf32>
      tpu.vector_store %arg19[%c0_97, %c0_98], %270 {strides = array<i32>} : memref<32x128xf32, #tpu.memory_space<vmem>>, vector<32x128xf32>,
    } else {
    }
    %c0 = arith.constant 0 : index
    %c0_1 = arith.constant 0 : index
    %3 = vector.load %arg19[%c0, %c0_1] : memref<32x128xf32, #tpu.memory_space<vmem>>, vector<32x128xf32>
    %c0_2 = arith.constant 0 : index
    %c0_3 = arith.constant 0 : index
    %c0_4 = arith.constant 0 : index
    %4 = vector.load %arg5[%c0_2, %c0_3, %c0_4] : memref<1x1x128xf32, #tpu.memory_space<vmem>>, vector<1x1x128xf32>
    %5 = vector.shape_cast %4 : vector<1x1x128xf32> to vector<1x128xf32>
    %c0_5 = arith.constant 0 : index
    %c0_6 = arith.constant 0 : index
    %c0_7 = arith.constant 0 : index
    %6 = vector.load %arg6[%c0_5, %c0_6, %c0_7] : memref<1x1x128xf32, #tpu.memory_space<vmem>>, vector<1x1x128xf32>
    %7 = vector.shape_cast %6 : vector<1x1x128xf32> to vector<1x128xf32>
    %cst = arith.constant dense<0.000000e+00> : vector<32xf32>
    %8 = vector.multi_reduction <add>, %3, %cst [1] : vector<32x128xf32> to vector<32xf32>
    %9 = vector.shape_cast %8 : vector<32xf32> to vector<32x1xf32>
    %cst_8 = arith.constant 1.280000e+02 : f32
    %10 = vector.broadcast %cst_8 : f32 to vector<32x1xf32>
    %11 = arith.divf %9, %10 : vector<32x1xf32>
    %12 = vector.broadcast %11 : vector<32x1xf32> to vector<32x128xf32>
    %13 = arith.subf %3, %12 : vector<32x128xf32>
    %14 = arith.mulf %13, %13 : vector<32x128xf32>
    %cst_9 = arith.constant dense<0.000000e+00> : vector<32xf32>
    %15 = vector.multi_reduction <add>, %14, %cst_9 [1] : vector<32x128xf32> to vector<32xf32>
    %16 = vector.shape_cast %15 : vector<32xf32> to vector<32x1xf32>
    %cst_10 = arith.constant 1.280000e+02 : f32
    %17 = vector.broadcast %cst_10 : f32 to vector<32x1xf32>
    %18 = arith.divf %16, %17 : vector<32x1xf32>
    %19 = vector.broadcast %11 : vector<32x1xf32> to vector<32x128xf32>
    %20 = arith.subf %3, %19 : vector<32x128xf32>
    %cst_11 = arith.constant 9.99999997E-7 : f32
    %21 = vector.broadcast %cst_11 : f32 to vector<32x1xf32>
    %22 = arith.addf %18, %21 : vector<32x1xf32>
    %23 = math.rsqrt %22 : vector<32x1xf32>
    %24 = vector.broadcast %23 : vector<32x1xf32> to vector<32x128xf32>
    %25 = arith.mulf %20, %24 : vector<32x128xf32>
    %26 = vector.broadcast %5 : vector<1x128xf32> to vector<32x128xf32>
    %27 = arith.mulf %25, %26 : vector<32x128xf32>
    %28 = vector.broadcast %7 : vector<1x128xf32> to vector<32x128xf32>
    %29 = arith.addf %27, %28 : vector<32x128xf32>
    %30 = arith.truncf %29 : vector<32x128xf32> to vector<32x128xbf16>
    %c0_12 = arith.constant 0 : index
    %c0_13 = arith.constant 0 : index
    %c0_14 = arith.constant 0 : index
    %31 = vector.load %arg7[%c0_12, %c0_13, %c0_14] : memref<1x128x384xbf16, #tpu.memory_space<vmem>>, vector<1x128x384xbf16>
    %32 = vector.shape_cast %31 : vector<1x128x384xbf16> to vector<128x384xbf16>
    %cst_15 = arith.constant dense<0.000000e+00> : vector<32x384xf32>
    %33 = tpu.matmul %30, %32, %cst_15 {dimension_numbers = #tpu.dot_dimension_numbers<[1], [0], [0], [1], [0, 0, 1, 1], [], []>} : vector<32x128xbf16>, vector<128x384xbf16>, vector<32x384xf32> -> vector<32x384xf32>
    %c0_16 = arith.constant 0 : index
    %c0_17 = arith.constant 0 : index
    %c0_18 = arith.constant 0 : index
    %34 = vector.load %arg8[%c0_16, %c0_17, %c0_18] : memref<1x1x384xf32, #tpu.memory_space<vmem>>, vector<1x1x384xf32>
    %35 = vector.shape_cast %34 : vector<1x1x384xf32> to vector<1x384xf32>
    %36 = vector.broadcast %35 : vector<1x384xf32> to vector<32x384xf32>
    %37 = arith.addf %33, %36 : vector<32x384xf32>
    %38 = vector.extract_strided_slice %37 {offsets = [0, 0], sizes = [32, 128], strides = [1, 1]} : vector<32x384xf32> to vector<32x128xf32>
    %cst_19 = arith.constant 0.176776692 : f32
    %39 = vector.broadcast %cst_19 : f32 to vector<32x128xf32>
    %40 = arith.mulf %38, %39 : vector<32x128xf32>
    %41 = vector.extract_strided_slice %37 {offsets = [0, 128], sizes = [32, 128], strides = [1, 1]} : vector<32x384xf32> to vector<32x128xf32>
    %42 = vector.extract_strided_slice %37 {offsets = [0, 256], sizes = [32, 128], strides = [1, 1]} : vector<32x384xf32> to vector<32x128xf32>
    %43 = arith.truncf %40 : vector<32x128xf32> to vector<32x128xbf16>
    %44 = arith.truncf %41 : vector<32x128xf32> to vector<32x128xbf16>
    %45 = arith.truncf %42 : vector<32x128xf32> to vector<32x128xbf16>
    %c0_20 = arith.constant 0 : index
    %c0_21 = arith.constant 0 : index
    %c0_22 = arith.constant 0 : index
    %46 = vector.load %arg9[%c0_20, %c0_21, %c0_22] : memref<1x1x128xf32, #tpu.memory_space<vmem>>, vector<1x1x128xf32>
    %47 = vector.shape_cast %46 : vector<1x1x128xf32> to vector<1x128xf32>
    %c0_23 = arith.constant 0 : index
    %c0_24 = arith.constant 0 : index
    %c0_25 = arith.constant 0 : index
    %48 = vector.load %arg10[%c0_23, %c0_24, %c0_25] : memref<1x1x128xf32, #tpu.memory_space<vmem>>, vector<1x1x128xf32>
    %49 = vector.shape_cast %48 : vector<1x1x128xf32> to vector<1x128xf32>
    %c0_26 = arith.constant 0 : index
    %c0_27 = arith.constant 0 : index
    %50 = vector.load %arg2[%c0_26, %c0_27] : memref<32x32xf32, #tpu.memory_space<vmem>>, vector<32x32xf32>
    %51 = vector.extract_strided_slice %43 {offsets = [0, 0], sizes = [32, 32], strides = [1, 1]} : vector<32x128xbf16> to vector<32x32xbf16>
    %52 = vector.extract_strided_slice %44 {offsets = [0, 0], sizes = [32, 32], strides = [1, 1]} : vector<32x128xbf16> to vector<32x32xbf16>
    %cst_28 = arith.constant dense<0.000000e+00> : vector<32x32xf32>
    %53 = tpu.matmul %51, %52, %cst_28 {dimension_numbers = #tpu.dot_dimension_numbers<[1], [1], [0], [0], [0, 0, 1, 0], [], []>} : vector<32x32xbf16>, vector<32x32xbf16>, vector<32x32xf32> -> vector<32x32xf32>
    %54 = arith.addf %53, %50 : vector<32x32xf32>
    %55 = vector.extract_strided_slice %40 {offsets = [0, 0], sizes = [32, 32], strides = [1, 1]} : vector<32x128xf32> to vector<32x32xf32>
    %56 = vector.extract_strided_slice %47 {offsets = [0, 0], sizes = [1, 32], strides = [1, 1]} : vector<1x128xf32> to vector<1x32xf32>
    %57 = vector.broadcast %56 : vector<1x32xf32> to vector<32x32xf32>
    %58 = arith.mulf %55, %57 : vector<32x32xf32>
    %cst_29 = arith.constant dense<0.000000e+00> : vector<32xf32>
    %59 = vector.multi_reduction <add>, %58, %cst_29 [1] : vector<32x32xf32> to vector<32xf32>
    %60 = vector.shape_cast %59 : vector<32xf32> to vector<32x1xf32>
    %cst_30 = arith.constant dense<0xFF800000> : vector<32xf32>
    %61 = vector.multi_reduction <maximumf>, %54, %cst_30 [1] : vector<32x32xf32> to vector<32xf32>
    %62 = vector.shape_cast %61 : vector<32xf32> to vector<32x1xf32>
    %63 = arith.maximumf %62, %60 : vector<32x1xf32>
    %64 = vector.broadcast %63 : vector<32x1xf32> to vector<32x32xf32>
    %65 = arith.subf %54, %64 : vector<32x32xf32>
    %66 = math.exp %65 : vector<32x32xf32>
    %67 = arith.subf %60, %63 : vector<32x1xf32>
    %68 = math.exp %67 : vector<32x1xf32>
    %cst_31 = arith.constant dense<0.000000e+00> : vector<32xf32>
    %69 = vector.multi_reduction <add>, %66, %cst_31 [1] : vector<32x32xf32> to vector<32xf32>
    %70 = vector.shape_cast %69 : vector<32xf32> to vector<32x1xf32>
    %71 = arith.addf %70, %68 : vector<32x1xf32>
    %72 = tpu.reciprocal %71 {approx = true} : vector<32x1xf32> -> vector<32x1xf32>
    %73 = arith.truncf %66 : vector<32x32xf32> to vector<32x32xbf16>
    %74 = vector.extract_strided_slice %45 {offsets = [0, 0], sizes = [32, 32], strides = [1, 1]} : vector<32x128xbf16> to vector<32x32xbf16>
    %cst_32 = arith.constant dense<0.000000e+00> : vector<32x32xf32>
    %75 = tpu.matmul %73, %74, %cst_32 {dimension_numbers = #tpu.dot_dimension_numbers<[1], [0], [0], [1], [0, 0, 1, 1], [], []>} : vector<32x32xbf16>, vector<32x32xbf16>, vector<32x32xf32> -> vector<32x32xf32>
    %76 = vector.extract_strided_slice %49 {offsets = [0, 0], sizes = [1, 32], strides = [1, 1]} : vector<1x128xf32> to vector<1x32xf32>
    %77 = vector.broadcast %68 : vector<32x1xf32> to vector<32x32xf32>
    %78 = vector.broadcast %76 : vector<1x32xf32> to vector<32x32xf32>
    %79 = arith.mulf %77, %78 : vector<32x32xf32>
    %80 = arith.addf %75, %79 : vector<32x32xf32>
    %81 = vector.broadcast %72 : vector<32x1xf32> to vector<32x32xf32>
    %82 = arith.mulf %80, %81 : vector<32x32xf32>
    %83 = vector.extract_strided_slice %43 {offsets = [0, 32], sizes = [32, 32], strides = [1, 1]} : vector<32x128xbf16> to vector<32x32xbf16>
    %84 = vector.extract_strided_slice %44 {offsets = [0, 32], sizes = [32, 32], strides = [1, 1]} : vector<32x128xbf16> to vector<32x32xbf16>
    %cst_33 = arith.constant dense<0.000000e+00> : vector<32x32xf32>
    %85 = tpu.matmul %83, %84, %cst_33 {dimension_numbers = #tpu.dot_dimension_numbers<[1], [1], [0], [0], [0, 0, 1, 0], [], []>} : vector<32x32xbf16>, vector<32x32xbf16>, vector<32x32xf32> -> vector<32x32xf32>
    %86 = arith.addf %85, %50 : vector<32x32xf32>
    %87 = vector.extract_strided_slice %40 {offsets = [0, 32], sizes = [32, 32], strides = [1, 1]} : vector<32x128xf32> to vector<32x32xf32>
    %88 = vector.extract_strided_slice %47 {offsets = [0, 32], sizes = [1, 32], strides = [1, 1]} : vector<1x128xf32> to vector<1x32xf32>
    %89 = vector.broadcast %88 : vector<1x32xf32> to vector<32x32xf32>
    %90 = arith.mulf %87, %89 : vector<32x32xf32>
    %cst_34 = arith.constant dense<0.000000e+00> : vector<32xf32>
    %91 = vector.multi_reduction <add>, %90, %cst_34 [1] : vector<32x32xf32> to vector<32xf32>
    %92 = vector.shape_cast %91 : vector<32xf32> to vector<32x1xf32>
    %cst_35 = arith.constant dense<0xFF800000> : vector<32xf32>
    %93 = vector.multi_reduction <maximumf>, %86, %cst_35 [1] : vector<32x32xf32> to vector<32xf32>
    %94 = vector.shape_cast %93 : vector<32xf32> to vector<32x1xf32>
    %95 = arith.maximumf %94, %92 : vector<32x1xf32>
    %96 = vector.broadcast %95 : vector<32x1xf32> to vector<32x32xf32>
    %97 = arith.subf %86, %96 : vector<32x32xf32>
    %98 = math.exp %97 : vector<32x32xf32>
    %99 = arith.subf %92, %95 : vector<32x1xf32>
    %100 = math.exp %99 : vector<32x1xf32>
    %cst_36 = arith.constant dense<0.000000e+00> : vector<32xf32>
    %101 = vector.multi_reduction <add>, %98, %cst_36 [1] : vector<32x32xf32> to vector<32xf32>
    %102 = vector.shape_cast %101 : vector<32xf32> to vector<32x1xf32>
    %103 = arith.addf %102, %100 : vector<32x1xf32>
    %104 = tpu.reciprocal %103 {approx = true} : vector<32x1xf32> -> vector<32x1xf32>
    %105 = arith.truncf %98 : vector<32x32xf32> to vector<32x32xbf16>
    %106 = vector.extract_strided_slice %45 {offsets = [0, 32], sizes = [32, 32], strides = [1, 1]} : vector<32x128xbf16> to vector<32x32xbf16>
    %cst_37 = arith.constant dense<0.000000e+00> : vector<32x32xf32>
    %107 = tpu.matmul %105, %106, %cst_37 {dimension_numbers = #tpu.dot_dimension_numbers<[1], [0], [0], [1], [0, 0, 1, 1], [], []>} : vector<32x32xbf16>, vector<32x32xbf16>, vector<32x32xf32> -> vector<32x32xf32>
    %108 = vector.extract_strided_slice %49 {offsets = [0, 32], sizes = [1, 32], strides = [1, 1]} : vector<1x128xf32> to vector<1x32xf32>
    %109 = vector.broadcast %100 : vector<32x1xf32> to vector<32x32xf32>
    %110 = vector.broadcast %108 : vector<1x32xf32> to vector<32x32xf32>
    %111 = arith.mulf %109, %110 : vector<32x32xf32>
    %112 = arith.addf %107, %111 : vector<32x32xf32>
    %113 = vector.broadcast %104 : vector<32x1xf32> to vector<32x32xf32>
    %114 = arith.mulf %112, %113 : vector<32x32xf32>
    %115 = vector.extract_strided_slice %43 {offsets = [0, 64], sizes = [32, 32], strides = [1, 1]} : vector<32x128xbf16> to vector<32x32xbf16>
    %116 = vector.extract_strided_slice %44 {offsets = [0, 64], sizes = [32, 32], strides = [1, 1]} : vector<32x128xbf16> to vector<32x32xbf16>
    %cst_38 = arith.constant dense<0.000000e+00> : vector<32x32xf32>
    %117 = tpu.matmul %115, %116, %cst_38 {dimension_numbers = #tpu.dot_dimension_numbers<[1], [1], [0], [0], [0, 0, 1, 0], [], []>} : vector<32x32xbf16>, vector<32x32xbf16>, vector<32x32xf32> -> vector<32x32xf32>
    %118 = arith.addf %117, %50 : vector<32x32xf32>
    %119 = vector.extract_strided_slice %40 {offsets = [0, 64], sizes = [32, 32], strides = [1, 1]} : vector<32x128xf32> to vector<32x32xf32>
    %120 = vector.extract_strided_slice %47 {offsets = [0, 64], sizes = [1, 32], strides = [1, 1]} : vector<1x128xf32> to vector<1x32xf32>
    %121 = vector.broadcast %120 : vector<1x32xf32> to vector<32x32xf32>
    %122 = arith.mulf %119, %121 : vector<32x32xf32>
    %cst_39 = arith.constant dense<0.000000e+00> : vector<32xf32>
    %123 = vector.multi_reduction <add>, %122, %cst_39 [1] : vector<32x32xf32> to vector<32xf32>
    %124 = vector.shape_cast %123 : vector<32xf32> to vector<32x1xf32>
    %cst_40 = arith.constant dense<0xFF800000> : vector<32xf32>
    %125 = vector.multi_reduction <maximumf>, %118, %cst_40 [1] : vector<32x32xf32> to vector<32xf32>
    %126 = vector.shape_cast %125 : vector<32xf32> to vector<32x1xf32>
    %127 = arith.maximumf %126, %124 : vector<32x1xf32>
    %128 = vector.broadcast %127 : vector<32x1xf32> to vector<32x32xf32>
    %129 = arith.subf %118, %128 : vector<32x32xf32>
    %130 = math.exp %129 : vector<32x32xf32>
    %131 = arith.subf %124, %127 : vector<32x1xf32>
    %132 = math.exp %131 : vector<32x1xf32>
    %cst_41 = arith.constant dense<0.000000e+00> : vector<32xf32>
    %133 = vector.multi_reduction <add>, %130, %cst_41 [1] : vector<32x32xf32> to vector<32xf32>
    %134 = vector.shape_cast %133 : vector<32xf32> to vector<32x1xf32>
    %135 = arith.addf %134, %132 : vector<32x1xf32>
    %136 = tpu.reciprocal %135 {approx = true} : vector<32x1xf32> -> vector<32x1xf32>
    %137 = arith.truncf %130 : vector<32x32xf32> to vector<32x32xbf16>
    %138 = vector.extract_strided_slice %45 {offsets = [0, 64], sizes = [32, 32], strides = [1, 1]} : vector<32x128xbf16> to vector<32x32xbf16>
    %cst_42 = arith.constant dense<0.000000e+00> : vector<32x32xf32>
    %139 = tpu.matmul %137, %138, %cst_42 {dimension_numbers = #tpu.dot_dimension_numbers<[1], [0], [0], [1], [0, 0, 1, 1], [], []>} : vector<32x32xbf16>, vector<32x32xbf16>, vector<32x32xf32> -> vector<32x32xf32>
    %140 = vector.extract_strided_slice %49 {offsets = [0, 64], sizes = [1, 32], strides = [1, 1]} : vector<1x128xf32> to vector<1x32xf32>
    %141 = vector.broadcast %132 : vector<32x1xf32> to vector<32x32xf32>
    %142 = vector.broadcast %140 : vector<1x32xf32> to vector<32x32xf32>
    %143 = arith.mulf %141, %142 : vector<32x32xf32>
    %144 = arith.addf %139, %143 : vector<32x32xf32>
    %145 = vector.broadcast %136 : vector<32x1xf32> to vector<32x32xf32>
    %146 = arith.mulf %144, %145 : vector<32x32xf32>
    %147 = vector.extract_strided_slice %43 {offsets = [0, 96], sizes = [32, 32], strides = [1, 1]} : vector<32x128xbf16> to vector<32x32xbf16>
    %148 = vector.extract_strided_slice %44 {offsets = [0, 96], sizes = [32, 32], strides = [1, 1]} : vector<32x128xbf16> to vector<32x32xbf16>
    %cst_43 = arith.constant dense<0.000000e+00> : vector<32x32xf32>
    %149 = tpu.matmul %147, %148, %cst_43 {dimension_numbers = #tpu.dot_dimension_numbers<[1], [1], [0], [0], [0, 0, 1, 0], [], []>} : vector<32x32xbf16>, vector<32x32xbf16>, vector<32x32xf32> -> vector<32x32xf32>
    %150 = arith.addf %149, %50 : vector<32x32xf32>
    %151 = vector.extract_strided_slice %40 {offsets = [0, 96], sizes = [32, 32], strides = [1, 1]} : vector<32x128xf32> to vector<32x32xf32>
    %152 = vector.extract_strided_slice %47 {offsets = [0, 96], sizes = [1, 32], strides = [1, 1]} : vector<1x128xf32> to vector<1x32xf32>
    %153 = vector.broadcast %152 : vector<1x32xf32> to vector<32x32xf32>
    %154 = arith.mulf %151, %153 : vector<32x32xf32>
    %cst_44 = arith.constant dense<0.000000e+00> : vector<32xf32>
    %155 = vector.multi_reduction <add>, %154, %cst_44 [1] : vector<32x32xf32> to vector<32xf32>
    %156 = vector.shape_cast %155 : vector<32xf32> to vector<32x1xf32>
    %cst_45 = arith.constant dense<0xFF800000> : vector<32xf32>
    %157 = vector.multi_reduction <maximumf>, %150, %cst_45 [1] : vector<32x32xf32> to vector<32xf32>
    %158 = vector.shape_cast %157 : vector<32xf32> to vector<32x1xf32>
    %159 = arith.maximumf %158, %156 : vector<32x1xf32>
    %160 = vector.broadcast %159 : vector<32x1xf32> to vector<32x32xf32>
    %161 = arith.subf %150, %160 : vector<32x32xf32>
    %162 = math.exp %161 : vector<32x32xf32>
    %163 = arith.subf %156, %159 : vector<32x1xf32>
    %164 = math.exp %163 : vector<32x1xf32>
    %cst_46 = arith.constant dense<0.000000e+00> : vector<32xf32>
    %165 = vector.multi_reduction <add>, %162, %cst_46 [1] : vector<32x32xf32> to vector<32xf32>
    %166 = vector.shape_cast %165 : vector<32xf32> to vector<32x1xf32>
    %167 = arith.addf %166, %164 : vector<32x1xf32>
    %168 = tpu.reciprocal %167 {approx = true} : vector<32x1xf32> -> vector<32x1xf32>
    %169 = arith.truncf %162 : vector<32x32xf32> to vector<32x32xbf16>
    %170 = vector.extract_strided_slice %45 {offsets = [0, 96], sizes = [32, 32], strides = [1, 1]} : vector<32x128xbf16> to vector<32x32xbf16>
    %cst_47 = arith.constant dense<0.000000e+00> : vector<32x32xf32>
    %171 = tpu.matmul %169, %170, %cst_47 {dimension_numbers = #tpu.dot_dimension_numbers<[1], [0], [0], [1], [0, 0, 1, 1], [], []>} : vector<32x32xbf16>, vector<32x32xbf16>, vector<32x32xf32> -> vector<32x32xf32>
    %172 = vector.extract_strided_slice %49 {offsets = [0, 96], sizes = [1, 32], strides = [1, 1]} : vector<1x128xf32> to vector<1x32xf32>
    %173 = vector.broadcast %164 : vector<32x1xf32> to vector<32x32xf32>
    %174 = vector.broadcast %172 : vector<1x32xf32> to vector<32x32xf32>
    %175 = arith.mulf %173, %174 : vector<32x32xf32>
    %176 = arith.addf %171, %175 : vector<32x32xf32>
    %177 = vector.broadcast %168 : vector<32x1xf32> to vector<32x32xf32>
    %178 = arith.mulf %176, %177 : vector<32x32xf32>
    %179 = tpu.concatenate %82, %114, %146, %178 in 1 : vector<32x32xf32>, vector<32x32xf32>, vector<32x32xf32>, vector<32x32xf32> -> vector<32x128xf32>
    %180 = arith.truncf %179 : vector<32x128xf32> to vector<32x128xbf16>
    %c0_48 = arith.constant 0 : index
    %c0_49 = arith.constant 0 : index
    %c0_50 = arith.constant 0 : index
    %181 = vector.load %arg11[%c0_48, %c0_49, %c0_50] : memref<1x128x128xbf16, #tpu.memory_space<vmem>>, vector<1x128x128xbf16>
    %182 = vector.shape_cast %181 : vector<1x128x128xbf16> to vector<128x128xbf16>
    %cst_51 = arith.constant dense<0.000000e+00> : vector<32x128xf32>
    %183 = tpu.matmul %180, %182, %cst_51 {dimension_numbers = #tpu.dot_dimension_numbers<[1], [0], [0], [1], [0, 0, 1, 1], [], []>} : vector<32x128xbf16>, vector<128x128xbf16>, vector<32x128xf32> -> vector<32x128xf32>
    %c0_52 = arith.constant 0 : index
    %c0_53 = arith.constant 0 : index
    %c0_54 = arith.constant 0 : index
    %184 = vector.load %arg12[%c0_52, %c0_53, %c0_54] : memref<1x1x128xf32, #tpu.memory_space<vmem>>, vector<1x1x128xf32>
    %185 = vector.shape_cast %184 : vector<1x1x128xf32> to vector<1x128xf32>
    %186 = vector.broadcast %185 : vector<1x128xf32> to vector<32x128xf32>
    %187 = arith.addf %183, %186 : vector<32x128xf32>
    %188 = arith.addf %3, %187 : vector<32x128xf32>
    %c0_55 = arith.constant 0 : index
    %c0_56 = arith.constant 0 : index
    %c0_57 = arith.constant 0 : index
    %189 = vector.load %arg13[%c0_55, %c0_56, %c0_57] : memref<1x1x128xf32, #tpu.memory_space<vmem>>, vector<1x1x128xf32>
    %190 = vector.shape_cast %189 : vector<1x1x128xf32> to vector<1x128xf32>
    %c0_58 = arith.constant 0 : index
    %c0_59 = arith.constant 0 : index
    %c0_60 = arith.constant 0 : index
    %191 = vector.load %arg14[%c0_58, %c0_59, %c0_60] : memref<1x1x128xf32, #tpu.memory_space<vmem>>, vector<1x1x128xf32>
    %192 = vector.shape_cast %191 : vector<1x1x128xf32> to vector<1x128xf32>
    %cst_61 = arith.constant dense<0.000000e+00> : vector<32xf32>
    %193 = vector.multi_reduction <add>, %188, %cst_61 [1] : vector<32x128xf32> to vector<32xf32>
    %194 = vector.shape_cast %193 : vector<32xf32> to vector<32x1xf32>
    %cst_62 = arith.constant 1.280000e+02 : f32
    %195 = vector.broadcast %cst_62 : f32 to vector<32x1xf32>
    %196 = arith.divf %194, %195 : vector<32x1xf32>
    %197 = vector.broadcast %196 : vector<32x1xf32> to vector<32x128xf32>
    %198 = arith.subf %188, %197 : vector<32x128xf32>
    %199 = arith.mulf %198, %198 : vector<32x128xf32>
    %cst_63 = arith.constant dense<0.000000e+00> : vector<32xf32>
    %200 = vector.multi_reduction <add>, %199, %cst_63 [1] : vector<32x128xf32> to vector<32xf32>
    %201 = vector.shape_cast %200 : vector<32xf32> to vector<32x1xf32>
    %cst_64 = arith.constant 1.280000e+02 : f32
    %202 = vector.broadcast %cst_64 : f32 to vector<32x1xf32>
    %203 = arith.divf %201, %202 : vector<32x1xf32>
    %204 = vector.broadcast %196 : vector<32x1xf32> to vector<32x128xf32>
    %205 = arith.subf %188, %204 : vector<32x128xf32>
    %cst_65 = arith.constant 9.99999997E-7 : f32
    %206 = vector.broadcast %cst_65 : f32 to vector<32x1xf32>
    %207 = arith.addf %203, %206 : vector<32x1xf32>
    %208 = math.rsqrt %207 : vector<32x1xf32>
    %209 = vector.broadcast %208 : vector<32x1xf32> to vector<32x128xf32>
    %210 = arith.mulf %205, %209 : vector<32x128xf32>
    %211 = vector.broadcast %190 : vector<1x128xf32> to vector<32x128xf32>
    %212 = arith.mulf %210, %211 : vector<32x128xf32>
    %213 = vector.broadcast %192 : vector<1x128xf32> to vector<32x128xf32>
    %214 = arith.addf %212, %213 : vector<32x128xf32>
    %215 = arith.truncf %214 : vector<32x128xf32> to vector<32x128xbf16>
    %c0_66 = arith.constant 0 : index
    %c0_67 = arith.constant 0 : index
    %c0_68 = arith.constant 0 : index
    %216 = vector.load %arg15[%c0_66, %c0_67, %c0_68] : memref<1x128x512xbf16, #tpu.memory_space<vmem>>, vector<1x128x512xbf16>
    %217 = vector.shape_cast %216 : vector<1x128x512xbf16> to vector<128x512xbf16>
    %cst_69 = arith.constant dense<0.000000e+00> : vector<32x512xf32>
    %218 = tpu.matmul %215, %217, %cst_69 {dimension_numbers = #tpu.dot_dimension_numbers<[1], [0], [0], [1], [0, 0, 1, 1], [], []>} : vector<32x128xbf16>, vector<128x512xbf16>, vector<32x512xf32> -> vector<32x512xf32>
    %c0_70 = arith.constant 0 : index
    %c0_71 = arith.constant 0 : index
    %c0_72 = arith.constant 0 : index
    %219 = vector.load %arg16[%c0_70, %c0_71, %c0_72] : memref<1x1x512xf32, #tpu.memory_space<vmem>>, vector<1x1x512xf32>
    %220 = vector.shape_cast %219 : vector<1x1x512xf32> to vector<1x512xf32>
    %221 = vector.broadcast %220 : vector<1x512xf32> to vector<32x512xf32>
    %222 = arith.addf %218, %221 : vector<32x512xf32>
    %223 = arith.mulf %222, %222 : vector<32x512xf32>
    %224 = arith.mulf %222, %223 : vector<32x512xf32>
    %cst_73 = arith.constant 4.471500e-02 : f32
    %225 = vector.broadcast %cst_73 : f32 to vector<32x512xf32>
    %226 = arith.mulf %225, %224 : vector<32x512xf32>
    %227 = arith.addf %222, %226 : vector<32x512xf32>
    %cst_74 = arith.constant 0.797884583 : f32
    %228 = vector.broadcast %cst_74 : f32 to vector<32x512xf32>
    %229 = arith.mulf %228, %227 : vector<32x512xf32>
    %230 = math.tanh %229 : vector<32x512xf32>
    %cst_75 = arith.constant 1.000000e+00 : f32
    %231 = vector.broadcast %cst_75 : f32 to vector<32x512xf32>
    %232 = arith.addf %231, %230 : vector<32x512xf32>
    %cst_76 = arith.constant 5.000000e-01 : f32
    %233 = vector.broadcast %cst_76 : f32 to vector<32x512xf32>
    %234 = arith.mulf %233, %232 : vector<32x512xf32>
    %235 = arith.mulf %222, %234 : vector<32x512xf32>
    %236 = arith.truncf %235 : vector<32x512xf32> to vector<32x512xbf16>
    %c0_77 = arith.constant 0 : index
    %c0_78 = arith.constant 0 : index
    %c0_79 = arith.constant 0 : index
    %237 = vector.load %arg17[%c0_77, %c0_78, %c0_79] : memref<1x512x128xbf16, #tpu.memory_space<vmem>>, vector<1x512x128xbf16>
    %238 = vector.shape_cast %237 : vector<1x512x128xbf16> to vector<512x128xbf16>
    %cst_80 = arith.constant dense<0.000000e+00> : vector<32x128xf32>
    %239 = tpu.matmul %236, %238, %cst_80 {dimension_numbers = #tpu.dot_dimension_numbers<[1], [0], [0], [1], [0, 0, 1, 1], [], []>} : vector<32x512xbf16>, vector<512x128xbf16>, vector<32x128xf32> -> vector<32x128xf32>
    %c0_81 = arith.constant 0 : index
    %c0_82 = arith.constant 0 : index
    %c0_83 = arith.constant 0 : index
    %240 = vector.load %arg18[%c0_81, %c0_82, %c0_83] : memref<1x1x128xf32, #tpu.memory_space<vmem>>, vector<1x1x128xf32>
    %241 = vector.shape_cast %240 : vector<1x1x128xf32> to vector<1x128xf32>
    %242 = vector.broadcast %241 : vector<1x128xf32> to vector<32x128xf32>
    %243 = arith.addf %239, %242 : vector<32x128xf32>
    %244 = arith.addf %188, %243 : vector<32x128xf32>
    %c0_84 = arith.constant 0 : index
    %c0_85 = arith.constant 0 : index
    %245 = vector.load %arg19[%c0_84, %c0_85] : memref<32x128xf32, #tpu.memory_space<vmem>>, vector<32x128xf32>
    tpu.vector_store %arg19[%c0_84, %c0_85], %244 {strides = array<i32>} : memref<32x128xf32, #tpu.memory_space<vmem>>, vector<32x128xf32>,
    return
  }
  func.func @transform_0(%arg0: i32) -> (i32, i32) {
    %c0_i32 = arith.constant 0 : i32
    %c0_i32_0 = arith.constant 0 : i32
    %c0_i32_1 = arith.constant 0 : i32
    return %c0_i32, %c0_i32_0 : i32, i32
  }
  func.func @transform_1(%arg0: i32) -> (i32, i32) {
    %c0_i32 = arith.constant 0 : i32
    %c0_i32_0 = arith.constant 0 : i32
    %c0_i32_1 = arith.constant 0 : i32
    return %c0_i32, %c0_i32_0 : i32, i32
  }
  func.func @transform_2(%arg0: i32) -> (i32, i32) {
    %c0_i32 = arith.constant 0 : i32
    %c0_i32_0 = arith.constant 0 : i32
    %c0_i32_1 = arith.constant 0 : i32
    return %c0_i32, %c0_i32_0 : i32, i32
  }
  func.func @transform_3(%arg0: i32) -> (i32, i32) {
    %c0_i32 = arith.constant 0 : i32
    %c0_i32_0 = arith.constant 0 : i32
    %c0_i32_1 = arith.constant 0 : i32
    return %c0_i32, %c0_i32_0 : i32, i32
  }
  func.func @transform_4(%arg0: i32) -> (i32, i32, i32) {
    %c0_i32 = arith.constant 0 : i32
    %c0_i32_0 = arith.constant 0 : i32
    %c0_i32_1 = arith.constant 0 : i32
    return %arg0, %c0_i32, %c0_i32_0 : i32, i32, i32
  }
  func.func @transform_5(%arg0: i32) -> (i32, i32, i32) {
    %c0_i32 = arith.constant 0 : i32
    %c0_i32_0 = arith.constant 0 : i32
    %c0_i32_1 = arith.constant 0 : i32
    return %arg0, %c0_i32, %c0_i32_0 : i32, i32, i32
  }
  func.func @transform_6(%arg0: i32) -> (i32, i32, i32) {
    %c0_i32 = arith.constant 0 : i32
    %c0_i32_0 = arith.constant 0 : i32
    %c0_i32_1 = arith.constant 0 : i32
    return %arg0, %c0_i32, %c0_i32_0 : i32, i32, i32
  }
  func.func @transform_7(%arg0: i32) -> (i32, i32, i32) {
    %c0_i32 = arith.constant 0 : i32
    %c0_i32_0 = arith.constant 0 : i32
    %c0_i32_1 = arith.constant 0 : i32
    return %arg0, %c0_i32, %c0_i32_0 : i32, i32, i32
  }
  func.func @transform_8(%arg0: i32) -> (i32, i32, i32) {
    %c0_i32 = arith.constant 0 : i32
    %c0_i32_0 = arith.constant 0 : i32
    %c0_i32_1 = arith.constant 0 : i32
    return %arg0, %c0_i32, %c0_i32_0 : i32, i32, i32
  }
  func.func @transform_9(%arg0: i32) -> (i32, i32, i32) {
    %c0_i32 = arith.constant 0 : i32
    %c0_i32_0 = arith.constant 0 : i32
    %c0_i32_1 = arith.constant 0 : i32
    return %arg0, %c0_i32, %c0_i32_0 : i32, i32, i32
  }
  func.func @transform_10(%arg0: i32) -> (i32, i32, i32) {
    %c0_i32 = arith.constant 0 : i32
    %c0_i32_0 = arith.constant 0 : i32
    %c0_i32_1 = arith.constant 0 : i32
    return %arg0, %c0_i32, %c0_i32_0 : i32, i32, i32
  }
  func.func @transform_11(%arg0: i32) -> (i32, i32, i32) {
    %c0_i32 = arith.constant 0 : i32
    %c0_i32_0 = arith.constant 0 : i32
    %c0_i32_1 = arith.constant 0 : i32
    return %arg0, %c0_i32, %c0_i32_0 : i32, i32, i32
  }
  func.func @transform_12(%arg0: i32) -> (i32, i32, i32) {
    %c0_i32 = arith.constant 0 : i32
    %c0_i32_0 = arith.constant 0 : i32
    %c0_i32_1 = arith.constant 0 : i32
    return %arg0, %c0_i32, %c0_i32_0 : i32, i32, i32
  }
  func.func @transform_13(%arg0: i32) -> (i32, i32, i32) {
    %c0_i32 = arith.constant 0 : i32
    %c0_i32_0 = arith.constant 0 : i32
    %c0_i32_1 = arith.constant 0 : i32
    return %arg0, %c0_i32, %c0_i32_0 : i32, i32, i32
  }
  func.func @transform_14(%arg0: i32) -> (i32, i32, i32) {
    %c0_i32 = arith.constant 0 : i32
    %c0_i32_0 = arith.constant 0 : i32
    %c0_i32_1 = arith.constant 0 : i32
    return %arg0, %c0_i32, %c0_i32_0 : i32, i32, i32
  }
  func.func @transform_15(%arg0: i32) -> (i32, i32, i32) {
    %c0_i32 = arith.constant 0 : i32
    %c0_i32_0 = arith.constant 0 : i32
    %c0_i32_1 = arith.constant 0 : i32
    return %arg0, %c0_i32, %c0_i32_0 : i32, i32, i32
  }
  func.func @transform_16(%arg0: i32) -> (i32, i32, i32) {
    %c0_i32 = arith.constant 0 : i32
    %c0_i32_0 = arith.constant 0 : i32
    %c0_i32_1 = arith.constant 0 : i32
    return %arg0, %c0_i32, %c0_i32_0 : i32, i32, i32
  }
  func.func @transform_17(%arg0: i32) -> (i32, i32, i32) {
    %c0_i32 = arith.constant 0 : i32
    %c0_i32_0 = arith.constant 0 : i32
    %c0_i32_1 = arith.constant 0 : i32
    return %arg0, %c0_i32, %c0_i32_0 : i32, i32, i32
  }
  func.func @transform_18(%arg0: i32) -> (i32, i32) {
    %c0_i32 = arith.constant 0 : i32
    %c0_i32_0 = arith.constant 0 : i32
    %c0_i32_1 = arith.constant 0 : i32
    return %c0_i32, %c0_i32_0 : i32, i32
  }
}

module attributes {stable_mosaic.version = 11 : i64} {
  func.func @score_heads_kernel(%arg0: memref<2x256xf32, #tpu.memory_space<vmem>>, %arg1: memref<256x128xbf16, #tpu.memory_space<vmem>>, %arg2: memref<1x128xf32, #tpu.memory_space<vmem>>, %arg3: memref<128x2xbf16, #tpu.memory_space<vmem>>, %arg4: memref<1x2xf32, #tpu.memory_space<vmem>>, %arg5: memref<2x2xf32, #tpu.memory_space<vmem>>) attributes {dimension_semantics = [], scalar_prefetch = 0 : i64, scratch_operands = 0 : i64, tpu.core_type = #tpu.core_type<tc>} {
    %c0 = arith.constant 0 : index
    %c0_0 = arith.constant 0 : index
    %0 = vector.load %arg0[%c0, %c0_0] : memref<2x256xf32, #tpu.memory_space<vmem>>, vector<2x256xf32>
    %1 = arith.truncf %0 : vector<2x256xf32> to vector<2x256xbf16>
    %c0_1 = arith.constant 0 : index
    %c0_2 = arith.constant 0 : index
    %2 = vector.load %arg1[%c0_1, %c0_2] : memref<256x128xbf16, #tpu.memory_space<vmem>>, vector<256x128xbf16>
    %cst = arith.constant dense<0.000000e+00> : vector<2x128xf32>
    %3 = tpu.matmul %1, %2, %cst {dimension_numbers = #tpu.dot_dimension_numbers<[1], [0], [0], [1], [0, 0, 1, 1], [], []>} : vector<2x256xbf16>, vector<256x128xbf16>, vector<2x128xf32> -> vector<2x128xf32>
    %c0_3 = arith.constant 0 : index
    %c0_4 = arith.constant 0 : index
    %4 = vector.load %arg2[%c0_3, %c0_4] : memref<1x128xf32, #tpu.memory_space<vmem>>, vector<1x128xf32>
    %5 = vector.broadcast %4 : vector<1x128xf32> to vector<2x128xf32>
    %6 = arith.addf %3, %5 : vector<2x128xf32>
    %cst_5 = arith.constant 0.000000e+00 : f32
    %7 = vector.broadcast %cst_5 : f32 to vector<2x128xf32>
    %8 = arith.maximumf %6, %7 : vector<2x128xf32>
    %9 = arith.truncf %8 : vector<2x128xf32> to vector<2x128xbf16>
    %c0_6 = arith.constant 0 : index
    %c0_7 = arith.constant 0 : index
    %10 = vector.load %arg3[%c0_6, %c0_7] : memref<128x2xbf16, #tpu.memory_space<vmem>>, vector<128x2xbf16>
    %cst_8 = arith.constant dense<0.000000e+00> : vector<2x2xf32>
    %11 = tpu.matmul %9, %10, %cst_8 {dimension_numbers = #tpu.dot_dimension_numbers<[1], [0], [0], [1], [0, 0, 1, 1], [], []>} : vector<2x128xbf16>, vector<128x2xbf16>, vector<2x2xf32> -> vector<2x2xf32>
    %c0_9 = arith.constant 0 : index
    %c0_10 = arith.constant 0 : index
    %12 = vector.load %arg4[%c0_9, %c0_10] : memref<1x2xf32, #tpu.memory_space<vmem>>, vector<1x2xf32>
    %13 = vector.broadcast %12 : vector<1x2xf32> to vector<2x2xf32>
    %14 = arith.addf %11, %13 : vector<2x2xf32>
    %c0_11 = arith.constant 0 : index
    %c0_12 = arith.constant 0 : index
    %15 = vector.load %arg5[%c0_11, %c0_12] : memref<2x2xf32, #tpu.memory_space<vmem>>, vector<2x2xf32>
    tpu.vector_store %arg5[%c0_11, %c0_12], %14 {strides = array<i32>} : memref<2x2xf32, #tpu.memory_space<vmem>>, vector<2x2xf32>,
    return
  }
}

module attributes {stable_mosaic.version = 11 : i64} {
  func.func @matmul_kernel(%arg0: memref<18x128xf32, #tpu.memory_space<vmem>>, %arg1: memref<128x256xbf16, #tpu.memory_space<vmem>>, %arg2: memref<18x256xf32, #tpu.memory_space<vmem>>) attributes {dimension_semantics = [], scalar_prefetch = 0 : i64, scratch_operands = 0 : i64, tpu.core_type = #tpu.core_type<tc>} {
    %c0 = arith.constant 0 : index
    %c0_0 = arith.constant 0 : index
    %0 = vector.load %arg0[%c0, %c0_0] : memref<18x128xf32, #tpu.memory_space<vmem>>, vector<18x128xf32>
    %1 = arith.truncf %0 : vector<18x128xf32> to vector<18x128xbf16>
    %c0_1 = arith.constant 0 : index
    %c0_2 = arith.constant 0 : index
    %2 = vector.load %arg1[%c0_1, %c0_2] : memref<128x256xbf16, #tpu.memory_space<vmem>>, vector<128x256xbf16>
    %cst = arith.constant dense<0.000000e+00> : vector<18x256xf32>
    %3 = tpu.matmul %1, %2, %cst {dimension_numbers = #tpu.dot_dimension_numbers<[1], [0], [0], [1], [0, 0, 1, 1], [], []>} : vector<18x128xbf16>, vector<128x256xbf16>, vector<18x256xf32> -> vector<18x256xf32>
    %c0_3 = arith.constant 0 : index
    %c0_4 = arith.constant 0 : index
    %4 = vector.load %arg2[%c0_3, %c0_4] : memref<18x256xf32, #tpu.memory_space<vmem>>, vector<18x256xf32>
    tpu.vector_store %arg2[%c0_3, %c0_4], %3 {strides = array<i32>} : memref<18x256xf32, #tpu.memory_space<vmem>>, vector<18x256xf32>,
    return
  }
}

</mosaic_0001>

<bundles_post_ra>
// kernel: forward.5
= control target key start
LH: loop header
LB: loop body
LE: loop exit
PB: predicated region body
PF: predicated region fallthrough
CT: control target
= control target key end

     0   :  { %7 = vsyncpa [#allocation3], 0  ;;  %s374_s9 = smov [#allocation2]   ;;  %s407_s0 = inlined_call_operand.vmem [shape: f32[8,256], index: 0, kind: input, shape index: {}]   ;;  %s408_s1 = inlined_call_operand.hbm [shape: bf16[256,256], index: 1, kind: input, shape index: {}]   ;;  %s409_s2 = inlined_call_operand.vmem [shape: f32[8,256], index: 2, kind: output, shape index: {}]  }
   0x1   :  { %s15_s10 = sshll.u32 %s374_s9, 4  ;;  %s16_s10 = int_to_ptr.vmem [resolvable:$true] %s15_s10 }
   0x2   :  { %s360_s11 = scalar_lea.vmem %s16_s10, 4096  ;;  %p365_p1 = scmp.lt.s32.totalorder %s16_s10, %s16_s10 }
   0x3   :  { %p361_p0 = scmp.ne.s32.totalorder %s16_s10, %s360_s11  ;;  %p366_p2 = scmp.lt.s32.totalorder %s360_s11, %s360_s11 }
   0x5   :  { %p367_p3 = por %p366_p2, %p365_p1 }
   0x7   :  { %p368_p4 = pnand %p367_p3, %p361_p0 }
   0x9   :  { %371 = shalt.err (!%p368_p4)
}
   0xa   :  { %s375_s12 = smov 128   ;;  %s376_s13 = smov 8  }
   0xb   :  { %21 = dma.hbm_to_vmem [thread:$0]  %s408_s1, 4096, %s16_s10, [#allocation3], %s375_s12, %s375_s12, %s376_s13  }
   0xc   :  { %372 = dma.done.wait [#allocation3], 4096  }
   0xd   :  { %373 = vsyncadd [#allocation3], 4294963200  ;;  %v304_v0 = vld [vmem:[#allocation2 + $0x74] ss:$8 sps:$4 sm:$0xff]   ;;  %v306_v1 = vld [vmem:[#allocation2 + $0x70] ss:$8 sps:$4 sm:$0xff]  }
   0xe   :  { %221 = vmatprep.subr.bf16.mxu0 %v304_v0  ;;  %v307_v2 = vld [vmem:[#allocation2 + $0x64] ss:$8 sps:$4 sm:$0xff]   ;;  %v309_v3 = vld [vmem:[#allocation2 + $0x60] ss:$8 sps:$4 sm:$0xff]   ;;  %v310_v4 = vld [vmem:[#allocation2 + $0x54] ss:$8 sps:$4 sm:$0xff]  }
   0xf   :  { %222 = vmatpush1.bf16.msra.mxu0 %v306_v1  ;;  %v312_v5 = vld [vmem:[#allocation2 + $0x50] ss:$8 sps:$4 sm:$0xff]   ;;  %v313_v6 = vld [vmem:[#allocation2 + $0x44] ss:$8 sps:$4 sm:$0xff]   ;;  %v315_v7 = vld [vmem:[#allocation2 + $0x40] ss:$8 sps:$4 sm:$0xff]  }
  0x10   :  { %223 = vmatprep.subr.bf16.mxu0 %v307_v2  ;;  %v316_v8 = vld [vmem:[#allocation2 + $0x34] ss:$8 sps:$4 sm:$0xff]   ;;  %v318_v9 = vld [vmem:[#allocation2 + $0x30] ss:$8 sps:$4 sm:$0xff]   ;;  %v319_v10 = vld [vmem:[#allocation2 + $0x24] ss:$8 sps:$4 sm:$0xff]  }
  0x11   :  { %v321_v11 = vld [vmem:[#allocation2 + $0x20] ss:$8 sps:$4 sm:$0xff]   ;;  %v322_v12 = vld [vmem:[#allocation2 + $0x14] ss:$8 sps:$4 sm:$0xff]   ;;  %v324_v15 = vld [vmem:[#allocation2 + $0x10] ss:$8 sps:$4 sm:$0xff]  }
  0x12   :  { %v26_v13 = vld [vmem:[%s407_s0 + $0x8] sm:$0xff]  ;;  %v328_v18 = vld [vmem:[#allocation2 + $0xf4] ss:$8 sps:$4 sm:$0xff]   ;;  %v330_v19 = vld [vmem:[#allocation2 + $0xf0] ss:$8 sps:$4 sm:$0xff]  }
  0x13   :  { %224 = vmatpush1.bf16.msra.mxu0 %v309_v3  ;;  %v28_v14 = vpack.c.bf16 %v26_v13, %v26_v13  ;;  %v325_v16 = vld [vmem:[#allocation2 + $0x4] ss:$8 sps:$4 sm:$0xff]   ;;  %v327_v17 = vld [vmem:[#allocation2] ss:$8 sps:$4 sm:$0xff]   ;;  %v334_v22 = vld [vmem:[#allocation2 + $0xd4] ss:$8 sps:$4 sm:$0xff]  }
  0x14   :  { %225 = vmatprep.subr.bf16.mxu0 %v310_v4  ;;  %v331_v20 = vld [vmem:[#allocation2 + $0xe4] ss:$8 sps:$4 sm:$0xff]   ;;  %v333_v21 = vld [vmem:[#allocation2 + $0xe0] ss:$8 sps:$4 sm:$0xff]   ;;  %v336_v23 = vld [vmem:[#allocation2 + $0xd0] ss:$8 sps:$4 sm:$0xff]  }
  0x15   :  { %253 = vmatprep.mubr.bf16.mxu0 %v28_v14  ;;  %v337_v24 = vld [vmem:[#allocation2 + $0xc4] ss:$8 sps:$4 sm:$0xff]   ;;  %v339_v25 = vld [vmem:[#allocation2 + $0xc0] ss:$8 sps:$4 sm:$0xff]   ;;  %v340_v26 = vld [vmem:[#allocation2 + $0xb4] ss:$8 sps:$4 sm:$0xff]  }
  0x16   :  { %v342_v27 = vld [vmem:[#allocation2 + $0xb0] ss:$8 sps:$4 sm:$0xff]   ;;  %v343_v28 = vld [vmem:[#allocation2 + $0xa4] ss:$8 sps:$4 sm:$0xff]   ;;  %v345_v29 = vld [vmem:[#allocation2 + $0xa0] ss:$8 sps:$4 sm:$0xff]  }
  0x17   :  { %226 = vmatpush1.bf16.msra.mxu0 %v312_v5  ;;  %v346_v30 = vld [vmem:[#allocation2 + $0x94] ss:$8 sps:$4 sm:$0xff]   ;;  %v348_v31 = vld [vmem:[#allocation2 + $0x90] ss:$8 sps:$4 sm:$0xff]   ;;  %v349_v32 = vld [vmem:[#allocation2 + $0x84] ss:$8 sps:$4 sm:$0xff]  }
  0x18   :  { %227 = vmatprep.subr.bf16.mxu0 %v313_v6  ;;  %v351_v33 = vld [vmem:[#allocation2 + $0x80] ss:$8 sps:$4 sm:$0xff]  }
  0x19   :  { %v25_v34 = vld [vmem:[%s407_s0] sm:$0xff] }
  0x1a   :  { %v27_v35 = vpack.c.bf16 %v25_v34, %v25_v34 }
  0x1b   :  { %228 = vmatpush1.bf16.msra.mxu0 %v315_v7 }
  0x1c   :  { %229 = vmatprep.subr.bf16.mxu0 %v316_v8 }
  0x1f   :  { %230 = vmatpush1.bf16.msra.mxu0 %v318_v9 }
  0x20   :  { %231 = vmatprep.subr.bf16.mxu0 %v319_v10 }
  0x23   :  { %232 = vmatpush1.bf16.msra.mxu0 %v321_v11 }
  0x24   :  { %233 = vmatprep.subr.bf16.mxu0 %v322_v12 }
  0x27   :  { %234 = vmatpush1.bf16.msra.mxu0 %v324_v15 }
  0x28   :  { %235 = vmatprep.subr.bf16.mxu0 %v325_v16 }
  0x2b   :  { %236 = vmatpush1.bf16.msra.mxu0 %v327_v17 }
  0x2c   :  { %237 = vmatprep.subr.bf16.mxu0 %v328_v18 }
  0x2f   :  { %238 = vmatpush2.bf16.msra.mxu0 %v330_v19 }
  0x30   :  { %239 = vmatprep.subr.bf16.mxu0 %v331_v20 }
  0x33   :  { %240 = vmatpush2.bf16.msra.mxu0 %v333_v21 }
  0x34   :  { %241 = vmatprep.subr.bf16.mxu0 %v334_v22 }
  0x37   :  { %242 = vmatpush2.bf16.msra.mxu0 %v336_v23 }
  0x38   :  { %243 = vmatprep.subr.bf16.mxu0 %v337_v24 }
  0x3b   :  { %244 = vmatpush2.bf16.msra.mxu0 %v339_v25 }
  0x3c   :  { %245 = vmatprep.subr.bf16.mxu0 %v340_v26 }
  0x3f   :  { %246 = vmatpush2.bf16.msra.mxu0 %v342_v27 }
  0x40   :  { %247 = vmatprep.subr.bf16.mxu0 %v343_v28 }
  0x43   :  { %248 = vmatpush2.bf16.msra.mxu0 %v345_v29 }
  0x44   :  { %249 = vmatprep.subr.bf16.mxu0 %v346_v30 }
  0x47   :  { %250 = vmatpush2.bf16.msra.mxu0 %v348_v31 }
  0x48   :  { %251 = vmatprep.subr.bf16.mxu0 %v349_v32 }
  0x4b   :  { %252 = vmatpush2.bf16.msra.mxu0 %v351_v33 }
  0x4e   :  { %254 = vmatmul.mubr.bf16.vlgmr.msra.gmra.mxu0 %v27_v35 }
 0x10e   :  { %v255_v36 = vpop.f32.mrf.mxu0 }
 0x10f   :  { %262 = vst [vmem:[%s409_s2] sm:$0xff] %v255_v36 }
 0x110   :  { %v257_v37 = vpop.f32.mrf.mxu0 }
 0x111   :  { %263 = vst [vmem:[%s409_s2 + $0x8] sm:$0xff] %v257_v37 }
 0x112   :  { %v259_v38 = vpop.f32.mrf.mxu0 }
 0x114   :  { %v260_v39 = vpop.f32.mrf.mxu0 }
 0x115   :  { %268 = vsyncpa [#allocation3], 1 }

// kernel: forward.8
= control target key start
LH: loop header
LB: loop body
LE: loop exit
PB: predicated region body
PF: predicated region fallthrough
CT: control target
= control target key end

     0   :  { %v433_v1 = vmov 0.0   ;;  %vm434_vm0 = vmmov 0   ;;  %vm323_vm1 = vcmask 9216   ;;  %s558_s1 = inlined_call_operand.vmem [shape: bf16[256,128], index: 1, kind: input, shape index: {}]   ;;  %s559_s0 = inlined_call_operand.vmem [shape: f32[2,256], index: 0, kind: input, shape index: {}]   ;;  %s560_s3 = inlined_call_operand.vmem [shape: bf16[128,2], index: 3, kind: input, shape index: {}]   ;;  %s561_s2 = inlined_call_operand.vmem [shape: f32[1,128], index: 2, kind: input, shape index: {}]   ;;  %s562_s4 = inlined_call_operand.vmem [shape: f32[1,2], index: 4, kind: input, shape index: {}]   ;;  %s563_s5 = inlined_call_operand.vmem [shape: f32[2,2], index: 5, kind: output, shape index: {}]  }
   0x1   :  { %v409_v0 = vld [vmem:[%s558_s1 + $0x78] sm:$0xff]   ;;  %387 = vmatprep.subr.bf16.mxu1 %v433_v1  ;;  %v411_v3 = vld [vmem:[%s558_s1 + $0x70] sm:$0xff]   ;;  %v413_v5 = vld [vmem:[%s558_s1 + $0x68] sm:$0xff]   ;;  %403 = vmatprep.mubr.msk.bf16.mxu1 %vm434_vm0, %v433_v1 }
   0x2   :  { %v410_v2 = vld [vmem:[%s558_s1 + $0x38] sm:$0xff]   ;;  %356 = vmatprep.subr.bf16.mxu0 %v409_v0  ;;  %v412_v4 = vld [vmem:[%s558_s1 + $0x30] sm:$0xff]   ;;  %v414_v6 = vld [vmem:[%s558_s1 + $0x28] sm:$0xff]  }
   0x3   :  { %357 = vmatpush3.bf16.msra.mxu0 %v410_v2  ;;  %v415_v7 = vld [vmem:[%s558_s1 + $0x60] sm:$0xff]   ;;  %v417_v9 = vld [vmem:[%s558_s1 + $0x58] sm:$0xff]   ;;  %v419_v11 = vld [vmem:[%s558_s1 + $0x50] sm:$0xff]  }
   0x4   :  { %358 = vmatprep.subr.bf16.mxu0 %v411_v3  ;;  %v416_v8 = vld [vmem:[%s558_s1 + $0x20] sm:$0xff]   ;;  %v418_v10 = vld [vmem:[%s558_s1 + $0x18] sm:$0xff]   ;;  %v420_v15 = vld [vmem:[%s558_s1 + $0x10] sm:$0xff]  }
   0x5   :  { %v329_v12 = vld.sshfl [vmem:[%s559_s0] sm:$0x33 pattern:$0x76325410]  ;;  %v425_v14 = vld [vmem:[%s560_s3 + $0x38] sm:$0xff]   ;;  %v426_v17 = vld [vmem:[%s560_s3 + $0x30] sm:$0xff]  }
   0x6   :  { %v30_v13 = vcombine.high %v329_v12, %v329_v12  ;;  %388 = vmatpush3.bf16.msra.mxu1 %v425_v14  ;;  %v421_v18 = vld [vmem:[%s558_s1 + $0x48] sm:$0xff]   ;;  %v423_v21 = vld [vmem:[%s558_s1 + $0x40] sm:$0xff]   ;;  %v33_v24 = vpack.c.bf16 %v329_v12, %v329_v12  ;;  %v429_v25 = vld [vmem:[%s560_s3 + $0x18] sm:$0xff]  }
   0x7   :  { %359 = vmatpush3.bf16.msra.mxu0 %v412_v4  ;;  %389 = vmatprep.subr.bf16.mxu1 %v433_v1  ;;  %v422_v19 = vld [vmem:[%s558_s1 + $0x8] sm:$0xff]   ;;  %v424_v22 = vld [vmem:[%s558_s1] sm:$0xff]   ;;  %v430_v26 = vld [vmem:[%s560_s3 + $0x10] sm:$0xff]  }
   0x8   :  { %360 = vmatprep.subr.bf16.mxu0 %v413_v5  ;;  %v34_v16 = vpack.c.bf16 %v30_v13, %v30_v13  ;;  %v427_v20 = vld [vmem:[%s560_s3 + $0x28] sm:$0xff]   ;;  %v428_v23 = vld [vmem:[%s560_s3 + $0x20] sm:$0xff]  }
   0x9   :  { %v431_v27 = vld [vmem:[%s560_s3 + $0x8] sm:$0xff]   ;;  %v432_v28 = vld [vmem:[%s560_s3] sm:$0xff]  }
   0xa   :  { %202 = vmatprep.mubr.bf16.mxu0 %v34_v16  ;;  %390 = vmatpush3.bf16.msra.mxu1 %v426_v17  ;;  %v330_v30 = vld [vmem:[%s561_s2] ss:$0 sm:$0xff] }
   0xb   :  { %361 = vmatpush3.bf16.msra.mxu0 %v414_v6  ;;  %391 = vmatprep.subr.bf16.mxu1 %v433_v1  ;;  %v347_v38 = vld [vmem:[%s562_s4] ss:$0 sm:$0xff] }
   0xc   :  { %362 = vmatprep.subr.bf16.mxu0 %v415_v7 }
   0xe   :  { %392 = vmatpush3.bf16.msra.mxu1 %v427_v20 }
   0xf   :  { %363 = vmatpush3.bf16.msra.mxu0 %v416_v8  ;;  %393 = vmatprep.subr.bf16.mxu1 %v433_v1 }
  0x10   :  { %364 = vmatprep.subr.bf16.mxu0 %v417_v9 }
  0x12   :  { %394 = vmatpush3.bf16.msra.mxu1 %v428_v23 }
  0x13   :  { %365 = vmatpush3.bf16.msra.mxu0 %v418_v10  ;;  %395 = vmatprep.subr.bf16.mxu1 %v433_v1 }
  0x14   :  { %366 = vmatprep.subr.bf16.mxu0 %v419_v11 }
  0x16   :  { %396 = vmatpush3.bf16.msra.mxu1 %v429_v25 }
  0x17   :  { %367 = vmatpush3.bf16.msra.mxu0 %v420_v15  ;;  %397 = vmatprep.subr.bf16.mxu1 %v433_v1 }
  0x18   :  { %368 = vmatprep.subr.bf16.mxu0 %v421_v18 }
  0x1a   :  { %398 = vmatpush3.bf16.msra.mxu1 %v430_v26 }
  0x1b   :  { %369 = vmatpush3.bf16.msra.mxu0 %v422_v19  ;;  %399 = vmatprep.subr.bf16.mxu1 %v433_v1 }
  0x1c   :  { %370 = vmatprep.subr.bf16.mxu0 %v423_v21 }
  0x1e   :  { %400 = vmatpush3.bf16.msra.mxu1 %v431_v27 }
  0x1f   :  { %371 = vmatpush3.bf16.msra.mxu0 %v424_v22  ;;  %401 = vmatprep.subr.bf16.mxu1 %v433_v1 }
  0x22   :  { %203 = vmatmul.mubr.bf16.vlgmr.msra.gmra.mxu0 %v33_v24  ;;  %402 = vmatpush3.bf16.msra.mxu1 %v432_v28 }
  0xe2   :  { %v372_v29 = vpop.f32.mrf.mxu0 }
  0xe4   :  { %v373_v31 = vpop.f32.mrf.mxu0 }
  0xe5   :  { %v374_v32 = vadd.f32 %v373_v31, %v372_v29 }
  0xe6   :  { %v375_v33 = vpop.f32.mrf.mxu0 }
  0xe7   :  { %v205_v34 = vadd.f32 %v374_v32, %v330_v30 }
  0xe8   :  { %v376_v35 = vpop.f32.mrf.mxu0 }
  0xe9   :  { %v210_v36 = vmax.f32 %v205_v34, 0.0 }
  0xeb   :  { %v211_v37 = vpack.c.bf16 %v210_v36, %v210_v36 }
  0xed   :  { %404 = vmatmul.mubr.bf16.vlgmr.msra.gmra.mxu1 %v211_v37 }
 0x1ad   :  { %v317_v39 = vpop.f32.mrf.mxu1 }
 0x1ae   :  { %v318_v40 = vadd.f32 %v347_v38, %v317_v39 }
 0x1af   :  { %v405_v41 = vpop.f32.mrf.mxu1 }
 0x1b0   :  { %324 = vst.msk [vmem:[%s563_s5] sm:$0x3] %vm323_vm1, %v318_v40 }
 0x1b1   :  { %v320_v42 = vpop.f32.mrf.mxu1 }
 0x1b3   :  { %v406_v43 = vpop.f32.mrf.mxu1 }

// kernel: forward.9
= control target key start
LH: loop header
LB: loop body
LE: loop exit
PB: predicated region body
PF: predicated region fallthrough
CT: control target
= control target key end

     0   :  { %v231_v1 = vmov 0   ;;  %s322_s1 = inlined_call_operand.vmem [shape: bf16[128,256], index: 1, kind: input, shape index: {}]   ;;  %s323_s0 = inlined_call_operand.vmem [shape: f32[18,128], index: 0, kind: input, shape index: {}]   ;;  %s324_s2 = inlined_call_operand.vmem [shape: f32[18,256], index: 2, kind: output, shape index: {}]  }
   0x1   :  { %v207_v0 = vld [vmem:[%s322_s1 + $0x74] ss:$8 sps:$4 sm:$0xff]   ;;  %145 = vmatprep.mubr.bf16.mxu0 %v231_v1  ;;  %155 = vmatprep.mubr.bf16.mxu1 %v231_v1  ;;  %v209_v2 = vld [vmem:[%s322_s1 + $0x70] ss:$8 sps:$4 sm:$0xff]   ;;  %v210_v3 = vld [vmem:[%s322_s1 + $0x64] ss:$8 sps:$4 sm:$0xff]  }
   0x2   :  { %113 = vmatprep.subr.bf16.mxu0 %v207_v0  ;;  %190 = vmatprep.subr.bf16.mxu1 %v207_v0  ;;  %v212_v4 = vld [vmem:[%s322_s1 + $0x60] ss:$8 sps:$4 sm:$0xff]   ;;  %v213_v5 = vld [vmem:[%s322_s1 + $0x54] ss:$8 sps:$4 sm:$0xff]   ;;  %v215_v6 = vld [vmem:[%s322_s1 + $0x50] ss:$8 sps:$4 sm:$0xff]  }
   0x3   :  { %114 = vmatpush1.bf16.msra.mxu0 %v209_v2  ;;  %198 = vmatpush1.bf16.msra.mxu1 %v209_v2  ;;  %v216_v7 = vld [vmem:[%s322_s1 + $0x44] ss:$8 sps:$4 sm:$0xff]   ;;  %v218_v8 = vld [vmem:[%s322_s1 + $0x40] ss:$8 sps:$4 sm:$0xff]   ;;  %v219_v9 = vld [vmem:[%s322_s1 + $0x34] ss:$8 sps:$4 sm:$0xff]  }
   0x4   :  { %115 = vmatprep.subr.bf16.mxu0 %v210_v3  ;;  %191 = vmatprep.subr.bf16.mxu1 %v210_v3  ;;  %v221_v10 = vld [vmem:[%s322_s1 + $0x30] ss:$8 sps:$4 sm:$0xff]   ;;  %v222_v11 = vld [vmem:[%s322_s1 + $0x24] ss:$8 sps:$4 sm:$0xff]   ;;  %v224_v12 = vld [vmem:[%s322_s1 + $0x20] ss:$8 sps:$4 sm:$0xff]  }
   0x5   :  { %v225_v13 = vld [vmem:[%s322_s1 + $0x14] ss:$8 sps:$4 sm:$0xff]   ;;  %v227_v14 = vld [vmem:[%s322_s1 + $0x10] ss:$8 sps:$4 sm:$0xff]   ;;  %v228_v15 = vld [vmem:[%s322_s1 + $0x4] ss:$8 sps:$4 sm:$0xff]  }
   0x6   :  { %v230_v16 = vld [vmem:[%s322_s1] ss:$8 sps:$4 sm:$0xff]   ;;  %v14_v19 = vld [vmem:[%s323_s0 + $0x10] sm:$0x3] }
   0x7   :  { %116 = vmatpush1.bf16.msra.mxu0 %v212_v4  ;;  %199 = vmatpush1.bf16.msra.mxu1 %v212_v4  ;;  %v12_v17 = vld [vmem:[%s323_s0] sm:$0xff]  ;;  %v13_v18 = vld [vmem:[%s323_s0 + $0x8] sm:$0xff]  ;;  %v16_v21 = vpack.c.bf16 %v14_v19, %v14_v19 }
   0x8   :  { %117 = vmatprep.subr.bf16.mxu0 %v213_v5  ;;  %192 = vmatprep.subr.bf16.mxu1 %v213_v5  ;;  %v15_v20 = vpack.c.bf16 %v13_v18, %v12_v17 }
   0xb   :  { %118 = vmatpush1.bf16.msra.mxu0 %v215_v6  ;;  %200 = vmatpush1.bf16.msra.mxu1 %v215_v6 }
   0xc   :  { %119 = vmatprep.subr.bf16.mxu0 %v216_v7  ;;  %193 = vmatprep.subr.bf16.mxu1 %v216_v7 }
   0xf   :  { %120 = vmatpush1.bf16.msra.mxu0 %v218_v8  ;;  %201 = vmatpush1.bf16.msra.mxu1 %v218_v8 }
  0x10   :  { %121 = vmatprep.subr.bf16.mxu0 %v219_v9  ;;  %194 = vmatprep.subr.bf16.mxu1 %v219_v9 }
  0x13   :  { %122 = vmatpush1.bf16.msra.mxu0 %v221_v10  ;;  %202 = vmatpush1.bf16.msra.mxu1 %v221_v10 }
  0x14   :  { %123 = vmatprep.subr.bf16.mxu0 %v222_v11  ;;  %195 = vmatprep.subr.bf16.mxu1 %v222_v11 }
  0x17   :  { %124 = vmatpush1.bf16.msra.mxu0 %v224_v12  ;;  %203 = vmatpush1.bf16.msra.mxu1 %v224_v12 }
  0x18   :  { %125 = vmatprep.subr.bf16.mxu0 %v225_v13  ;;  %196 = vmatprep.subr.bf16.mxu1 %v225_v13 }
  0x1b   :  { %126 = vmatpush1.bf16.msra.mxu0 %v227_v14  ;;  %204 = vmatpush1.bf16.msra.mxu1 %v227_v14 }
  0x1c   :  { %127 = vmatprep.subr.bf16.mxu0 %v228_v15  ;;  %197 = vmatprep.subr.bf16.mxu1 %v228_v15 }
  0x1f   :  { %128 = vmatpush1.bf16.msra.mxu0 %v230_v16  ;;  %205 = vmatpush1.bf16.msra.mxu1 %v230_v16 }
  0x22   :  { %146 = vmatmul.mubr.bf16.vlgmr.msra.gmra.mxu0 %v15_v20  ;;  %156 = vmatmul.mubr.bf16.vlgmr.msra.gmra.mxu1 %v16_v21 }
  0xe2   :  { %v147_v22 = vpop.f32.mrf.mxu0  ;;  %v157_v23 = vpop.f32.mrf.mxu1 }
  0xe3   :  { %164 = vst [vmem:[%s324_s2] sm:$0xff] %v147_v22  ;;  %168 = vst [vmem:[%s324_s2 + $0x20] sm:$0x3] %v157_v23 }
  0xe4   :  { %v149_v24 = vpop.f32.mrf.mxu0  ;;  %v159_v25 = vpop.f32.mrf.mxu1 }
  0xe5   :  { %165 = vst [vmem:[%s324_s2 + $0x8] sm:$0xff] %v149_v24  ;;  %169 = vst [vmem:[%s324_s2 + $0x28] sm:$0x3] %v159_v25 }
  0xe6   :  { %v151_v26 = vpop.f32.mrf.mxu0  ;;  %v161_v27 = vpop.f32.mrf.mxu1 }
  0xe7   :  { %166 = vst [vmem:[%s324_s2 + $0x10] sm:$0xff] %v151_v26 }
  0xe8   :  { %v153_v28 = vpop.f32.mrf.mxu0  ;;  %v162_v29 = vpop.f32.mrf.mxu1 }
  0xe9   :  { %167 = vst [vmem:[%s324_s2 + $0x18] sm:$0xff] %v153_v28 }

// kernel: forward.6
= control target key start
LH: loop header
LB: loop body
LE: loop exit
PB: predicated region body
PF: predicated region fallthrough
CT: control target
= control target key end

     0   :  { %s4529_s0 = inlined_call_operand.vmem [shape: f32[16,128], index: 0, kind: input, shape index: {}]   ;;  %s4530_s1 = inlined_call_operand.vmem [shape: f32[16,16], index: 1, kind: input, shape index: {}]   ;;  %s4531_s2 = inlined_call_operand.vmem [shape: f32[1,128], index: 2, kind: input, shape index: {}]   ;;  %s4532_s3 = inlined_call_operand.hbm [shape: f32[1,128], index: 3, kind: input, shape index: {}]   ;;  %s4533_s4 = inlined_call_operand.vmem [shape: f32[2,1,128], index: 4, kind: input, shape index: {}]   ;;  %s4534_s5 = inlined_call_operand.vmem [shape: f32[2,1,128], index: 5, kind: input, shape index: {}]   ;;  %s4535_s6 = inlined_call_operand.vmem [shape: bf16[2,128,384], index: 6, kind: input, shape index: {}]   ;;  %s4536_s7 = inlined_call_operand.vmem [shape: f32[2,1,384], index: 7, kind: input, shape index: {}]   ;;  %s4537_s8 = inlined_call_operand.vmem [shape: f32[2,1,128], index: 8, kind: input, shape index: {}]   ;;  %s4538_s9 = inlined_call_operand.vmem [shape: f32[2,1,128], index: 9, kind: input, shape index: {}]   ;;  %s4539_s10 = inlined_call_operand.hbm [shape: bf16[2,128,128], index: 10, kind: input, shape index: {}]   ;;  %s4540_s11 = inlined_call_operand.vmem [shape: f32[2,1,128], index: 11, kind: input, shape index: {}]   ;;  %s4541_s12 = inlined_call_operand.vmem [shape: f32[2,1,128], index: 12, kind: input, shape index: {}]   ;;  %s4542_s13 = inlined_call_operand.vmem [shape: f32[2,1,128], index: 13, kind: input, shape index: {}]   ;;  %s4543_s14 = inlined_call_operand.hbm [shape: bf16[2,128,512], index: 14, kind: input, shape index: {}]   ;;  %s4544_s15 = inlined_call_operand.vmem [shape: f32[2,1,512], index: 15, kind: input, shape index: {}]   ;;  %s4545_s16 = inlined_call_operand.hbm [shape: bf16[2,512,128], index: 16, kind: input, shape index: {}]   ;;  %s4546_s17 = inlined_call_operand.vmem [shape: f32[2,1,128], index: 17, kind: input, shape index: {}]   ;;  %s4547_s18 = inlined_call_operand.vmem [shape: f32[16,128], index: 18, kind: output, shape index: {}]  }
   0x1   :  { %4564 = sst [smem:[#allocation17_spill]] %s4529_s0 }
   0x2   :  { %4565 = sst [smem:[#allocation18_spill]] %s4530_s1 }
   0x3   :  { %4566 = sst [smem:[#allocation19_spill]] %s4531_s2 }
   0x4   :  { %4567 = sst [smem:[#allocation20_spill]] %s4532_s3 }
   0x5   :  { %4568 = sst [smem:[#allocation21_spill]] %s4535_s6 }
   0x6   :  { %4569 = sst [smem:[#allocation22_spill]] %s4539_s10 }
   0x7   :  { %4570 = sst [smem:[#allocation23_spill]] %s4541_s12 }
   0x8   :  { %4571 = sst [smem:[#allocation24_spill]] %s4542_s13 }
   0x9   :  { %4572 = sst [smem:[#allocation25_spill]] %s4543_s14 }
   0xa   :  { %4573 = sst [smem:[#allocation26_spill]] %s4544_s15 }
   0xb   :  { %4574 = sst [smem:[#allocation27_spill]] %s4545_s16 }
   0xc   :  { %4575 = sst [smem:[#allocation28_spill]] %s4546_s17 }
   0xd   :  { %4576 = sst [smem:[#allocation29_spill]] %s4547_s18 }
   0xe   :  { %23 = vsyncpa [#allocation3], 0 }
   0xf   :  { %24 = vsyncpa [#allocation5], 0 }
  0x10   :  { %26 = vsyncpa [#allocation5 + $0x1], 0 }
  0x11   :  { %27 = vsyncpa [#allocation8], 0 }
  0x12   :  { %29 = vsyncpa [#allocation8 + $0x1], 0  ;;  %s3782_s27 = smov 0   ;;  %s3784_s28 = smov 0  }
  0x13   :  { %s3786_s29 = smov 0   ;;  %s3788_s30 = smov 0  }
  0x14 LB: > { %4577 = sst [smem:[#allocation12_spill]] %s3663_s28  ;;  %s3803_s0 = sadd.s32 1, %s3671_s30   ;;  %s3671_s30 = sphi %s3788_s30, %s4619_s30   ;;  %s3667_s29 = sphi %s3786_s29, %s4622_s29   ;;  %s3663_s28 = sphi %s3784_s28, %s4621_s28   ;;  %s3659_s27 = sphi %s3782_s27, %s4620_s27  }
  0x15   : > { %4578 = sst [smem:[#allocation13_spill]] %s3667_s29  ;;  %s282_s19 = sadd.s32 1, %s3667_s29 }
  0x16   : > { %4579 = sst [smem:[#allocation14_spill]] %s3803_s0  ;;  %s279_s1 = ssub.s32 %s3671_s30, %s3803_s0 }
  0x17   : > { %p289_p0 = scmp.ne.s32.totalorder %s3667_s29, %s3663_s28  ;;  %p280_p1 = scmp.eq.s32.totalorder %s279_s1, 0 }
  0x18   : > { %p290_p2 = scmp.eq.s32.totalorder %s3671_s30, 0  ;;  %p3261_p3 = scmp.lt.s32.totalorder %s3671_s30, 2 }
  0x19   : > { %s3813_s20 = scalar_select %p280_p1, %s3667_s29, %s282_s19  }
  0x1a   : > { %p291_p4 = por %p290_p2, %p289_p0  ;;  %s581_s21 = sand.u32 1, %s3671_s30  }
  0x1b   : > { %4580 = sst [smem:[#allocation15_spill]] %s3813_s20  ;;  %s3817_s22 = sand.u32 1, %s3667_s29  }
  0x1c   : > { %s2932_s2 = sshll.u32 %s3817_s22, 6  ;;  %s3065_s23 = sshll.u32 %s3671_s30, 10 }
  0x1d   : > { %s4581_s10 = sld [smem:[#allocation22_spill]]  ;;  %s585_s1 = scalar_lea.vmem [#allocation4], %s2932_s2 }
  0x1e   : > { %s592_s0 = sshll.u32 %s585_s1, 4  ;;  %p3826_p5 = pnand %p3261_p3, %p291_p4  ;;  %s3830_s0 = int_to_ptr.vmem [resolvable:$true] %s592_s0 }
  0x1f   : > { %s3832_s20 = scalar_lea.sflag [#allocation5], %s581_s21 }
  0x20   : > { %p3838_p7 = pneg %p3826_p5 }
  0x23   : > { %s3824_s26 = scalar_lea.hbm %s4581_s10, %s3065_s23  ;;  %s3524_s25 = scalar_lea.hbm %s4581_s10, 2048 }
  0x24   : > { %s3519_s29 = scalar_lea.hbm %s3824_s26, 1024  ;;  %p3525_p10 = scmp.lt.s32.totalorder %s3824_s26, %s4581_s10 }
  0x25   : > { %p3520_p6 = scmp.ne.s32.totalorder %s3824_s26, %s3519_s29  ;;  %p3526_p11 = scmp.lt.s32.totalorder %s3524_s25, %s3519_s29 }
  0x27   : > { %p3522_p8 = pnand %p3838_p7, %p3520_p6  ;;  %p3527_p12 = por %p3526_p11, %p3525_p10 }
  0x29   : > { %p3523_p9 = pneg %p3522_p8 }
  0x2b   : > { %p3528_p13 = pnand %p3527_p12, %p3523_p9 }
  0x2d   : > { %3531 = shalt.err (!%p3528_p13)
}
  0x2e   : > { %s3532_s21 = scalar_lea.vmem %s3830_s0, 1024  ;;  %s3673_s17 = smov [#allocation4]  }
  0x2f   : > { %p3533_p0 = scmp.ne.s32.totalorder %s3830_s0, %s3532_s21  ;;  %s3537_s2 = sshll.u32 %s3673_s17, 4  ;;  %s3538_s2 = int_to_ptr.vmem [resolvable:$false] %s3537_s2 }
  0x30   : > { %s3539_s24 = scalar_lea.vmem %s3538_s2, 2048  ;;  %p3540_p3 = scmp.lt.s32.totalorder %s3830_s0, %s3538_s2 }
  0x31   : > { %p3535_p1 = pnand %p3533_p0, %p3838_p7  ;;  %p3541_p4 = scmp.lt.s32.totalorder %s3539_s24, %s3532_s21 }
  0x33   : > { %p3536_p2 = pneg %p3535_p1  ;;  %p3542_p6 = por %p3541_p4, %p3540_p3 }
  0x35   : > { %p3543_p8 = pnand %p3542_p6, %p3536_p2 }
  0x37   : > { %3546 = shalt.err (!%p3543_p8)
}
  0x38   : > { %s4555_s18 = smov 64   ;;  %s4556_s17 = smov 4  }
  0x39   : > { %3253 = dma.hbm_to_vmem [thread:$0]  (!%p3826_p5), %s3824_s26, 1024, %s3830_s0, %s3832_s20, %s4555_s18, %s4555_s18, %s4556_s17  }
  0x3a   : > { %s3865_s29 = sadd.s32 4294967295, %s3671_s30   ;;  %p295_p10 = scmp.ne.s32.totalorder %s3663_s28, %s3659_s27 }
  0x3b   : > { %p4558_p9 = scmp.eq.s32.totalorder %s3865_s29, 0  ;;  %p2929_p11 = scmp.ge.s32.totalorder %s3671_s30, 1 }
  0x3c   : > { %p509_p12 = scmp.lt.s32.totalorder %s3671_s30, 3  ;;  %s3676_s0 = smov [#allocation2]  }
  0x3d   : > { %p3875_p0 = por %p4558_p9, %p295_p10  ;;  %s531_s26 = sshll.u32 %s3676_s0, 4  ;;  %s532_s26 = int_to_ptr.vmem [resolvable:$true] %s531_s26 }
  0x3e   : > { %p3879_p1 = pnand %p2929_p11, %p509_p12  ;;  %s4557_s21 = sshll.u32 %s3817_s22, 8 }
  0x3f   : > { %s4584_s25 = scalar_select %p3875_p0, 1, 0 }
  0x40   : > { %s4585_s1 = scalar_select %p3879_p1, 1, 0 }
  0x41   : > { %p3246_p2 = pneg %p3879_p1  ;;  %s4559_s27 = sshll.u32 %s3671_s30, 12 }
  0x42   : > { %s624_s2 = scalar_lea.vmem [#allocation6], %s4557_s21  ;;  %s4587_s14 = sld [smem:[#allocation25_spill]] }
  0x43   : > { %s631_s24 = sshll.u32 %s624_s2, 4  ;;  %p3891_p3 = pnand %p3246_p2, %p4558_p9  ;;  %s3902_s24 = int_to_ptr.vmem [resolvable:$true] %s631_s24 }
  0x44   : > { %s3558_s0 = scalar_lea.vmem %s532_s26, 16  ;;  %s3565_s2 = scalar_lea.vmem %s532_s26, 32 }
  0x45   : > { %p3549_p4 = pneg %p3891_p3  ;;  %p3559_p6 = scmp.ne.s32.totalorder %s532_s26, %s3558_s0 }
  0x46   : > { %p3566_p11 = scmp.lt.s32.totalorder %s532_s26, %s532_s26  ;;  %p3567_p12 = scmp.lt.s32.totalorder %s3565_s2, %s3558_s0 }
  0x47   : > { %p3561_p8 = pnand %p3559_p6, %p3549_p4 }
  0x48   : > { %s3900_s15 = scalar_lea.hbm %s4587_s14, %s4559_s27  ;;  %p3568_p2 = por %p3567_p12, %p3566_p11 }
  0x49   : > { %p3562_p10 = pneg %p3561_p8 }
  0x4b   : > { %p3569_p13 = pnand %p3568_p2, %p3562_p10 }
  0x4d   : > { %3572 = shalt.err (!%p3569_p13)
}
  0x4e   : > { %s4588_s3 = sld [smem:[#allocation20_spill]]  ;;  %s3573_s21 = scalar_lea.hbm %s3900_s15, 4096 }
  0x4f   : > { %p3574_p9 = scmp.ne.s32.totalorder %s3900_s15, %s3573_s21  ;;  %s3578_s2 = scalar_lea.hbm %s4587_s14, 8192 }
  0x50   : > { %p3579_p13 = scmp.lt.s32.totalorder %s3900_s15, %s4587_s14  ;;  %p3580_p8 = scmp.lt.s32.totalorder %s3578_s2, %s3573_s21 }
  0x51   : > { %p3576_p4 = pnand %p3574_p9, %p3838_p7 }
  0x52   : > { %p3581_p10 = por %p3580_p8, %p3579_p13 }
  0x53   : > { %p3577_p6 = pneg %p3576_p4 }
  0x54   : > { %3249 = dma.hbm_to_vmem [thread:$0]  (!%p3891_p3), %s4588_s3, 16, %s532_s26, [#allocation3]  }
  0x55   : > { %p3582_p11 = pnand %p3581_p10, %p3577_p6 }
  0x57   : > { %3585 = shalt.err (!%p3582_p11)
}
  0x58   : > { %s3586_s18 = scalar_lea.vmem %s3902_s24, 4096  ;;  %s3677_s26 = smov [#allocation6]  }
  0x59   : > { %p3587_p3 = scmp.ne.s32.totalorder %s3902_s24, %s3586_s18  ;;  %s3591_s27 = sshll.u32 %s3677_s26, 4  ;;  %s3592_s27 = int_to_ptr.vmem [resolvable:$false] %s3591_s27 }
  0x5a   : > { %s3593_s10 = scalar_lea.vmem %s3592_s27, 8192  ;;  %p3594_p2 = scmp.lt.s32.totalorder %s3902_s24, %s3592_s27 }
  0x5b   : > { %p3589_p9 = pnand %p3587_p3, %p3838_p7  ;;  %p3595_p4 = scmp.lt.s32.totalorder %s3593_s10, %s3586_s18 }
  0x5d   : > { %p3590_p12 = pneg %p3589_p9  ;;  %p3596_p0 = por %p3595_p4, %p3594_p2 }
  0x5f   : > { %p3597_p1 = pnand %p3596_p0, %p3590_p12 }
  0x61   : > { %3600 = shalt.err (!%p3597_p1)
}
  0x62   : > { %s3678_s12 = smov 256   ;;  %s3679_s13 = smov 16  }
  0x63   : > { %3256 = dma.hbm_to_vmem [thread:$0]  (!%p3826_p5), %s3900_s15, 4096, %s3902_s24, %s3832_s20, %s3678_s12, %s3678_s12, %s3679_s13  }
  0x64   : > { %s4589_s21 = sshll.u32 %s3671_s30, 12  ;;  %s4590_s16 = sld [smem:[#allocation27_spill]] }
  0x65   : > { %s4591_s18 = sshll.u32 %s3817_s22, 8  ;;  %s649_s10 = scalar_lea.sflag [#allocation8], %s3817_s22 }
  0x66   : > { %s652_s26 = scalar_lea.vmem [#allocation7], %s4591_s18 }
  0x67   : > { %s659_s27 = sshll.u32 %s652_s26, 4  ;;  %s3941_s27 = int_to_ptr.vmem [resolvable:$true] %s659_s27 }
  0x6a   : > { %s3937_s2 = scalar_lea.hbm %s4590_s16, %s4589_s21  ;;  %s3606_s20 = scalar_lea.hbm %s4590_s16, 8192 }
  0x6b   : > { %s3601_s3 = scalar_lea.hbm %s3937_s2, 4096  ;;  %p3607_p13 = scmp.lt.s32.totalorder %s3937_s2, %s4590_s16 }
  0x6c   : > { %p3602_p0 = scmp.ne.s32.totalorder %s3937_s2, %s3601_s3  ;;  %p3608_p8 = scmp.lt.s32.totalorder %s3606_s20, %s3601_s3 }
  0x6e   : > { %p3604_p1 = pnand %p3602_p0, %p3838_p7  ;;  %p3609_p10 = por %p3608_p8, %p3607_p13 }
  0x70   : > { %p3605_p6 = pneg %p3604_p1 }
  0x72   : > { %p3610_p11 = pnand %p3609_p10, %p3605_p6 }
  0x74   : > { %3613 = shalt.err (!%p3610_p11)
}
  0x75   : > { %s3614_s22 = scalar_lea.vmem %s3941_s27, 4096  ;;  %s3680_s13 = smov [#allocation7]  }
  0x76   : > { %p3615_p3 = scmp.ne.s32.totalorder %s3941_s27, %s3614_s22  ;;  %s3619_s21 = sshll.u32 %s3680_s13, 4  ;;  %s3620_s21 = int_to_ptr.vmem [resolvable:$false] %s3619_s21 }
  0x77   : > { %s3621_s17 = scalar_lea.vmem %s3620_s21, 8192  ;;  %p3622_p2 = scmp.lt.s32.totalorder %s3941_s27, %s3620_s21 }
  0x78   : > { %p3617_p9 = pnand %p3615_p3, %p3838_p7  ;;  %p3623_p4 = scmp.lt.s32.totalorder %s3621_s17, %s3614_s22 }
  0x7a   : > { %p3618_p12 = pneg %p3617_p9  ;;  %p3624_p0 = por %p3623_p4, %p3622_p2 }
  0x7c   : > { %p3625_p1 = pnand %p3624_p0, %p3618_p12 }
  0x7e   : > { %3628 = shalt.err (!%p3625_p1)
}
  0x7f   : > { %s4592_s3 = smov 4   ;;  %s4593_s0 = smov 64  }
  0x80   : > { %3259 = dma.hbm_to_vmem [thread:$0]  (!%p3826_p5), %s3937_s2, 4096, %s3941_s27, %s649_s10, %s4593_s0, %s4593_s0, %s4592_s3  }
  0x81   : > { %p4594_p7 = scmp.ne.s32.totalorder %s4585_s1, 0 }
  0x83   : > { %677 = sbr.rel (%p4594_p7) target bundleno = 3023 (0xbcf), region = 92 }
  0x88   : > { %p4595_p6 = scmp.eq.s32.totalorder %s3865_s29, 0 }
  0x8a   : > { %3646 = dma.done.wait (%p4595_p6), [#allocation3], 16   ;;  %p4596_p13 = pmov %p4595_p6 }
  0x8b   : > { %s683_s23 = sand.u32 1, %s3865_s29   ;;  %s685_s19 = sand.u32 1, %s3663_s28  }
  0x8c   : > { %3648 = vsyncadd (%p4596_p13), [#allocation3], 4294967280  ;;  %s2943_s18 = sshll.u32 %s685_s19, 6  ;;  %s684_s26 = scalar_lea.sflag [#allocation5], %s683_s23 }
  0x8d   : > { %s3975_s15 = scalar_lea.vmem [#allocation4], %s2943_s18  ;;  %p4597_p8 = scmp.ne.s32.totalorder %s4584_s25, 0 }
  0x8f   : > { %3650 = dma.done.wait (%p4597_p8), %s684_s26, 5120  }
  0x90   : > { %3652 = vsyncadd (%p4597_p8), %s684_s26, 4294962176  ;;  %s2944_s1 = sshll.u32 %s685_s19, 8  ;;  %s702_s27 = scalar_lea.sflag [#allocation8], %s685_s19 }
  0x91   : > { %s3981_s2 = scalar_lea.vmem [#allocation6], %s2944_s1  ;;  %s3983_s10 = scalar_lea.vmem [#allocation7], %s2944_s1 }
  0x92   : > { %4598 = sst [smem:[#allocation16_spill]] %s3983_s10 }
  0x93   : > { %3654 = dma.done.wait (%p4597_p8), %s702_s27, 4096  }
  0x94   : > { %3656 = vsyncadd (%p4597_p8), %s702_s27, 4294963200  ;;  %p800_p5 = scmp.lt.s32.totalorder %s3865_s29, 1  ;;  %s4599_s6 = sld [smem:[#allocation21_spill]] }
  0x95   : > { %s4600_s0 = sld [smem:[#allocation23_spill]]  ;;  %p4604_p10 = scmp.ne.s32.totalorder %s3865_s29, 0 }
  0x96   : > { %s3991_s30 = scalar_select %p800_p5, %s3865_s29, 1 }
  0x97   : > { %s4601_s26 = sld [smem:[#allocation24_spill]] }
  0x98   : > { %s3234_s21 = smul.u32 192, %s3991_s30  ;;  %s2947_s1 = sshll.u32 %s3991_s30, 2 }
  0x99   : > { %s3235_s23 = smul.u32 3, %s3991_s30  ;;  %s4603_s12 = sld [smem:[#allocation28_spill]] }
  0x9a   : > { %s4014_s20 = scalar_lea.vmem %s4599_s6, %s3234_s21  ;;  %s4602_s6 = sld [smem:[#allocation26_spill]] }
  0x9b   : > { %s4023_s14 = scalar_lea.vmem %s4536_s7, %s3235_s23  ;;  %s826_s16 = scalar_lea.vmem %s4600_s0, %s3991_s30 }
  0x9c   : > { %841 = sbr.rel (%p4604_p10) target bundleno = 474 (0x1da), region = 112  ;;  %s4605_s0 = sld [smem:[#allocation17_spill]] (!%p4604_p10) }
  0x9d   : > { %s829_s28 = scalar_lea.vmem %s4601_s26, %s3991_s30  ;;  %s4607_s18 = sld [smem:[#allocation29_spill]] (!%p4604_p10) }
  0x9f   : > { %s836_s13 = scalar_lea.vmem %s4603_s12, %s3991_s30  ;;  %s4606_s12 = sld [smem:[#allocation19_spill]] (!%p4604_p10) }
  0xa0   : > { %s4037_s10 = scalar_lea.vmem %s4602_s6, %s2947_s1 }
  0xa1   : > { %v2950_v19 = vld [vmem:[#allocation2] ss:$0 sm:$0xff] }
  0xa2   : > { %v842_v0 = vld [vmem:[%s4605_s0] sm:$0xff]  ;;  %v843_v1 = vld [vmem:[%s4605_s0 + $0x8] sm:$0xff] }
  0xa3   : > { %846 = vadd.xlane.f32.xlu0 %v842_v0 }
  0xa5   : > { %v2949_v17 = vld [vmem:[%s4606_s12] ss:$0 sm:$0xff] }
  0xa7   : > { %848 = vadd.xlane.f32.xlu0 %v843_v1 }
 0x12c   : > { %v847_v2 = vpop.xlane.xlu0 %846 }
 0x12d   : > { %v851_v3 = vmul.f32 0.0078125, %v847_v2 }
 0x12f   : > { %v853_v4 = vsub.f32 %v842_v0, %v851_v3 }
 0x130   : > { %v849_v5 = vpop.xlane.xlu0 %848 }
 0x131   : > { %v852_v6 = vmul.f32 0.0078125, %v849_v5  ;;  %v855_v7 = vmul.f32 %v853_v4, %v853_v4 }
 0x133   : > { %v854_v8 = vsub.f32 %v843_v1, %v852_v6  ;;  %857 = vadd.xlane.f32.xlu1 %v855_v7 }
 0x135   : > { %v856_v9 = vmul.f32 %v854_v8, %v854_v8 }
 0x137   : > { %859 = vadd.xlane.f32.xlu1 %v856_v9 }
 0x1bc   : > { %v858_v10 = vpop.xlane.xlu1 %857 }
 0x1bd   : > { %v861_v11 = vmul.f32 0.0078125, %v858_v10 }
 0x1bf   : > { %v863_v12 = vadd.f32 1e-06, %v861_v11 }
 0x1c0   : > { %v860_v13 = vpop.xlane.xlu1 %859 }
 0x1c1   : > { %3306 = vrsqrt.f32 %v863_v12  ;;  %v862_v14 = vmul.f32 0.0078125, %v860_v13 }
 0x1c3   : > { %v864_v15 = vadd.f32 1e-06, %v862_v14 }
 0x1c5   : > { %3308 = vrsqrt.f32 %v864_v15 }
 0x1ce   : > { %v3307_v16 = vpop.eup %3306 }
 0x1cf   : > { %v867_v18 = vmul.f32 %v3307_v16, %v853_v4 }
 0x1d1   : > { %v875_v20 = vmul.f32 %v2949_v17, %v867_v18 }
 0x1d2   : > { %v3309_v21 = vpop.eup %3308 }
 0x1d3   : > { %v883_v22 = vadd.f32 %v2950_v19, %v875_v20  ;;  %v868_v23 = vmul.f32 %v3309_v21, %v854_v8 }
 0x1d5   : > { %885 = vst [vmem:[%s4607_s18] sm:$0xff] %v883_v22  ;;  %v876_v24 = vmul.f32 %v2949_v17, %v868_v23 }
 0x1d7   : > { %v884_v25 = vadd.f32 %v2950_v19, %v876_v24 }
 0x1d9   : > { %886 = vst [vmem:[%s4607_s18 + $0x8] sm:$0xff] %v884_v25 }
 0x1da PF: > { %s4608_s24 = sld [smem:[#allocation29_spill]]  ;;  %v3325_v28 = vld [vmem:[%s4014_s20 + $0xac] ss:$12 sps:$4 sm:$0xff]   ;;  %v3327_v29 = vld [vmem:[%s4014_s20 + $0xa8] ss:$12 sps:$4 sm:$0xff]   ;;  %v3681_v30 = vmov 0.0   ;;  %s4609_s26 = scalar_lea.vmem %s4533_s4, %s3991_s30  ;;  %v965_v15 = vlaneseq }
 0x1db   : > { %3146 = vmatprep.subr.bf16.mxu1 %v3681_v30  ;;  %v3328_v31 = vld [vmem:[%s4014_s20 + $0xb0] ss:$12 sps:$4 sm:$0xff]   ;;  %1108 = vmatprep.subr.bf16.mxu0 %v3325_v28  ;;  %v3329_v40 = vld [vmem:[%s4014_s20 + $0x94] ss:$12 sps:$4 sm:$0xff]   ;;  %v3332_v42 = vld [vmem:[%s4014_s20 + $0x98] ss:$12 sps:$4 sm:$0xff]   ;;  %s4610_s12 = scalar_lea.vmem %s4534_s5, %s3991_s30  ;;  %s4611_s18 = scalar_lea.vmem %s4537_s8, %s3991_s30 }
 0x1dc   : > { %1109 = vmatpush1.bf16.msra.mxu0 %v3327_v29  ;;  %3147 = vmatpush3.bf16.msra.mxu1 %v3328_v31  ;;  %v3331_v41 = vld [vmem:[%s4014_s20 + $0x90] ss:$12 sps:$4 sm:$0xff]   ;;  %v3335_v44 = vld [vmem:[%s4014_s20 + $0x78] ss:$12 sps:$4 sm:$0xff]   ;;  %v3336_v45 = vld [vmem:[%s4014_s20 + $0x80] ss:$12 sps:$4 sm:$0xff]   ;;  %s4613_s6 = scalar_lea.vmem %s4538_s9, %s3991_s30 }
 0x1dd   : > { %3148 = vmatprep.subr.bf16.mxu1 %v3681_v30  ;;  %1110 = vmatprep.subr.bf16.mxu0 %v3329_v40  ;;  %v3333_v43 = vld [vmem:[%s4014_s20 + $0x7c] ss:$12 sps:$4 sm:$0xff]   ;;  %v3337_v46 = vld [vmem:[%s4014_s20 + $0x64] ss:$12 sps:$4 sm:$0xff]   ;;  %v3339_v47 = vld [vmem:[%s4014_s20 + $0x60] ss:$12 sps:$4 sm:$0xff]  }
 0x1de   : > { %v3340_v48 = vld [vmem:[%s4014_s20 + $0x68] ss:$12 sps:$4 sm:$0xff]   ;;  %v3341_v49 = vld [vmem:[%s4014_s20 + $0x4c] ss:$12 sps:$4 sm:$0xff]   ;;  %v3344_v51 = vld [vmem:[%s4014_s20 + $0x50] ss:$12 sps:$4 sm:$0xff]  }
 0x1df   : > { %v3343_v50 = vld [vmem:[%s4014_s20 + $0x48] ss:$12 sps:$4 sm:$0xff]   ;;  %v3682_v53 = vmov 0   ;;  %vm3683_vm0 = vmmov 0   ;;  %v3347_v54 = vld [vmem:[%s4014_s20 + $0x30] ss:$12 sps:$4 sm:$0xff]  }
 0x1e0   : > { %v887_v26 = vld [vmem:[%s4608_s24] sm:$0xff]  ;;  %v888_v27 = vld [vmem:[%s4608_s24 + $0x8] sm:$0xff]  ;;  %1111 = vmatpush1.bf16.msra.mxu0 %v3331_v41  ;;  %3149 = vmatpush3.bf16.msra.mxu1 %v3332_v42  ;;  %v4127_v16 = vshrl.u32 %v965_v15, 7  ;;  %vm1201_vm1 = vcmask 261120   ;;  %s4612_s21 = sld [smem:[#allocation18_spill]]  ;;  %vm1263_vm2 = vcmask 130048  }
 0x1e1   : > { %891 = vadd.xlane.f32.xlu0 %v887_v26  ;;  %3150 = vmatprep.subr.bf16.mxu1 %v3681_v30  ;;  %v3345_v52 = vld [vmem:[%s4014_s20 + $0x34] ss:$12 sps:$4 sm:$0xff]   ;;  %v3348_v55 = vld [vmem:[%s4014_s20 + $0x38] ss:$12 sps:$4 sm:$0xff]   ;;  %v3349_v56 = vld [vmem:[%s4014_s20 + $0x1c] ss:$12 sps:$4 sm:$0xff]  }
 0x1e2   : > { %1112 = vmatprep.subr.bf16.mxu0 %v3333_v43  ;;  %1140 = vmatprep.mubr.bf16.mxu0 %v3682_v53  ;;  %v3351_v57 = vld [vmem:[%s4014_s20 + $0x18] ss:$12 sps:$4 sm:$0xff]   ;;  %v3352_v58 = vld [vmem:[%s4014_s20 + $0x20] ss:$12 sps:$4 sm:$0xff]   ;;  %v3356_v61 = vld [vmem:[%s4014_s20 + $0x8] ss:$12 sps:$4 sm:$0xff]  }
 0x1e3   : > { %3162 = vmatprep.mubr.msk.bf16.mxu1 %vm3683_vm0, %v3681_v30  ;;  %v3353_v59 = vld [vmem:[%s4014_s20 + $0x4] ss:$12 sps:$4 sm:$0xff]   ;;  %v3355_v60 = vld [vmem:[%s4014_s20] ss:$12 sps:$4 sm:$0xff]   ;;  %v967_v17 = vsub.s32 0, %v4127_v16  ;;  %v971_v20 = vsub.s32 1, %v4127_v16 }
 0x1e4   : > { %1113 = vmatpush1.bf16.msra.mxu0 %v3335_v44  ;;  %3151 = vmatpush3.bf16.msra.mxu1 %v3336_v45  ;;  %v2951_v6 = vld [vmem:[%s4609_s26] ss:$0 sm:$0xff]  ;;  %v975_v40 = vsub.s32 2, %v4127_v16  ;;  %s3684_s23 = smov 96   ;;  %s3685_s22 = smov 64   ;;  %vm1839_vm3 = vcmask 523264  }
 0x1e5   : > { %893 = vadd.xlane.f32.xlu0 %v888_v27  ;;  %3152 = vmatprep.subr.bf16.mxu1 %v3681_v30  ;;  %v2952_v10 = vld [vmem:[%s4610_s12] ss:$0 sm:$0xff]  ;;  %s3686_s20 = smov 32   ;;  %vm1842_vm4 = vcmask 785408   ;;  %s4614_s12 = scalar_lea.vmem %s4540_s11, %s3991_s30 }
 0x1e6   : > { %1114 = vmatprep.subr.bf16.mxu0 %v3337_v46  ;;  %v963_v18 = vld [vmem:[%s4023_s14] sm:$0x7]  ;;  %s4615_s1 = sld [smem:[#allocation16_spill]] }
 0x1e7   : > { %v968_v19 = vrot.slane %v963_v18, %v967_v17  ;;  %v2978_v24 = vld [vmem:[%s4611_s18] ss:$0 sm:$0xff]  ;;  %v972_v28 = vrot.slane %v963_v18, %v971_v20  ;;  %v976_v45 = vrot.slane %v963_v18, %v975_v40 }
 0x1e8   : > { %1115 = vmatpush1.bf16.msra.mxu0 %v3339_v47  ;;  %3153 = vmatpush3.bf16.msra.mxu1 %v3340_v48 }
 0x1e9   : > { %1116 = vmatprep.subr.bf16.mxu0 %v3341_v49  ;;  %3154 = vmatprep.subr.bf16.mxu1 %v3681_v30 }
 0x1ec   : > { %1117 = vmatpush1.bf16.msra.mxu0 %v3343_v50  ;;  %3155 = vmatpush3.bf16.msra.mxu1 %v3344_v51  ;;  %v4158_v50 = vld [vmem:[%s4612_s21] sm:$0xff] }
 0x1ed   : > { %1118 = vmatprep.subr.bf16.mxu0 %v3345_v52  ;;  %3156 = vmatprep.subr.bf16.mxu1 %v3681_v30 }
 0x1f0   : > { %1119 = vmatpush1.bf16.msra.mxu0 %v3347_v54  ;;  %3157 = vmatpush3.bf16.msra.mxu1 %v3348_v55  ;;  %v4164_v55 = vld [vmem:[%s4612_s21 + $0x8] sm:$0xff] }
 0x1f1   : > { %1120 = vmatprep.subr.bf16.mxu0 %v3349_v56  ;;  %3158 = vmatprep.subr.bf16.mxu1 %v3681_v30 }
 0x1f4   : > { %1121 = vmatpush1.bf16.msra.mxu0 %v3351_v57  ;;  %3159 = vmatpush3.bf16.msra.mxu1 %v3352_v58 }
 0x1f5   : > { %1122 = vmatprep.subr.bf16.mxu0 %v3353_v59  ;;  %3160 = vmatprep.subr.bf16.mxu1 %v3681_v30 }
 0x1f8   : > { %1123 = vmatpush1.bf16.msra.mxu0 %v3355_v60  ;;  %3161 = vmatpush3.bf16.msra.mxu1 %v3356_v61 }
 0x1f9   : > { %3166 = vmatprep.subr.bf16.mxu1 %v3681_v30  ;;  %3190 = vmatprep.subr.bf16.mxu0 %v3681_v30 }
 0x26a   : > { %v892_v32 = vpop.xlane.xlu0 %891 }
 0x26b   : > { %v896_v33 = vmul.f32 0.0078125, %v892_v32 }
 0x26d   : > { %v4071_v34 = vsub.f32 %v887_v26, %v896_v33 }
 0x26e   : > { %v894_v35 = vpop.xlane.xlu0 %893 }
 0x26f   : > { %v897_v36 = vmul.f32 0.0078125, %v894_v35  ;;  %v900_v37 = vmul.f32 %v4071_v34, %v4071_v34 }
 0x271   : > { %v4075_v38 = vsub.f32 %v888_v27, %v897_v36  ;;  %902 = vadd.xlane.f32.xlu1 %v900_v37 }
 0x273   : > { %v901_v39 = vmul.f32 %v4075_v38, %v4075_v38 }
 0x275   : > { %904 = vadd.xlane.f32.xlu1 %v901_v39 }
 0x2fa   : > { %v903_v62 = vpop.xlane.xlu1 %902 }
 0x2fb   : > { %v906_v63 = vmul.f32 0.0078125, %v903_v62 }
 0x2fd   : > { %v908_v0 = vadd.f32 1e-06, %v906_v63 }
 0x2fe   : > { %v905_v1 = vpop.xlane.xlu1 %904 }
 0x2ff   : > { %3445 = vrsqrt.f32 %v908_v0  ;;  %v907_v2 = vmul.f32 0.0078125, %v905_v1 }
 0x301   : > { %v909_v3 = vadd.f32 1e-06, %v907_v2 }
 0x303   : > { %3447 = vrsqrt.f32 %v909_v3 }
 0x30c   : > { %v3446_v4 = vpop.eup %3445 }
 0x30d   : > { %v912_v5 = vmul.f32 %v3446_v4, %v4071_v34 }
 0x30f   : > { %v920_v9 = vmul.f32 %v2951_v6, %v912_v5 }
 0x310   : > { %v3448_v7 = vpop.eup %3447 }
 0x311   : > { %v913_v8 = vmul.f32 %v3448_v7, %v4075_v38  ;;  %v928_v12 = vadd.f32 %v2952_v10, %v920_v9 }
 0x313   : > { %v921_v11 = vmul.f32 %v2951_v6, %v913_v8 }
 0x315   : > { %v929_v13 = vadd.f32 %v2952_v10, %v921_v11 }
 0x317   : > { %v930_v14 = vpack.c.bf16 %v929_v13, %v928_v12 }
 0x319   : > { %1141 = vmatmul.mubr.bf16.vlgmr.msra.gmra.mxu0 %v930_v14  ;;  %3163 = vmatmul.mubr.bf16.vlgmr.msra.gmra.mxu1 %v930_v14 }
 0x31a   : > { %3168 = vmatprep.mubr.msk.bf16.mxu1 %vm3683_vm0, %v3681_v30  ;;  %3192 = vmatprep.mubr.msk.bf16.mxu0 %vm3683_vm0, %v3681_v30 }
 0x3d9   : > { %v1142_v21 = vpop.f32.mrf.mxu0  ;;  %v1185_v22 = vpop.f32.mrf.mxu1 }
 0x3da   : > { %v1143_v23 = vadd.f32 %v1142_v21, %v968_v19  ;;  %v1186_v47 = vadd.f32 %v1185_v22, %v976_v45 }
 0x3db   : > { %v1144_v25 = vpop.f32.mrf.mxu0  ;;  %v3164_v26 = vpop.f32.mrf.mxu1 }
 0x3dc   : > { %v1192_v27 = vmul.f32 0.17677669, %v1143_v23  ;;  %v1145_v36 = vadd.f32 %v1144_v25, %v972_v28 }
 0x3dd   : > { %v1146_v29 = vpop.f32.mrf.mxu0  ;;  %v1188_v31 = vpop.f32.mrf.mxu1 }
 0x3de   : > { %v1255_v32 = vmul.f32 %v2978_v24, %v1192_v27  ;;  %v1147_v33 = vadd.f32 %v1146_v29, %v968_v19  ;;  %v1189_v46 = vadd.f32 %v1188_v31, %v976_v45 }
 0x3df   : > { %v1148_v34 = vpop.f32.mrf.mxu0  ;;  %v3165_v35 = vpop.f32.mrf.mxu1 }
 0x3e0   : > { %v1193_v37 = vmul.f32 0.17677669, %v1147_v33  ;;  %v1149_v38 = vadd.f32 %v1148_v34, %v972_v28  ;;  %v1257_v39 = vsel %vm1201_vm1, %v1255_v32, 0.0  ;;  %v4148_v49 = vpack.c.bf16 %v1189_v46, %v1186_v47 }
 0x3e1   : > { %1258 = vadd.xlane.f32.xlu0 %v1257_v39 }
 0x3e2   : > { %v1256_v41 = vmul.f32 %v2978_v24, %v1193_v37  ;;  %v1195_v42 = vpack.c.bf16 %v1149_v38, %v1145_v36  ;;  %v1194_v48 = vpack.c.bf16 %v1193_v37, %v1192_v27 }
 0x3e4   : > { %v1260_v43 = vsel %vm1201_vm1, %v1256_v41, 0.0  ;;  %v1206_v44 = vsel %vm1201_vm1, %v1195_v42, 0 }
 0x3e5   : > { %1261 = vadd.xlane.f32.xlu1 %v1260_v43  ;;  %3167 = vmatpush3.bf16.xpose.msra.mxu1 %v1206_v44  ;;  %v4219_v44 = vld [vmem:[%s4613_s6] ss:$0 sm:$0xff] }
 0x3e6   : > { %3172 = vmatprep.subr.bf16.mxu1 %v3681_v30 }
 0x3ec   : > { %3169 = vmatmul.mubr.msk.bf16.vlgmr.msra.gmra.mxu1 %vm1201_vm1, %v1194_v48 }
 0x3ed   : > { %3173 = vmatpush3.bf16.msra.mxu1 %v4148_v49  ;;  %3174 = vmatprep.mubr.msk.bf16.mxu1 %vm3683_vm0, %v3681_v30 }
 0x3ee   : > { %3178 = vmatprep.subr.bf16.mxu1 %v3681_v30 }
 0x46a   : > { %v1259_v61 = vpop.xlane.xlu0 %1258 }
 0x46e   : > { %v1262_v62 = vpop.xlane.xlu1 %1261 }
 0x4ac   : > { %v1242_v51 = vpop.f32.mrf.mxu1 }
 0x4ad   : > { %v1243_v52 = vadd.f32 %v1242_v51, %v4158_v50 }
 0x4ae   : > { %v3170_v54 = vpop.f32.mrf.mxu1 }
 0x4af   : > { %v1264_v56 = vsel %vm1263_vm2, %v1243_v52, -inf }
 0x4b0   : > { %1265 = vmax.xlane.f32.xlu0 %v1264_v56  ;;  %v1245_v57 = vpop.f32.mrf.mxu1 }
 0x4b1   : > { %v1246_v58 = vadd.f32 %v1245_v57, %v4164_v55 }
 0x4b2   : > { %v3171_v59 = vpop.f32.mrf.mxu1 }
 0x4b3   : > { %v1267_v60 = vsel %vm1263_vm2, %v1246_v58, -inf }
 0x4b4   : > { %1268 = vmax.xlane.f32.xlu1 %v1267_v60 }
 0x4c5   : > { %1350 = vrot.lane.b32.xlu1 %v1194_v48, %s3684_s23 }
 0x4c6   : > { %1353 = vrot.lane.b32.xlu0 %v1195_v42, %s3684_s23 }
 0x4c9   : > { %1509 = vrot.lane.b32.xlu1 %v1195_v42, %s3685_s22 }
 0x4ca   : > { %1662 = vrot.lane.b32.xlu0 %v1195_v42, %s3686_s20 }
 0x4cd   : > { %1507 = vrot.lane.b32.xlu1 %v1194_v48, %s3685_s22 }
 0x4ce   : > { %1404 = vrot.lane.b32.xlu0 %v1255_v32, %s3684_s23 }
 0x4d1   : > { %1660 = vrot.lane.b32.xlu1 %v1194_v48, %s3686_s20 }
 0x4d2   : > { %1558 = vrot.lane.b32.xlu0 %v1255_v32, %s3685_s22 }
 0x4d5   : > { %1406 = vrot.lane.b32.xlu1 %v1256_v41, %s3684_s23 }
 0x4d6   : > { %1711 = vrot.lane.b32.xlu0 %v1255_v32, %s3686_s20 }
 0x4d9   : > { %1560 = vrot.lane.b32.xlu1 %v1256_v41, %s3685_s22 }
 0x4dd   : > { %1713 = vrot.lane.b32.xlu1 %v1256_v41, %s3686_s20 }
 0x539   : > { %v1266_v63 = vpop.xlane.xlu0 %1265 }
 0x53a   : > { %v1270_v0 = vmax.f32 %v1266_v63, %v1259_v61 }
 0x53c   : > { %v1272_v1 = vsub.f32 %v1243_v52, %v1270_v0  ;;  %v1278_v2 = vsub.f32 %v1259_v61, %v1270_v0 }
 0x53d   : > { %v1354_v3 = vpop.permute.xlu0 %1353  ;;  %v1269_v4 = vpop.xlane.xlu1 %1268 }
 0x53e   : > { %v1271_v5 = vmax.f32 %v1269_v4, %v1262_v62  ;;  %v1274_v6 = vmul.f32 1.442695, %v1272_v1  ;;  %v1359_v32 = vsel %vm1201_vm1, %v1354_v3, 0  ;;  %v1280_v37 = vmul.f32 1.442695, %v1278_v2 }
 0x540   : > { %v1273_v7 = vsub.f32 %v1246_v58, %v1271_v5  ;;  %v1279_v8 = vsub.f32 %v1262_v62, %v1271_v5  ;;  %3449 = vpow2.f32 %v1274_v6 }
 0x541   : > { %v1663_v9 = vpop.permute.xlu0 %1662  ;;  %v1351_v10 = vpop.permute.xlu1 %1350 }
 0x542   : > { %v1276_v11 = vmul.f32 1.442695, %v1273_v7  ;;  %v1668_v24 = vsel %vm1201_vm1, %v1663_v9, 0  ;;  %v1282_v38 = vmul.f32 1.442695, %v1279_v8 }
 0x544   : > { %3451 = vpow2.f32 %v1276_v11 }
 0x545   : > { %v1405_v12 = vpop.permute.xlu0 %1404  ;;  %v1510_v13 = vpop.permute.xlu1 %1509  ;;  %3453 = vpow2.f32 %v1280_v37 }
 0x546   : > { %v1515_v14 = vsel %vm1201_vm1, %v1510_v13, 0  ;;  %v1410_v15 = vsel %vm1201_vm1, %v1405_v12, 0.0  ;;  %3455 = vpow2.f32 %v1282_v38 }
 0x547   : > { %1411 = vadd.xlane.f32.xlu0 %v1410_v15  ;;  %3191 = vmatpush3.bf16.xpose.msra.mxu0 %v1515_v14 }
 0x548   : > { %3202 = vmatprep.subr.bf16.mxu0 %v3681_v30 }
 0x549   : > { %v1559_v18 = vpop.permute.xlu0 %1558  ;;  %v1508_v19 = vpop.permute.xlu1 %1507 }
 0x54a   : > { %v1564_v21 = vsel %vm1201_vm1, %v1559_v18, 0.0 }
 0x54b   : > { %1565 = vadd.xlane.f32.xlu0 %v1564_v21 }
 0x54d   : > { %v1712_v22 = vpop.permute.xlu0 %1711  ;;  %v1661_v23 = vpop.permute.xlu1 %1660 }
 0x54e   : > { %3193 = vmatmul.mubr.msk.bf16.vlgmr.msra.gmra.mxu0 %vm1201_vm1, %v1508_v19  ;;  %v1717_v25 = vsel %vm1201_vm1, %v1712_v22, 0.0  ;;  %v4188_v26 = vpop.eup %3449 }
 0x54f   : > { %1718 = vadd.xlane.f32.xlu0 %v1717_v25  ;;  %3203 = vmatpush3.bf16.xpose.msra.mxu0 %v1668_v24 }
 0x550   : > { %3204 = vmatprep.mubr.msk.bf16.mxu0 %vm3683_vm0, %v3681_v30  ;;  %3214 = vmatprep.subr.bf16.mxu0 %v3681_v30 }
 0x551   : > { %v4193_v27 = vpop.eup %3451  ;;  %v1407_v28 = vpop.permute.xlu1 %1406 }
 0x552   : > { %v1413_v29 = vsel %vm1201_vm1, %v1407_v28, 0.0  ;;  %v1294_v31 = vpack.c.bf16 %v4193_v27, %v4188_v26  ;;  %v4212_v42 = vpop.eup %3453 }
 0x553   : > { %1414 = vadd.xlane.f32.xlu1 %v1413_v29  ;;  %v1301_v48 = vmul.f32 %v4212_v42, %v4219_v44  ;;  %v4225_v51 = vpop.eup %3455 }
 0x554   : > { %3175 = vmatmul.mubr.msk.bf16.vlgmr.msra.gmra.mxu1 %vm1263_vm2, %v1294_v31  ;;  %v1302_v61 = vmul.f32 %v4225_v51, %v4219_v44 }
 0x555   : > { %3179 = vmatpush3.bf16.xpose.msra.mxu1 %v1359_v32  ;;  %v1561_v33 = vpop.permute.xlu1 %1560  ;;  %3180 = vmatprep.mubr.msk.bf16.mxu1 %vm3683_vm0, %v3681_v30 }
 0x556   : > { %3205 = vmatmul.mubr.msk.bf16.vlgmr.msra.gmra.mxu0 %vm1201_vm1, %v1661_v23  ;;  %v1567_v34 = vsel %vm1201_vm1, %v1561_v33, 0.0  ;;  %3184 = vmatprep.subr.bf16.mxu1 %v3681_v30 }
 0x557   : > { %1568 = vadd.xlane.f32.xlu1 %v1567_v34  ;;  %3230 = vmatprep.mubr.msk.bf16.mxu0 %vm3683_vm0, %v3681_v30 }
 0x559   : > { %v1714_v35 = vpop.permute.xlu1 %1713 }
 0x55a   : > { %v1720_v36 = vsel %vm1201_vm1, %v1714_v35, 0.0 }
 0x55b   : > { %1721 = vadd.xlane.f32.xlu1 %v1720_v36 }
 0x55c   : > { %3181 = vmatmul.mubr.msk.bf16.vlgmr.msra.gmra.mxu1 %vm1201_vm1, %v1351_v10 }
 0x55d   : > { %3186 = vmatprep.mubr.msk.bf16.mxu1 %vm3683_vm0, %v3681_v30 }
 0x5dc   : > { %v4250_v15 = vpop.xlane.xlu1 %1414 }
 0x5e0   : > { %v1569_v19 = vpop.xlane.xlu1 %1568 }
 0x5e4   : > { %v4254_v21 = vpop.xlane.xlu1 %1721 }
 0x60e   : > { %v1551_v39 = vpop.f32.mrf.mxu0 }
 0x60f   : > { %v1552_v41 = vadd.f32 %v1551_v39, %v4158_v50 }
 0x610   : > { %v3194_v43 = vpop.f32.mrf.mxu0 }
 0x611   : > { %v1570_v45 = vsel %vm1263_vm2, %v1552_v41, -inf }
 0x612   : > { %1571 = vmax.xlane.f32.xlu0 %v1570_v45  ;;  %v1554_v46 = vpop.f32.mrf.mxu0 }
 0x613   : > { %v1555_v47 = vadd.f32 %v1554_v46, %v4164_v55 }
 0x614   : > { %v1340_v52 = vpop.f32.mrf.mxu1  ;;  %v3195_v54 = vpop.f32.mrf.mxu0 }
 0x615   : > { %v4227_v56 = vadd.f32 %v1340_v52, %v1301_v48  ;;  %v1573_v57 = vsel %vm1263_vm2, %v1555_v47, -inf }
 0x616   : > { %v1704_v58 = vpop.f32.mrf.mxu0  ;;  %1574 = vmax.xlane.f32.xlu1 %v1573_v57  ;;  %v3176_v59 = vpop.f32.mrf.mxu1 }
 0x617   : > { %v1705_v60 = vadd.f32 %v1704_v58, %v4158_v50 }
 0x618   : > { %v1343_v62 = vpop.f32.mrf.mxu1  ;;  %v3206_v63 = vpop.f32.mrf.mxu0 }
 0x619   : > { %v4233_v0 = vadd.f32 %v1343_v62, %v1302_v61  ;;  %v1723_v1 = vsel %vm1263_vm2, %v1705_v60, -inf }
 0x61a   : > { %1724 = vmax.xlane.f32.xlu0 %v1723_v1  ;;  %v3177_v2 = vpop.f32.mrf.mxu1  ;;  %v1707_v3 = vpop.f32.mrf.mxu0 }
 0x61b   : > { %v1708_v4 = vadd.f32 %v1707_v3, %v4164_v55 }
 0x61c   : > { %v1395_v5 = vpop.f32.mrf.mxu1  ;;  %v3207_v6 = vpop.f32.mrf.mxu0 }
 0x61d   : > { %v1396_v7 = vadd.f32 %v1395_v5, %v4158_v50  ;;  %v1726_v8 = vsel %vm1263_vm2, %v1708_v4, -inf  ;;  %v4248_v50 = vpop.xlane.xlu0 %1411 }
 0x61e   : > { %1727 = vmax.xlane.f32.xlu1 %v1726_v8  ;;  %v3182_v9 = vpop.f32.mrf.mxu1 }
 0x61f   : > { %v1416_v10 = vsel %vm1263_vm2, %v1396_v7, -inf }
 0x620   : > { %1417 = vmax.xlane.f32.xlu0 %v1416_v10  ;;  %v1398_v11 = vpop.f32.mrf.mxu1 }
 0x621   : > { %v1399_v12 = vadd.f32 %v1398_v11, %v4164_v55  ;;  %v1566_v18 = vpop.xlane.xlu0 %1565 }
 0x622   : > { %v3183_v13 = vpop.f32.mrf.mxu1 }
 0x623   : > { %v1419_v14 = vsel %vm1263_vm2, %v1399_v12, -inf }
 0x624   : > { %1420 = vmax.xlane.f32.xlu0 %v1419_v14 }
 0x625   : > { %v4252_v55 = vpop.xlane.xlu0 %1718 }
 0x62f   : > { %1603 = vrot.lane.b32.xlu1 %v4148_v49, %s3685_s22 }
 0x633   : > { %1756 = vrot.lane.b32.xlu1 %v4148_v49, %s3686_s20 }
 0x63a   : > { %1450 = vrot.lane.b32.xlu0 %v4148_v49, %s3684_s23 }
 0x69b   : > { %v1572_v22 = vpop.xlane.xlu0 %1571 }
 0x69c   : > { %v1576_v23 = vmax.f32 %v1572_v22, %v1566_v18 }
 0x69e   : > { %v1578_v24 = vsub.f32 %v1552_v41, %v1576_v23  ;;  %v1584_v57 = vsub.f32 %v1566_v18, %v1576_v23 }
 0x69f   : > { %v1575_v25 = vpop.xlane.xlu1 %1574 }
 0x6a0   : > { %v1580_v28 = vmul.f32 1.442695, %v1578_v24  ;;  %v1577_v29 = vmax.f32 %v1575_v25, %v1569_v19  ;;  %v1586_v63 = vmul.f32 1.442695, %v1584_v57 }
 0x6a2   : > { %3457 = vpow2.f32 %v1580_v28  ;;  %v1579_v31 = vsub.f32 %v1555_v47, %v1577_v29  ;;  %v1585_v1 = vsub.f32 %v1569_v19, %v1577_v29 }
 0x6a3   : > { %v1725_v32 = vpop.xlane.xlu0 %1724 }
 0x6a4   : > { %v1582_v49 = vmul.f32 1.442695, %v1579_v31  ;;  %v4257_v33 = vmax.f32 %v1725_v32, %v4252_v55 }
 0x6a6   : > { %3459 = vpow2.f32 %v1582_v49  ;;  %v1731_v34 = vsub.f32 %v1705_v60, %v4257_v33  ;;  %v1737_v35 = vsub.f32 %v4252_v55, %v4257_v33  ;;  %v1284_v33 = vsel %vm1263_vm2, %v4188_v26, 0.0 }
 0x6a7   : > { %v1728_v36 = vpop.xlane.xlu1 %1727 }
 0x6a8   : > { %v1733_v37 = vmul.f32 1.442695, %v1731_v34  ;;  %v1730_v38 = vmax.f32 %v1728_v36, %v4254_v21 }
 0x6a9   : > { %v1418_v39 = vpop.xlane.xlu0 %1417 }
 0x6aa   : > { %3461 = vpow2.f32 %v1733_v37  ;;  %v1732_v41 = vsub.f32 %v1708_v4, %v1730_v38  ;;  %v4264_v43 = vmax.f32 %v1418_v39, %v4248_v50  ;;  %v1588_v4 = vmul.f32 1.442695, %v1585_v1  ;;  %v3360_v1 = vld [vmem:[%s3975_s15 + $0x20] sm:$0xff]  }
 0x6ab   : > { %v1738_v13 = vsub.f32 %v4254_v21, %v1730_v38  ;;  %v1604_v18 = vpop.permute.xlu1 %1603  ;;  %v1739_v37 = vmul.f32 1.442695, %v1737_v35  ;;  %v1287_v39 = vsel %vm1263_vm2, %v4193_v27, 0.0  ;;  %v3357_v35 = vld [vmem:[%s3975_s15 + $0x38] sm:$0xff]   ;;  %v3359_v27 = vld [vmem:[%s3975_s15 + $0x28] sm:$0xff]  }
 0x6ac   : > { %v1735_v45 = vmul.f32 1.442695, %v1732_v41  ;;  %v1424_v46 = vsub.f32 %v1396_v7, %v4264_v43  ;;  %v1430_v34 = vsub.f32 %v4248_v50, %v4264_v43  ;;  %3215 = vmatpush3.bf16.msra.mxu0 %v3357_v35 }
 0x6ad   : > { %v1421_v47 = vpop.xlane.xlu0 %1420  ;;  %3216 = vmatprep.subr.bf16.mxu0 %v3681_v30 }
 0x6ae   : > { %3463 = vpow2.f32 %v1735_v45  ;;  %v1423_v48 = vmax.f32 %v1421_v47, %v4250_v15  ;;  %v1426_v54 = vmul.f32 1.442695, %v1424_v46  ;;  %v1432_v36 = vmul.f32 1.442695, %v1430_v34  ;;  %v3358_v45 = vld [vmem:[%s3975_s15 + $0x30] sm:$0xff]  }
 0x6af   : > { %v3458_v52 = vpop.eup %3457  ;;  %v1757_v24 = vpop.permute.xlu1 %1756 }
 0x6b0   : > { %v1425_v58 = vsub.f32 %v1399_v12, %v1423_v48  ;;  %v1590_v59 = vsel %vm1263_vm2, %v3458_v52, 0.0  ;;  %3465 = vpow2.f32 %v1426_v54  ;;  %v1431_v8 = vsub.f32 %v4250_v15, %v1423_v48  ;;  %3217 = vmatpush3.bf16.msra.mxu0 %v3358_v45 }
 0x6b1   : > { %1591 = vadd.xlane.f32.xlu0 %v1590_v59  ;;  %v1451_v60 = vpop.permute.xlu0 %1450  ;;  %v1741_v15 = vmul.f32 1.442695, %v1738_v13  ;;  %3218 = vmatprep.subr.bf16.mxu0 %v3681_v30 }
 0x6b2   : > { %v1428_v61 = vmul.f32 1.442695, %v1425_v58  ;;  %3185 = vmatpush3.bf16.msra.mxu1 %v1451_v60  ;;  %v1434_v14 = vmul.f32 1.442695, %v1431_v8 }
 0x6b3   : > { %v3460_v62 = vpop.eup %3459  ;;  %3196 = vmatprep.subr.bf16.mxu1 %v3681_v30 }
 0x6b4   : > { %3467 = vpow2.f32 %v1428_v61  ;;  %v1593_v2 = vsel %vm1263_vm2, %v3460_v62, 0.0  ;;  %v1600_v21 = vpack.c.bf16 %v3460_v62, %v3458_v52  ;;  %3219 = vmatpush3.bf16.msra.mxu0 %v3359_v27 }
 0x6b5   : > { %1594 = vadd.xlane.f32.xlu0 %v1593_v2  ;;  %3469 = vpow2.f32 %v1586_v63  ;;  %3220 = vmatprep.subr.bf16.mxu0 %v3681_v30 }
 0x6b6   : > { %3471 = vpow2.f32 %v1588_v4  ;;  %v3361_v4 = vld [vmem:[%s3975_s15 + $0x18] sm:$0xff]  }
 0x6b7   : > { %v3462_v3 = vpop.eup %3461  ;;  %3473 = vpow2.f32 %v1434_v14 }
 0x6b8   : > { %v1743_v5 = vsel %vm1263_vm2, %v3462_v3, 0.0  ;;  %3475 = vpow2.f32 %v1741_v15  ;;  %3221 = vmatpush3.bf16.msra.mxu0 %v3360_v1 }
 0x6b9   : > { %1744 = vadd.xlane.f32.xlu1 %v1743_v5  ;;  %3477 = vpow2.f32 %v1432_v36  ;;  %3222 = vmatprep.subr.bf16.mxu0 %v3681_v30 }
 0x6ba   : > { %3479 = vpow2.f32 %v1739_v37  ;;  %v3364_v37 = vld [vmem:[%s3975_s15] sm:$0xff]  }
 0x6bb   : > { %v3464_v6 = vpop.eup %3463 }
 0x6bc   : > { %v1746_v7 = vsel %vm1263_vm2, %v3464_v6, 0.0  ;;  %v1753_v28 = vpack.c.bf16 %v3464_v6, %v3462_v3  ;;  %3223 = vmatpush3.bf16.msra.mxu0 %v3361_v4 }
 0x6bd   : > { %1747 = vadd.xlane.f32.xlu0 %v1746_v7  ;;  %v3466_v9 = vpop.eup %3465  ;;  %3224 = vmatprep.subr.bf16.mxu0 %v3681_v30 }
 0x6be   : > { %v1436_v38 = vsel %vm1263_vm2, %v3466_v9, 0.0 }
 0x6c1   : > { %v3468_v10 = vpop.eup %3467 }
 0x6c2   : > { %v1439_v11 = vsel %vm1263_vm2, %v3468_v10, 0.0  ;;  %v1446_v12 = vpack.c.bf16 %v3468_v10, %v3466_v9  ;;  %v4277_v19 = vpop.eup %3469 }
 0x6c3   : > { %1440 = vadd.xlane.f32.xlu0 %v1439_v11  ;;  %v1601_v22 = vmul.f32 %v4277_v19, %v4219_v44  ;;  %v3472_v23 = vpop.eup %3471 }
 0x6c4   : > { %3187 = vmatmul.mubr.msk.bf16.vlgmr.msra.gmra.mxu1 %vm1263_vm2, %v1446_v12  ;;  %v1602_v25 = vmul.f32 %v3472_v23, %v4219_v44  ;;  %v3474_v29 = vpop.eup %3473 }
 0x6c5   : > { %3197 = vmatpush3.bf16.msra.mxu1 %v1604_v18  ;;  %3198 = vmatprep.mubr.msk.bf16.mxu1 %vm3683_vm0, %v3681_v30  ;;  %v1448_v31 = vmul.f32 %v3474_v29, %v4219_v44  ;;  %v3476_v32 = vpop.eup %3475 }
 0x6c6   : > { %3208 = vmatprep.subr.bf16.mxu1 %v3681_v30  ;;  %v1755_v49 = vmul.f32 %v3476_v32, %v4219_v44  ;;  %v3478_v41 = vpop.eup %3477 }
 0x6c7   : > { %v1447_v50 = vmul.f32 %v3478_v41, %v4219_v44  ;;  %v3480_v43 = vpop.eup %3479 }
 0x6c8   : > { %v1754_v55 = vmul.f32 %v3480_v43, %v4219_v44 }
 0x6ca   : > { %1608 = vrot.lane.b32.xlu1 %v1601_v22, %s3685_s22 }
 0x6cc   : > { %3199 = vmatmul.mubr.msk.bf16.vlgmr.msra.gmra.mxu1 %vm1263_vm2, %v1600_v21 }
 0x6cd   : > { %3209 = vmatpush3.bf16.msra.mxu1 %v1757_v24  ;;  %3210 = vmatprep.mubr.msk.bf16.mxu1 %vm3683_vm0, %v3681_v30 }
 0x6ce   : > { %1610 = vrot.lane.b32.xlu1 %v1602_v25, %s3685_s22 }
 0x6d4   : > { %3211 = vmatmul.mubr.msk.bf16.vlgmr.msra.gmra.mxu1 %vm1263_vm2, %v1753_v28 }
 0x6d5   : > { %2247 = vmatprep.mubr.bf16.mxu1 %v3682_v53 }
 0x6d9   : > { %1457 = vrot.lane.b32.xlu0 %v1448_v31, %s3684_s23 }
 0x6dd   : > { %1763 = vrot.lane.b32.xlu0 %v1755_v49, %s3686_s20 }
 0x6f2   : > { %1437 = vadd.xlane.f32.xlu1 %v1436_v38 }
 0x6fc   : > { %1288 = vadd.xlane.f32.xlu0 %v1287_v39 }
 0x703   : > { %1455 = vrot.lane.b32.xlu1 %v1447_v50, %s3684_s23 }
 0x707   : > { %1761 = vrot.lane.b32.xlu1 %v1754_v55, %s3686_s20 }
 0x72b   : > { %1285 = vadd.xlane.f32.xlu1 %v1284_v33 }
 0x73a   : > { %v1592_v46 = vpop.xlane.xlu0 %1591 }
 0x73b   : > { %v1596_v61 = vadd.f32 %v4277_v19, %v1592_v46 }
 0x73e   : > { %v1595_v47 = vpop.xlane.xlu0 %1594 }
 0x73f   : > { %v1597_v62 = vadd.f32 %v3472_v23, %v1595_v47  ;;  %v3363_v23 = vld [vmem:[%s3975_s15 + $0x8] sm:$0xff]  }
 0x742   : > { %v1745_v44 = vpop.xlane.xlu1 %1744 }
 0x743   : > { %v1749_v7 = vadd.f32 %v3480_v43, %v1745_v44 }
 0x746   : > { %v1609_v48 = vpop.permute.xlu1 %1608  ;;  %v1748_v52 = vpop.xlane.xlu0 %1747 }
 0x747   : > { %v1750_v9 = vadd.f32 %v3476_v32, %v1748_v52 }
 0x74a   : > { %v1611_v54 = vpop.permute.xlu1 %1610 }
 0x74c   : > { %v1441_v26 = vpop.xlane.xlu0 %1440 }
 0x74d   : > { %v1443_v57 = vadd.f32 %v3474_v29, %v1441_v26 }
 0x74f   : > { %3481 = vrcp.f32 %v1443_v57 }
 0x750   : > { %v1458_v58 = vpop.permute.xlu0 %1457 }
 0x754   : > { %v1764_v63 = vpop.permute.xlu0 %1763 }
 0x75c   : > { %v3482_v12 = vpop.eup %3481 }
 0x77b   : > { %v1438_v59 = vpop.xlane.xlu1 %1437 }
 0x77c   : > { %v1442_v60 = vadd.f32 %v3478_v41, %v1438_v59 }
 0x77e   : > { %3483 = vrcp.f32 %v1442_v60 }
 0x77f   : > { %3485 = vrcp.f32 %v1596_v61  ;;  %v1456_v10 = vpop.permute.xlu1 %1455 }
 0x780   : > { %3487 = vrcp.f32 %v1597_v62 }
 0x783   : > { %v1762_v50 = vpop.permute.xlu1 %1761 }
 0x784   : > { %v1498_v2 = vpop.f32.mrf.mxu1 }
 0x785   : > { %v1289_v3 = vpop.xlane.xlu0 %1288  ;;  %v1499_v13 = vadd.f32 %v1498_v2, %v1456_v10 }
 0x786   : > { %v1291_v5 = vadd.f32 %v4225_v51, %v1289_v3  ;;  %v3188_v6 = vpop.f32.mrf.mxu1  ;;  %v3362_v51 = vld [vmem:[%s3975_s15 + $0x10] sm:$0xff]  }
 0x787   : > { %3225 = vmatpush3.bf16.msra.mxu0 %v3362_v51 }
 0x788   : > { %3489 = vrcp.f32 %v1291_v5  ;;  %v1501_v8 = vpop.f32.mrf.mxu1  ;;  %3226 = vmatprep.subr.bf16.mxu0 %v3681_v30 }
 0x789   : > { %v1502_v11 = vadd.f32 %v1501_v8, %v1458_v58  ;;  %3491 = vrcp.f32 %v1749_v7  ;;  %v2987_v8 = vld [vmem:[%s4614_s12] ss:$0 sm:$0xff] }
 0x78a   : > { %v3189_v14 = vpop.f32.mrf.mxu1  ;;  %3493 = vrcp.f32 %v1750_v9 }
 0x78b   : > { %v3484_v18 = vpop.eup %3483  ;;  %v1506_v19 = vmul.f32 %v3482_v12, %v1502_v11  ;;  %3227 = vmatpush3.bf16.msra.mxu0 %v3363_v23  ;;  %v3517_v12 = vld [vmem:[%s4608_s24] sm:$0xff]  ;;  %v3368_v23 = vld [vmem:[%s3981_s2 + $0xe8] ss:$16 sps:$4 sm:$0xff]  }
 0x78c   : > { %v1505_v15 = vmul.f32 %v3484_v18, %v1499_v13  ;;  %v1651_v22 = vpop.f32.mrf.mxu1  ;;  %v3486_v29 = vpop.eup %3485  ;;  %3228 = vmatprep.subr.bf16.mxu0 %v3681_v30 }
 0x78d   : > { %v1652_v25 = vadd.f32 %v1651_v22, %v1609_v48  ;;  %v3488_v32 = vpop.eup %3487  ;;  %v3367_v22 = vld [vmem:[%s3981_s2 + $0xe4] ss:$16 sps:$4 sm:$0xff]  }
 0x78e   : > { %v3200_v21 = vpop.f32.mrf.mxu1  ;;  %v3310_v24 = vpack.i.bf16 %v1506_v19, %v1505_v15  ;;  %v3518_v19 = vld [vmem:[%s4608_s24 + $0x8] sm:$0xff]  ;;  %v3365_v15 = vld [vmem:[%s3981_s2 + $0xe0] ss:$16 sps:$4 sm:$0xff]   ;;  %2215 = vmatprep.subr.bf16.mxu1 %v3367_v22  ;;  %v3415_v22 = vld [vmem:[%s4615_s1 + $0x38] sm:$0xff]  }
 0x78f   : > { %v1658_v34 = vmul.f32 %v3486_v29, %v1652_v25  ;;  %3229 = vmatpush3.bf16.msra.mxu0 %v3364_v37  ;;  %v3370_v21 = vld [vmem:[%s3981_s2 + $0xec] ss:$16 sps:$4 sm:$0xff]   ;;  %2216 = vmatpush1.bf16.msra.mxu1 %v3365_v15 }
 0x790   : > { %3311 = vrot.lane.b32.xlu0 %v3310_v24, %s3686_s20  ;;  %v1654_v28 = vpop.f32.mrf.mxu1  ;;  %2258 = vmatprep.subr.bf16.mxu0 %v3370_v21  ;;  %v3376_v37 = vld [vmem:[%s3981_s2 + $0xcc] ss:$16 sps:$4 sm:$0xff]  }
 0x791   : > { %v1655_v31 = vadd.f32 %v1654_v28, %v1611_v54  ;;  %v3414_v15 = vld [vmem:[%s4615_s1 + $0xf8] sm:$0xff]   ;;  %v3417_v21 = vld [vmem:[%s4615_s1 + $0x70] sm:$0xff]  }
 0x792   : > { %v3201_v49 = vpop.f32.mrf.mxu1 }
 0x793   : > { %v1659_v36 = vmul.f32 %v3488_v32, %v1655_v31 }
 0x794   : > { %v1804_v38 = vpop.f32.mrf.mxu1 }
 0x795   : > { %v3490_v39 = vpop.eup %3489  ;;  %v3315_v41 = vpack.i.bf16 %v1659_v36, %v1658_v34  ;;  %v1805_v33 = vadd.f32 %v1804_v38, %v1762_v50  ;;  %v3373_v36 = vld [vmem:[%s3981_s2 + $0xc4] ss:$16 sps:$4 sm:$0xff]   ;;  %v3371_v38 = vld [vmem:[%s3981_s2 + $0xc0] ss:$16 sps:$4 sm:$0xff]   ;;  %v3382_v50 = vld [vmem:[%s3981_s2 + $0xac] ss:$16 sps:$4 sm:$0xff]  }
 0x796   : > { %v3212_v43 = vpop.f32.mrf.mxu1  ;;  %v1348_v55 = vmul.f32 %v3490_v39, %v4233_v0  ;;  %v3492_v45 = vpop.eup %3491  ;;  %v3374_v39 = vld [vmem:[%s3981_s2 + $0xc8] ss:$16 sps:$4 sm:$0xff]   ;;  %2217 = vmatprep.subr.bf16.mxu1 %v3373_v36  ;;  %v3426_v36 = vld [vmem:[%s4615_s1 + $0xe0] sm:$0xff]  }
 0x797   : > { %3316 = vrot.lane.b32.xlu1 %v3315_v41, %s3685_s22  ;;  %v3494_v46 = vpop.eup %3493  ;;  %v1811_v30 = vmul.f32 %v3492_v45, %v1805_v33  ;;  %2218 = vmatpush1.bf16.msra.mxu1 %v3371_v38  ;;  %v3379_v41 = vld [vmem:[%s3981_s2 + $0xa4] ss:$16 sps:$4 sm:$0xff]   ;;  %v3377_v43 = vld [vmem:[%s3981_s2 + $0xa0] ss:$16 sps:$4 sm:$0xff]   ;;  %v3386_v45 = vld [vmem:[%s3981_s2 + $0x88] ss:$16 sps:$4 sm:$0xff]  }
 0x798   : > { %v1807_v35 = vpop.f32.mrf.mxu1  ;;  %2219 = vmatprep.subr.bf16.mxu1 %v3379_v41  ;;  %v3383_v33 = vld [vmem:[%s3981_s2 + $0x80] ss:$16 sps:$4 sm:$0xff]   ;;  %v3430_v41 = vld [vmem:[%s4615_s1 + $0xd8] sm:$0xff]  }
 0x799   : > { %v1808_v27 = vadd.f32 %v1807_v35, %v1764_v63  ;;  %v3385_v35 = vld [vmem:[%s3981_s2 + $0x84] ss:$16 sps:$4 sm:$0xff]  }
 0x79a   : > { %v3213_v44 = vpop.f32.mrf.mxu1  ;;  %v3428_v38 = vld [vmem:[%s4615_s1 + $0xa0] sm:$0xff]  }
 0x79b   : > { %v1812_v47 = vmul.f32 %v3494_v46, %v1808_v27  ;;  %2220 = vmatpush1.bf16.msra.mxu1 %v3377_v43  ;;  %v3388_v27 = vld [vmem:[%s3981_s2 + $0x8c] ss:$16 sps:$4 sm:$0xff]   ;;  %v3391_v46 = vld [vmem:[%s3981_s2 + $0x64] ss:$16 sps:$4 sm:$0xff]  }
 0x79c   : > { %2221 = vmatprep.subr.bf16.mxu1 %v3385_v35  ;;  %v3394_v44 = vld [vmem:[%s3981_s2 + $0x6c] ss:$16 sps:$4 sm:$0xff]  }
 0x79d   : > { %v3320_v48 = vpack.i.bf16 %v1812_v47, %v1811_v30  ;;  %v3389_v30 = vld [vmem:[%s3981_s2 + $0x60] ss:$16 sps:$4 sm:$0xff]   ;;  %v3392_v47 = vld [vmem:[%s3981_s2 + $0x68] ss:$16 sps:$4 sm:$0xff]  }
 0x79e   : > { %v3432_v43 = vld [vmem:[%s4615_s1 + $0x98] sm:$0xff]   ;;  %v3435_v35 = vld [vmem:[%s4615_s1 + $0x10] sm:$0xff]  }
 0x79f   : > { %3321 = vrot.lane.b32.xlu1 %v3320_v48, %s3684_s23  ;;  %2222 = vmatpush1.bf16.msra.mxu1 %v3383_v33  ;;  %v3397_v48 = vld [vmem:[%s3981_s2 + $0x44] ss:$16 sps:$4 sm:$0xff]  }
 0x7a0   : > { %2223 = vmatprep.subr.bf16.mxu1 %v3391_v46  ;;  %v3434_v33 = vld [vmem:[%s4615_s1 + $0xd0] sm:$0xff]   ;;  %v3438_v46 = vld [vmem:[%s4615_s1 + $0xc8] sm:$0xff]  }
 0x7a3   : > { %2224 = vmatpush1.bf16.msra.mxu1 %v3389_v30  ;;  %v3440_v30 = vld [vmem:[%s4615_s1 + $0x88] sm:$0xff]  }
 0x7a4   : > { %2225 = vmatprep.subr.bf16.mxu1 %v3397_v48  ;;  %v3442_v48 = vld [vmem:[%s4615_s1 + $0xc0] sm:$0xff]  }
 0x7b4   : > { %v1286_v52 = vpop.xlane.xlu1 %1285 }
 0x7b5   : > { %v1290_v26 = vadd.f32 %v4212_v42, %v1286_v52  ;;  %v3400_v52 = vld [vmem:[%s3981_s2 + $0x4c] ss:$16 sps:$4 sm:$0xff]  }
 0x7b7   : > { %3495 = vrcp.f32 %v1290_v26  ;;  %v3395_v26 = vld [vmem:[%s3981_s2 + $0x40] ss:$16 sps:$4 sm:$0xff]  }
 0x7b8   : > { %2226 = vmatpush1.bf16.msra.mxu1 %v3395_v26  ;;  %v3444_v26 = vld [vmem:[%s4615_s1 + $0x80] sm:$0xff]  }
 0x7c4   : > { %v3496_v54 = vpop.eup %3495 }
 0x7c5   : > { %v1347_v0 = vmul.f32 %v3496_v54, %v4227_v56  ;;  %v3398_v54 = vld [vmem:[%s3981_s2 + $0x48] ss:$16 sps:$4 sm:$0xff]  }
 0x802   : > { %v3312_v57 = vpop.permute.xlu0 %3311 }
 0x803   : > { %v3314_v59 = vunpack.i.h.bf16 %v3312_v57  ;;  %v3313_v60 = vunpack.i.l.bf16 %v3312_v57  ;;  %v3406_v57 = vld [vmem:[%s3981_s2 + $0x2c] ss:$16 sps:$4 sm:$0xff]  }
 0x805   : > { %v1838_v1 = vsel %vm1201_vm1, %v1348_v55, %v3314_v59  ;;  %v1837_v2 = vsel %vm1201_vm1, %v1347_v0, %v3313_v60  ;;  %v3380_v55 = vld [vmem:[%s3981_s2 + $0xa8] ss:$16 sps:$4 sm:$0xff]   ;;  %v3403_v0 = vld [vmem:[%s3981_s2 + $0x24] ss:$16 sps:$4 sm:$0xff]  }
 0x806   : > { %v3404_v59 = vld [vmem:[%s3981_s2 + $0x28] ss:$16 sps:$4 sm:$0xff]   ;;  %2227 = vmatprep.subr.bf16.mxu1 %v3403_v0  ;;  %v3409_v60 = vld [vmem:[%s3981_s2 + $0x4] ss:$16 sps:$4 sm:$0xff]   ;;  %v2049_v0 = vsub.s32 3, %v4127_v16 }
 0x809   : > { %v3317_v58 = vpop.permute.xlu1 %3316 }
 0x80a   : > { %v3319_v61 = vunpack.i.h.bf16 %v3317_v58  ;;  %v3318_v62 = vunpack.i.l.bf16 %v3317_v58  ;;  %v3401_v58 = vld [vmem:[%s3981_s2 + $0x20] ss:$16 sps:$4 sm:$0xff]  }
 0x80b   : > { %2228 = vmatpush1.bf16.msra.mxu1 %v3401_v58 }
 0x80c   : > { %v1841_v4 = vsel %vm1839_vm3, %v1838_v1, %v3319_v61  ;;  %v1840_v5 = vsel %vm1839_vm3, %v1837_v2, %v3318_v62  ;;  %v3412_v61 = vld [vmem:[%s3981_s2 + $0xc] ss:$16 sps:$4 sm:$0xff]   ;;  %v3407_v62 = vld [vmem:[%s3981_s2] ss:$16 sps:$4 sm:$0xff]   ;;  %2229 = vmatprep.subr.bf16.mxu1 %v3409_v60 }
 0x80f   : > { %2230 = vmatpush1.bf16.msra.mxu1 %v3407_v62 }
 0x811   : > { %v3322_v63 = vpop.permute.xlu1 %3321 }
 0x812   : > { %v3324_v3 = vunpack.i.h.bf16 %v3322_v63  ;;  %v3323_v42 = vunpack.i.l.bf16 %v3322_v63  ;;  %v3410_v63 = vld [vmem:[%s3981_s2 + $0x8] ss:$16 sps:$4 sm:$0xff]  }
 0x814   : > { %v1844_v6 = vsel %vm1842_vm4, %v1841_v4, %v3324_v3  ;;  %v1843_v56 = vsel %vm1842_vm4, %v1840_v5, %v3323_v42 }
 0x815   : > { %v1845_v7 = vpack.c.bf16 %v1844_v6, %v1843_v56 }
 0x817   : > { %3231 = vmatmul.mubr.bf16.vlgmr.msra.gmra.mxu0 %v1845_v7  ;;  %v2996_v7 = vld [vmem:[%s826_s16] ss:$0 sm:$0xff] }
 0x818   : > { %2290 = vmatprep.mubr.bf16.mxu0 %v3682_v53  ;;  %2259 = vmatpush1.bf16.msra.mxu0 %v3368_v23  ;;  %v3416_v23 = vld [vmem:[%s4615_s1 + $0xb8] sm:$0xff]  }
 0x819   : > { %2260 = vmatprep.subr.bf16.mxu0 %v3376_v37  ;;  %v3427_v37 = vld [vmem:[%s4615_s1 + $0x20] sm:$0xff]  }
 0x81c   : > { %2261 = vmatpush1.bf16.msra.mxu0 %v3374_v39  ;;  %v3429_v39 = vld [vmem:[%s4615_s1 + $0x58] sm:$0xff]  }
 0x81d   : > { %2262 = vmatprep.subr.bf16.mxu0 %v3382_v50  ;;  %v3431_v50 = vld [vmem:[%s4615_s1 + $0x18] sm:$0xff]  }
 0x820   : > { %2263 = vmatpush1.bf16.msra.mxu0 %v3380_v55  ;;  %v3433_v55 = vld [vmem:[%s4615_s1 + $0x50] sm:$0xff]  }
 0x821   : > { %2264 = vmatprep.subr.bf16.mxu0 %v3388_v27  ;;  %v3437_v27 = vld [vmem:[%s4615_s1 + $0x48] sm:$0xff]  }
 0x824   : > { %2265 = vmatpush1.bf16.msra.mxu0 %v3386_v45  ;;  %v3436_v45 = vld [vmem:[%s4615_s1 + $0x90] sm:$0xff]  }
 0x825   : > { %2266 = vmatprep.subr.bf16.mxu0 %v3394_v44  ;;  %v3439_v44 = vld [vmem:[%s4615_s1 + $0x8] sm:$0xff]  }
 0x828   : > { %2267 = vmatpush1.bf16.msra.mxu0 %v3392_v47  ;;  %v3441_v47 = vld [vmem:[%s4615_s1 + $0x40] sm:$0xff]  }
 0x829   : > { %2268 = vmatprep.subr.bf16.mxu0 %v3400_v52  ;;  %v3443_v52 = vld [vmem:[%s4615_s1] sm:$0xff]  }
 0x82c   : > { %2269 = vmatpush1.bf16.msra.mxu0 %v3398_v54  ;;  %v2033_v54 = vld [vmem:[%s4037_s10] sm:$0xf] }
 0x82d   : > { %2270 = vmatprep.subr.bf16.mxu0 %v3406_v57  ;;  %v2038_v57 = vrot.slane %v2033_v54, %v967_v17  ;;  %v2046_v58 = vrot.slane %v2033_v54, %v975_v40  ;;  %v2050_v60 = vrot.slane %v2033_v54, %v2049_v0 }
 0x830   : > { %2271 = vmatpush1.bf16.msra.mxu0 %v3404_v59  ;;  %v2042_v59 = vrot.slane %v2033_v54, %v971_v20 }
 0x831   : > { %2272 = vmatprep.subr.bf16.mxu0 %v3412_v61 }
 0x834   : > { %2273 = vmatpush1.bf16.msra.mxu0 %v3410_v63 }
 0x835   : > { %3124 = vmatprep.subr.bf16.mxu0 %v3414_v15 }
 0x8d7   : > { %v1951_v9 = vpop.f32.mrf.mxu0 }
 0x8d8   : > { %v1952_v10 = vadd.f32 %v2987_v8, %v1951_v9 }
 0x8d9   : > { %v3232_v11 = vpop.f32.mrf.mxu0 }
 0x8da   : > { %v4344_v13 = vadd.f32 %v3517_v12, %v1952_v10  ;;  %v2997_v11 = vld [vmem:[%s829_s28] ss:$0 sm:$0xff] }
 0x8db   : > { %v1954_v14 = vpop.f32.mrf.mxu0 }
 0x8dc   : > { %v1955_v18 = vadd.f32 %v2987_v8, %v1954_v14  ;;  %1962 = vadd.xlane.f32.xlu0 %v4344_v13 }
 0x8dd   : > { %v3233_v53 = vpop.f32.mrf.mxu0 }
 0x8de   : > { %v4350_v51 = vadd.f32 %v3518_v19, %v1955_v18  ;;  %v3413_v19 = vld [vmem:[%s4615_s1 + $0x78] sm:$0xff]  }
 0x8df   : > { %3102 = vmatprep.subr.bf16.mxu1 %v3413_v19 }
 0x8e0   : > { %1964 = vadd.xlane.f32.xlu1 %v4350_v51 }
 0x965   : > { %v1963_v24 = vpop.xlane.xlu0 %1962 }
 0x966   : > { %v1966_v25 = vmul.f32 0.0078125, %v1963_v24  ;;  %v3418_v24 = vld [vmem:[%s4615_s1 + $0xf0] sm:$0xff]  }
 0x968   : > { %v4358_v28 = vsub.f32 %v4344_v13, %v1966_v25  ;;  %v3419_v25 = vld [vmem:[%s4615_s1 + $0x30] sm:$0xff]  }
 0x969   : > { %v1965_v29 = vpop.xlane.xlu1 %1964 }
 0x96a   : > { %v1967_v31 = vmul.f32 0.0078125, %v1965_v29  ;;  %v1970_v32 = vmul.f32 %v4358_v28, %v4358_v28  ;;  %v3421_v29 = vld [vmem:[%s4615_s1 + $0x68] sm:$0xff]  }
 0x96c   : > { %v4363_v49 = vsub.f32 %v4350_v51, %v1967_v31  ;;  %1972 = vadd.xlane.f32.xlu0 %v1970_v32  ;;  %v3422_v31 = vld [vmem:[%s4615_s1 + $0xe8] sm:$0xff]  }
 0x96d   : > { %v3423_v32 = vld [vmem:[%s4615_s1 + $0x28] sm:$0xff]  }
 0x96e   : > { %v1971_v34 = vmul.f32 %v4363_v49, %v4363_v49 }
 0x970   : > { %1974 = vadd.xlane.f32.xlu0 %v1971_v34  ;;  %v3425_v34 = vld [vmem:[%s4615_s1 + $0x60] sm:$0xff]  }
 0x9f5   : > { %v1973_v1 = vpop.xlane.xlu0 %1972 }
 0x9f6   : > { %v1976_v2 = vmul.f32 0.0078125, %v1973_v1 }
 0x9f8   : > { %v1978_v3 = vadd.f32 1e-06, %v1976_v2 }
 0x9f9   : > { %v1975_v42 = vpop.xlane.xlu0 %1974 }
 0x9fa   : > { %3497 = vrsqrt.f32 %v1978_v3  ;;  %v1977_v4 = vmul.f32 0.0078125, %v1975_v42 }
 0x9fc   : > { %v1979_v5 = vadd.f32 1e-06, %v1977_v4 }
 0x9fe   : > { %3499 = vrsqrt.f32 %v1979_v5 }
 0xa07   : > { %v3498_v6 = vpop.eup %3497 }
 0xa08   : > { %v1982_v56 = vmul.f32 %v3498_v6, %v4358_v28  ;;  %v3420_v28 = vld [vmem:[%s4615_s1 + $0xb0] sm:$0xff]  }
 0xa0a   : > { %v1990_v10 = vmul.f32 %v2996_v7, %v1982_v56 }
 0xa0b   : > { %v3500_v8 = vpop.eup %3499 }
 0xa0c   : > { %v1983_v9 = vmul.f32 %v3500_v8, %v4363_v49  ;;  %v1998_v14 = vadd.f32 %v2997_v11, %v1990_v10  ;;  %v3424_v49 = vld [vmem:[%s4615_s1 + $0xa8] sm:$0xff]  }
 0xa0e   : > { %v1991_v12 = vmul.f32 %v2996_v7, %v1983_v9 }
 0xa10   : > { %v1999_v18 = vadd.f32 %v2997_v11, %v1991_v12 }
 0xa12   : > { %v2000_v53 = vpack.c.bf16 %v1999_v18, %v1998_v14 }
 0xa14   : > { %2248 = vmatmul.mubr.bf16.vlgmr.msra.gmra.mxu1 %v2000_v53  ;;  %2291 = vmatmul.mubr.bf16.vlgmr.msra.gmra.mxu0 %v2000_v53 }
 0xa15   : > { %3103 = vmatpush3.bf16.msra.mxu1 %v3415_v22  ;;  %3125 = vmatpush3.bf16.msra.mxu0 %v3416_v23 }
 0xa16   : > { %3104 = vmatprep.subr.bf16.mxu1 %v3417_v21  ;;  %3126 = vmatprep.subr.bf16.mxu0 %v3418_v24 }
 0xa19   : > { %3105 = vmatpush3.bf16.msra.mxu1 %v3419_v25  ;;  %3127 = vmatpush3.bf16.msra.mxu0 %v3420_v28 }
 0xa1a   : > { %3106 = vmatprep.subr.bf16.mxu1 %v3421_v29  ;;  %3128 = vmatprep.subr.bf16.mxu0 %v3422_v31 }
 0xa1d   : > { %3107 = vmatpush3.bf16.msra.mxu1 %v3423_v32  ;;  %3129 = vmatpush3.bf16.msra.mxu0 %v3424_v49 }
 0xa1e   : > { %3108 = vmatprep.subr.bf16.mxu1 %v3425_v34  ;;  %3130 = vmatprep.subr.bf16.mxu0 %v3426_v36 }
 0xa21   : > { %3109 = vmatpush3.bf16.msra.mxu1 %v3427_v37  ;;  %3131 = vmatpush3.bf16.msra.mxu0 %v3428_v38 }
 0xa22   : > { %3110 = vmatprep.subr.bf16.mxu1 %v3429_v39  ;;  %3132 = vmatprep.subr.bf16.mxu0 %v3430_v41 }
 0xa25   : > { %3111 = vmatpush3.bf16.msra.mxu1 %v3431_v50  ;;  %3133 = vmatpush3.bf16.msra.mxu0 %v3432_v43 }
 0xa26   : > { %3112 = vmatprep.subr.bf16.mxu1 %v3433_v55  ;;  %3134 = vmatprep.subr.bf16.mxu0 %v3434_v33 }
 0xa29   : > { %3113 = vmatpush3.bf16.msra.mxu1 %v3435_v35  ;;  %3135 = vmatpush3.bf16.msra.mxu0 %v3436_v45 }
 0xa2a   : > { %3114 = vmatprep.subr.bf16.mxu1 %v3437_v27  ;;  %3136 = vmatprep.subr.bf16.mxu0 %v3438_v46 }
 0xa2d   : > { %3115 = vmatpush3.bf16.msra.mxu1 %v3439_v44  ;;  %3137 = vmatpush3.bf16.msra.mxu0 %v3440_v30 }
 0xa2e   : > { %3116 = vmatprep.subr.bf16.mxu1 %v3441_v47  ;;  %3138 = vmatprep.subr.bf16.mxu0 %v3442_v48 }
 0xa31   : > { %3117 = vmatpush3.bf16.msra.mxu1 %v3443_v52  ;;  %3139 = vmatpush3.bf16.msra.mxu0 %v3444_v26 }
 0xad4   : > { %v2249_v61 = vpop.f32.mrf.mxu1  ;;  %v2292_v62 = vpop.f32.mrf.mxu0 }
 0xad5   : > { %v4447_v63 = vadd.f32 %v2249_v61, %v2038_v57  ;;  %v4449_v1 = vadd.f32 %v2292_v62, %v2046_v58 }
 0xad6   : > { %v2251_v2 = vpop.f32.mrf.mxu1  ;;  %v2294_v3 = vpop.f32.mrf.mxu0 }
 0xad7   : > { %v2301_v42 = vmul.f32 %v4447_v63, %v4447_v63  ;;  %v2303_v17 = vmul.f32 %v4449_v1, %v4449_v1  ;;  %v4455_v4 = vadd.f32 %v2251_v2, %v2042_v59  ;;  %v4457_v40 = vadd.f32 %v2294_v3, %v2050_v60 }
 0xad8   : > { %v2253_v16 = vpop.f32.mrf.mxu1  ;;  %v2296_v20 = vpop.f32.mrf.mxu0 }
 0xad9   : > { %v2309_v5 = vmul.f32 %v2301_v42, %v4447_v63  ;;  %v2311_v6 = vmul.f32 %v2303_v17, %v4449_v1  ;;  %v2302_v56 = vmul.f32 %v4455_v4, %v4455_v4  ;;  %v2304_v7 = vmul.f32 %v4457_v40, %v4457_v40 }
 0xada   : > { %v4465_v8 = vadd.f32 %v2253_v16, %v2038_v57  ;;  %v4467_v9 = vadd.f32 %v2296_v20, %v2046_v58  ;;  %v2255_v10 = vpop.f32.mrf.mxu1  ;;  %v2298_v11 = vpop.f32.mrf.mxu0 }
 0xadb   : > { %v2317_v12 = vmul.f32 0.044715, %v2309_v5  ;;  %v2319_v14 = vmul.f32 0.044715, %v2311_v6  ;;  %v2310_v18 = vmul.f32 %v2302_v56, %v4455_v4  ;;  %v2312_v53 = vmul.f32 %v2304_v7, %v4457_v40 }
 0xadc   : > { %v2305_v19 = vmul.f32 %v4465_v8, %v4465_v8  ;;  %v2307_v15 = vmul.f32 %v4467_v9, %v4467_v9  ;;  %v4475_v22 = vadd.f32 %v2255_v10, %v2042_v59  ;;  %v4477_v23 = vadd.f32 %v2298_v11, %v2050_v60 }
 0xadd   : > { %v2325_v21 = vadd.f32 %v2317_v12, %v4447_v63  ;;  %v2327_v24 = vadd.f32 %v2319_v14, %v4449_v1  ;;  %v2318_v25 = vmul.f32 0.044715, %v2310_v18  ;;  %v2320_v28 = vmul.f32 0.044715, %v2312_v53 }
 0xade   : > { %v2313_v29 = vmul.f32 %v2305_v19, %v4465_v8  ;;  %v2315_v31 = vmul.f32 %v2307_v15, %v4467_v9  ;;  %v2306_v32 = vmul.f32 %v4475_v22, %v4475_v22  ;;  %v2308_v49 = vmul.f32 %v4477_v23, %v4477_v23 }
 0xadf   : > { %v2333_v34 = vmul.f32 0.7978846, %v2325_v21  ;;  %v2335_v36 = vmul.f32 0.7978846, %v2327_v24  ;;  %v2326_v37 = vadd.f32 %v2318_v25, %v4455_v4  ;;  %v2328_v38 = vadd.f32 %v2320_v28, %v4457_v40 }
 0xae0   : > { %v2321_v39 = vmul.f32 0.044715, %v2313_v29  ;;  %v2323_v41 = vmul.f32 0.044715, %v2315_v31  ;;  %v2314_v50 = vmul.f32 %v2306_v32, %v4475_v22  ;;  %v2316_v43 = vmul.f32 %v2308_v49, %v4477_v23 }
 0xae1   : > { %3501 = vtanh.f32 %v2333_v34  ;;  %v2334_v55 = vmul.f32 0.7978846, %v2326_v37  ;;  %v2336_v33 = vmul.f32 0.7978846, %v2328_v38 }
 0xae2   : > { %3503 = vtanh.f32 %v2335_v36  ;;  %v2329_v35 = vadd.f32 %v2321_v39, %v4465_v8  ;;  %v2331_v45 = vadd.f32 %v2323_v41, %v4467_v9  ;;  %v2322_v27 = vmul.f32 0.044715, %v2314_v50 }
 0xae3   : > { %3505 = vtanh.f32 %v2334_v55  ;;  %v2324_v46 = vmul.f32 0.044715, %v2316_v43 }
 0xae4   : > { %3507 = vtanh.f32 %v2336_v33  ;;  %v2337_v44 = vmul.f32 0.7978846, %v2329_v35  ;;  %v2339_v30 = vmul.f32 0.7978846, %v2331_v45  ;;  %v2330_v47 = vadd.f32 %v2322_v27, %v4475_v22 }
 0xae5   : > { %v2332_v48 = vadd.f32 %v2324_v46, %v4477_v23 }
 0xae6   : > { %3509 = vtanh.f32 %v2337_v44  ;;  %v2338_v52 = vmul.f32 0.7978846, %v2330_v47 }
 0xae7   : > { %3511 = vtanh.f32 %v2339_v30  ;;  %v2340_v26 = vmul.f32 0.7978846, %v2332_v48 }
 0xae8   : > { %3513 = vtanh.f32 %v2338_v52 }
 0xae9   : > { %3515 = vtanh.f32 %v2340_v26 }
 0xaee   : > { %v3502_v54 = vpop.eup %3501 }
 0xaef   : > { %v3504_v0 = vpop.eup %3503  ;;  %v2349_v61 = vadd.f32 1.0, %v3502_v54 }
 0xaf0   : > { %v3506_v57 = vpop.eup %3505  ;;  %v2351_v3 = vadd.f32 1.0, %v3504_v0 }
 0xaf1   : > { %v3508_v58 = vpop.eup %3507  ;;  %v2350_v59 = vadd.f32 1.0, %v3506_v57  ;;  %v2357_v7 = vmul.f32 0.5, %v2349_v61 }
 0xaf2   : > { %v2352_v62 = vadd.f32 1.0, %v3508_v58  ;;  %v2359_v14 = vmul.f32 0.5, %v2351_v3 }
 0xaf3   : > { %v3510_v60 = vpop.eup %3509  ;;  %v2358_v56 = vmul.f32 0.5, %v2350_v59  ;;  %v2365_v25 = vmul.f32 %v2357_v7, %v4447_v63  ;;  %v3030_v63 = vld [vmem:[%s836_s13] ss:$0 sm:$0xff] }
 0xaf4   : > { %v3512_v2 = vpop.eup %3511  ;;  %v2353_v42 = vadd.f32 1.0, %v3510_v60  ;;  %v2360_v12 = vmul.f32 0.5, %v2352_v62  ;;  %v2367_v31 = vmul.f32 %v2359_v14, %v4449_v1 }
 0xaf5   : > { %v3514_v17 = vpop.eup %3513  ;;  %v2355_v16 = vadd.f32 1.0, %v3512_v2  ;;  %v2366_v21 = vmul.f32 %v2358_v56, %v4455_v4 }
 0xaf6   : > { %v3516_v20 = vpop.eup %3515  ;;  %v2361_v5 = vmul.f32 0.5, %v2353_v42  ;;  %v2354_v6 = vadd.f32 1.0, %v3514_v17  ;;  %v2368_v28 = vmul.f32 %v2360_v12, %v4457_v40 }
 0xaf7   : > { %v2363_v10 = vmul.f32 0.5, %v2355_v16  ;;  %v2356_v11 = vadd.f32 1.0, %v3516_v20 }
 0xaf8   : > { %v2362_v18 = vmul.f32 0.5, %v2354_v6  ;;  %v2369_v53 = vmul.f32 %v2361_v5, %v4465_v8 }
 0xaf9   : > { %v2364_v19 = vmul.f32 0.5, %v2356_v11  ;;  %v2371_v15 = vmul.f32 %v2363_v10, %v4467_v9 }
 0xafa   : > { %v2370_v24 = vmul.f32 %v2362_v18, %v4475_v22  ;;  %v2373_v34 = vpack.c.bf16 %v2369_v53, %v2365_v25 }
 0xafb   : > { %v2372_v29 = vmul.f32 %v2364_v19, %v4477_v23  ;;  %v2375_v8 = vpack.c.bf16 %v2371_v15, %v2367_v31 }
 0xafc   : > { %v2374_v32 = vpack.c.bf16 %v2370_v24, %v2366_v21 }
 0xafd   : > { %v2376_v49 = vpack.c.bf16 %v2372_v29, %v2368_v28 }
 0xafe   : > { %2672 = vmatprep.mubr.bf16.mxu1 %v2374_v32 }
 0xaff   : > { %2713 = vmatprep.mubr.bf16.mxu0 %v2376_v49  ;;  %2673 = vmatmul.mubr.bf16.vlgmr.msra.gmra.mxu1 %v2373_v34 }
 0xb00   : > { %2714 = vmatmul.mubr.bf16.vlgmr.msra.gmra.mxu0 %v2375_v8 }
 0xbbf   : > { %v3118_v4 = vpop.f32.mrf.mxu1 }
 0xbc0   : > { %v3140_v9 = vpop.f32.mrf.mxu0 }
 0xbc1   : > { %v3119_v40 = vpop.f32.mrf.mxu1 }
 0xbc2   : > { %v3120_v22 = vadd.f32 %v3119_v40, %v3118_v4  ;;  %v3141_v23 = vpop.f32.mrf.mxu0 }
 0xbc3   : > { %v3121_v36 = vpop.f32.mrf.mxu1  ;;  %v3142_v37 = vadd.f32 %v3141_v23, %v3140_v9 }
 0xbc4   : > { %v2675_v1 = vadd.f32 %v3120_v22, %v3030_v63  ;;  %v3143_v38 = vpop.f32.mrf.mxu0 }
 0xbc5   : > { %v3122_v39 = vpop.f32.mrf.mxu1 }
 0xbc6   : > { %v2716_v41 = vadd.f32 %v3142_v37, %v2675_v1  ;;  %v3123_v50 = vadd.f32 %v3122_v39, %v3121_v36  ;;  %v3144_v43 = vpop.f32.mrf.mxu0 }
 0xbc7   : > { %v3145_v35 = vadd.f32 %v3144_v43, %v3143_v38 }
 0xbc8   : > { %v2722_v55 = vadd.f32 %v2716_v41, %v4344_v13  ;;  %v2678_v33 = vadd.f32 %v3123_v50, %v3030_v63 }
 0xbca   : > { %2724 = vst [vmem:[%s4608_s24] sm:$0xff] %v2722_v55  ;;  %v2719_v45 = vadd.f32 %v3145_v35, %v2678_v33 }
 0xbcc   : > { %v2723_v27 = vadd.f32 %v2719_v45, %v4350_v51 }
 0xbce   : > { %2725 = vst [vmem:[%s4608_s24 + $0x8] sm:$0xff] %v2723_v27 }
 0xbcf PF: > { %s4619_s30 = sld [smem:[#allocation14_spill]] }
 0xbd0   : > { %s4620_s27 = sld [smem:[#allocation12_spill]] }
 0xbd1   : > { %s4621_s28 = sld [smem:[#allocation13_spill]] }
 0xbd2   : > { %s4622_s29 = sld [smem:[#allocation15_spill]] }
 0xbd5   : > { %p32_p11 = scmp.ge.s32.totalorder %s4619_s30, 4  }
 0xbd7   :  { %34 = sbr.rel (!%p32_p11) target bundleno = 20 (0x14), region = 194 }
 0xbdc   :  { %2737 = vsyncpa [#allocation3], 1 }
 0xbdd   :  { %2739 = vsyncpa [#allocation3 + $0x1], 1 }
 0xbde   :  { %2740 = vsyncpa [#allocation5], 1 }
 0xbdf   :  { %2742 = vsyncpa [#allocation5 + $0x1], 1 }
 0xbe0   :  { %2743 = vsyncpa [#allocation8], 1 }
 0xbe1   :  { %2745 = vsyncpa [#allocation8 + $0x1], 1 }

// kernel: forward.7
= control target key start
LH: loop header
LB: loop body
LE: loop exit
PB: predicated region body
PF: predicated region fallthrough
CT: control target
= control target key end

     0   :  { %s4204_s27 = smov 0   ;;  %s5216_s0 = inlined_call_operand.vmem [shape: f32[32,128], index: 0, kind: input, shape index: {}]   ;;  %s5217_s1 = inlined_call_operand.vmem [shape: f32[32,32], index: 1, kind: input, shape index: {}]   ;;  %s5218_s2 = inlined_call_operand.vmem [shape: f32[1,128], index: 2, kind: input, shape index: {}]   ;;  %s5219_s3 = inlined_call_operand.vmem [shape: f32[1,128], index: 3, kind: input, shape index: {}]   ;;  %s5220_s4 = inlined_call_operand.vmem [shape: f32[2,1,128], index: 4, kind: input, shape index: {}]   ;;  %s5221_s5 = inlined_call_operand.vmem [shape: f32[2,1,128], index: 5, kind: input, shape index: {}]   ;;  %s5222_s6 = inlined_call_operand.vmem [shape: bf16[2,128,384], index: 6, kind: input, shape index: {}]   ;;  %s5223_s7 = inlined_call_operand.vmem [shape: f32[2,1,384], index: 7, kind: input, shape index: {}]   ;;  %s5224_s8 = inlined_call_operand.vmem [shape: f32[2,1,128], index: 8, kind: input, shape index: {}]   ;;  %s5225_s9 = inlined_call_operand.vmem [shape: f32[2,1,128], index: 9, kind: input, shape index: {}]   ;;  %s5226_s10 = inlined_call_operand.vmem [shape: bf16[2,128,128], index: 10, kind: input, shape index: {}]   ;;  %s5227_s11 = inlined_call_operand.vmem [shape: f32[2,1,128], index: 11, kind: input, shape index: {}]   ;;  %s5228_s12 = inlined_call_operand.vmem [shape: f32[2,1,128], index: 12, kind: input, shape index: {}]   ;;  %s5229_s13 = inlined_call_operand.vmem [shape: f32[2,1,128], index: 13, kind: input, shape index: {}]   ;;  %s5230_s14 = inlined_call_operand.vmem [shape: bf16[2,128,512], index: 14, kind: input, shape index: {}]   ;;  %s5231_s15 = inlined_call_operand.vmem [shape: f32[2,1,512], index: 15, kind: input, shape index: {}]   ;;  %s5232_s16 = inlined_call_operand.vmem [shape: bf16[2,512,128], index: 16, kind: input, shape index: {}]   ;;  %s5233_s17 = inlined_call_operand.vmem [shape: f32[2,1,128], index: 17, kind: input, shape index: {}]   ;;  %s5234_s18 = inlined_call_operand.vmem [shape: f32[32,128], index: 18, kind: output, shape index: {}]  }
   0x1   :  { %5240 = sst [smem:[#allocation3_spill]] %s5216_s0 }
   0x2   :  { %5241 = sst [smem:[#allocation4_spill]] %s5217_s1 }
   0x3   :  { %5242 = sst [smem:[#allocation5_spill]] %s5218_s2 }
   0x4   :  { %5243 = sst [smem:[#allocation6_spill]] %s5219_s3 }
   0x5   :  { %5244 = sst [smem:[#allocation7_spill]] %s5220_s4 }
   0x6   :  { %5245 = sst [smem:[#allocation8_spill]] %s5222_s6 }
   0x7   :  { %5246 = sst [smem:[#allocation9_spill]] %s5223_s7 }
   0x8   :  { %5247 = sst [smem:[#allocation10_spill]] %s5224_s8 }
   0x9   :  { %5248 = sst [smem:[#allocation11_spill]] %s5226_s10 }
   0xa   :  { %5249 = sst [smem:[#allocation12_spill]] %s5234_s18 }
   0xb LB: > { %5250 = sst [smem:[#allocation2_spill]] %s4103_s27  ;;  %s3417_s28 = sadd.s32 4294967295, %s4103_s27   ;;  %s4103_s27 = sphi %s4204_s27, %s28_s27  }
   0xc   : > { %p3420_p0 = scmp.ge.s32.totalorder %s4103_s27, 1  ;;  %p619_p1 = scmp.lt.s32.totalorder %s4103_s27, 3 }
   0xe   : > { %p620_p2 = pnand %p3420_p0, %p619_p1 }
   0xf   : > { %p715_p3 = scmp.lt.s32.totalorder (!%p620_p2), %s3417_s28, 1  ;;  %s5253_s6 = sld [smem:[#allocation8_spill]] (!%p620_p2) }
  0x10   : > { %623 = sbr.rel (%p620_p2) target bundleno = 3336 (0xd08), region = 92  ;;  %s5254_s7 = sld [smem:[#allocation9_spill]] (!%p620_p2) }
  0x11   : > { %s5255_s10 = sld [smem:[#allocation11_spill]] (!%p620_p2)  ;;  %p3429_p4 = scmp.ne.s32.totalorder (!%p620_p2), %s3417_s28, 0 }
  0x15   : > { %s4212_s29 = scalar_select %p715_p3, %s3417_s28, 1 }
  0x16   : > { %s5257_s18 = sld [smem:[#allocation5_spill]] (!%p3429_p4) }
  0x17   : > { %s3777_s22 = smul.u32 192, %s4212_s29  ;;  %s3554_s19 = sshll.u32 %s4212_s29, 6 }
  0x18   : > { %s3778_s25 = smul.u32 3, %s4212_s29  ;;  %s4246_s23 = scalar_lea.vmem %s5255_s10, %s3554_s19 }
  0x19   : > { %s4235_s3 = scalar_lea.vmem %s5253_s6, %s3777_s22  ;;  %s3555_s4 = sshll.u32 %s4212_s29, 8 }
  0x1a   : > { %s4241_s20 = scalar_lea.vmem %s5254_s7, %s3778_s25  ;;  %s4264_s7 = scalar_lea.vmem %s5230_s14, %s3555_s4 }
  0x1b   : > { %s3426_s19 = sshll.u32 %s4212_s29, 2  ;;  %s4275_s0 = scalar_lea.vmem %s5232_s16, %s3555_s4 }
  0x1c   : > { %s4270_s8 = scalar_lea.vmem %s5231_s15, %s3426_s19  ;;  %s766_s22 = scalar_lea.vmem %s5233_s17, %s4212_s29 }
  0x1d   : > { %771 = sbr.rel (%p3429_p4) target bundleno = 351 (0x15f), region = 96  ;;  %s5256_s6 = sld [smem:[#allocation3_spill]] (!%p3429_p4) }
  0x1e   : > { %s5258_s30 = sld [smem:[#allocation6_spill]] (!%p3429_p4) }
  0x1f   : > { %s5259_s1 = sld [smem:[#allocation12_spill]] (!%p3429_p4) }
  0x22   : > { %v3430_v33 = vld [vmem:[%s5257_s18] ss:$0 sm:$0xff] }
  0x23   : > { %v772_v0 = vld [vmem:[%s5256_s6] sm:$0xff]  ;;  %v774_v1 = vld [vmem:[%s5256_s6 + $0x10] sm:$0xff]  ;;  %v773_v2 = vld [vmem:[%s5256_s6 + $0x8] sm:$0xff] }
  0x24   : > { %778 = vadd.xlane.f32.xlu0 %v772_v0  ;;  %782 = vadd.xlane.f32.xlu1 %v774_v1  ;;  %v775_v3 = vld [vmem:[%s5256_s6 + $0x18] sm:$0xff]  ;;  %v3431_v35 = vld [vmem:[%s5258_s30] ss:$0 sm:$0xff] }
  0x28   : > { %780 = vadd.xlane.f32.xlu0 %v773_v2  ;;  %784 = vadd.xlane.f32.xlu1 %v775_v3 }
  0xad   : > { %v779_v4 = vpop.xlane.xlu0 %778  ;;  %v783_v5 = vpop.xlane.xlu1 %782 }
  0xae   : > { %v787_v6 = vmul.f32 0.0078125, %v779_v4  ;;  %v789_v7 = vmul.f32 0.0078125, %v783_v5 }
  0xb0   : > { %v791_v8 = vsub.f32 %v772_v0, %v787_v6  ;;  %v793_v9 = vsub.f32 %v774_v1, %v789_v7 }
  0xb1   : > { %v781_v10 = vpop.xlane.xlu0 %780  ;;  %v785_v11 = vpop.xlane.xlu1 %784 }
  0xb2   : > { %v788_v12 = vmul.f32 0.0078125, %v781_v10  ;;  %v795_v13 = vmul.f32 %v791_v8, %v791_v8  ;;  %v790_v14 = vmul.f32 0.0078125, %v785_v11  ;;  %v797_v17 = vmul.f32 %v793_v9, %v793_v9 }
  0xb4   : > { %v792_v15 = vsub.f32 %v773_v2, %v788_v12  ;;  %799 = vadd.xlane.f32.xlu0 %v795_v13  ;;  %v794_v16 = vsub.f32 %v775_v3, %v790_v14 }
  0xb6   : > { %v796_v18 = vmul.f32 %v792_v15, %v792_v15  ;;  %v798_v19 = vmul.f32 %v794_v16, %v794_v16 }
  0xb8   : > { %803 = vadd.xlane.f32.xlu0 %v797_v17  ;;  %801 = vadd.xlane.f32.xlu1 %v796_v18 }
  0xbc   : > { %805 = vadd.xlane.f32.xlu1 %v798_v19 }
 0x13d   : > { %v800_v20 = vpop.xlane.xlu0 %799 }
 0x13e   : > { %v807_v21 = vmul.f32 0.0078125, %v800_v20 }
 0x140   : > { %v811_v22 = vadd.f32 1e-06, %v807_v21 }
 0x141   : > { %v802_v23 = vpop.xlane.xlu1 %801  ;;  %v804_v24 = vpop.xlane.xlu0 %803 }
 0x142   : > { %3791 = vrsqrt.f32 %v811_v22  ;;  %v808_v25 = vmul.f32 0.0078125, %v802_v23  ;;  %v809_v26 = vmul.f32 0.0078125, %v804_v24 }
 0x144   : > { %v812_v27 = vadd.f32 1e-06, %v808_v25  ;;  %v813_v28 = vadd.f32 1e-06, %v809_v26 }
 0x145   : > { %v806_v29 = vpop.xlane.xlu1 %805 }
 0x146   : > { %3793 = vrsqrt.f32 %v812_v27  ;;  %v810_v30 = vmul.f32 0.0078125, %v806_v29 }
 0x147   : > { %3795 = vrsqrt.f32 %v813_v28 }
 0x148   : > { %v814_v31 = vadd.f32 1e-06, %v810_v30 }
 0x14a   : > { %3797 = vrsqrt.f32 %v814_v31 }
 0x14f   : > { %v3792_v32 = vpop.eup %3791 }
 0x150   : > { %v819_v34 = vmul.f32 %v3792_v32, %v791_v8 }
 0x152   : > { %v829_v36 = vmul.f32 %v3430_v33, %v819_v34 }
 0x153   : > { %v3794_v37 = vpop.eup %3793 }
 0x154   : > { %v3796_v38 = vpop.eup %3795  ;;  %v839_v39 = vadd.f32 %v3431_v35, %v829_v36  ;;  %v820_v40 = vmul.f32 %v3794_v37, %v792_v15 }
 0x155   : > { %v821_v41 = vmul.f32 %v3796_v38, %v793_v9 }
 0x156   : > { %843 = vst [vmem:[%s5259_s1] sm:$0xff] %v839_v39  ;;  %v830_v42 = vmul.f32 %v3430_v33, %v820_v40 }
 0x157   : > { %v3798_v43 = vpop.eup %3797  ;;  %v831_v44 = vmul.f32 %v3430_v33, %v821_v41 }
 0x158   : > { %v840_v45 = vadd.f32 %v3431_v35, %v830_v42  ;;  %v822_v46 = vmul.f32 %v3798_v43, %v794_v16 }
 0x159   : > { %v841_v47 = vadd.f32 %v3431_v35, %v831_v44 }
 0x15a   : > { %844 = vst [vmem:[%s5259_s1 + $0x8] sm:$0xff] %v840_v45  ;;  %v832_v48 = vmul.f32 %v3430_v33, %v822_v46 }
 0x15b   : > { %845 = vst [vmem:[%s5259_s1 + $0x10] sm:$0xff] %v841_v47 }
 0x15c   : > { %v842_v49 = vadd.f32 %v3431_v35, %v832_v48 }
 0x15e   : > { %846 = vst [vmem:[%s5259_s1 + $0x18] sm:$0xff] %v842_v49 }
 0x15f PF: > { %s5260_s24 = sld [smem:[#allocation12_spill]]  ;;  %v3829_v54 = vld [vmem:[%s4235_s3 + $0xac] ss:$12 sps:$4 sm:$0xff]   ;;  %v3831_v55 = vld [vmem:[%s4235_s3 + $0xa8] ss:$12 sps:$4 sm:$0xff]   ;;  %v4105_v25 = vmov 0   ;;  %s5263_s2 = scalar_lea.vmem %s5221_s5, %s4212_s29 }
 0x160   : > { %1097 = vmatprep.subr.bf16.mxu0 %v3829_v54  ;;  %v3832_v8 = vld [vmem:[%s4235_s3 + $0x94] ss:$12 sps:$4 sm:$0xff]   ;;  %v3834_v9 = vld [vmem:[%s4235_s3 + $0xb0] ss:$12 sps:$4 sm:$0xff]   ;;  %v3838_v12 = vld [vmem:[%s4235_s3 + $0x98] ss:$12 sps:$4 sm:$0xff]   ;;  %1129 = vmatprep.mubr.bf16.mxu0 %v4105_v25  ;;  %s5270_s26 = scalar_lea.vmem %s5229_s13, %s4212_s29 }
 0x161   : > { %1098 = vmatpush1.bf16.msra.mxu0 %v3831_v55  ;;  %v3835_v10 = vld [vmem:[%s4235_s3 + $0x90] ss:$12 sps:$4 sm:$0xff]   ;;  %3665 = vmatprep.subr.bf16.mxu1 %v3834_v9  ;;  %v3839_v13 = vld [vmem:[%s4235_s3 + $0x78] ss:$12 sps:$4 sm:$0xff]   ;;  %v3842_v15 = vld [vmem:[%s4235_s3 + $0x80] ss:$12 sps:$4 sm:$0xff]  }
 0x162   : > { %1099 = vmatprep.subr.bf16.mxu0 %v3832_v8  ;;  %3666 = vmatpush3.bf16.msra.mxu1 %v3834_v9  ;;  %v3836_v11 = vld [vmem:[%s4235_s3 + $0x7c] ss:$12 sps:$4 sm:$0xff]   ;;  %v3840_v14 = vld [vmem:[%s4235_s3 + $0x64] ss:$12 sps:$4 sm:$0xff]   ;;  %v3843_v16 = vld [vmem:[%s4235_s3 + $0x60] ss:$12 sps:$4 sm:$0xff]  }
 0x163   : > { %3667 = vmatprep.subr.bf16.mxu1 %v3838_v12  ;;  %v3844_v17 = vld [vmem:[%s4235_s3 + $0x4c] ss:$12 sps:$4 sm:$0xff]   ;;  %v3846_v18 = vld [vmem:[%s4235_s3 + $0x68] ss:$12 sps:$4 sm:$0xff]   ;;  %v3850_v21 = vld [vmem:[%s4235_s3 + $0x50] ss:$12 sps:$4 sm:$0xff]  }
 0x164   : > { %v3847_v19 = vld [vmem:[%s4235_s3 + $0x48] ss:$12 sps:$4 sm:$0xff]   ;;  %v3851_v22 = vld [vmem:[%s4235_s3 + $0x30] ss:$12 sps:$4 sm:$0xff]   ;;  %v3854_v24 = vld [vmem:[%s4235_s3 + $0x38] ss:$12 sps:$4 sm:$0xff]  }
 0x165   : > { %v847_v50 = vld [vmem:[%s5260_s24] sm:$0xff]  ;;  %v849_v51 = vld [vmem:[%s5260_s24 + $0x10] sm:$0xff]  ;;  %v848_v52 = vld [vmem:[%s5260_s24 + $0x8] sm:$0xff]  ;;  %1100 = vmatpush1.bf16.msra.mxu0 %v3835_v10  ;;  %s5261_s21 = sld [smem:[#allocation7_spill]]  ;;  %vm1215_vm0 = vcmask 261120   ;;  %s4107_s30 = smov 64  }
 0x166   : > { %853 = vadd.xlane.f32.xlu0 %v847_v50  ;;  %857 = vadd.xlane.f32.xlu1 %v849_v51  ;;  %v850_v53 = vld [vmem:[%s5260_s24 + $0x18] sm:$0xff]  ;;  %v3848_v20 = vld [vmem:[%s4235_s3 + $0x34] ss:$12 sps:$4 sm:$0xff]   ;;  %v3856_v27 = vld [vmem:[%s4235_s3 + $0x4] ss:$12 sps:$4 sm:$0xff]   ;;  %s5264_s25 = sld [smem:[#allocation10_spill]] }
 0x167   : > { %1101 = vmatprep.subr.bf16.mxu0 %v3836_v11  ;;  %3668 = vmatpush3.bf16.msra.mxu1 %v3838_v12  ;;  %v3852_v23 = vld [vmem:[%s4235_s3 + $0x1c] ss:$12 sps:$4 sm:$0xff]   ;;  %v3855_v26 = vld [vmem:[%s4235_s3 + $0x18] ss:$12 sps:$4 sm:$0xff]   ;;  %v3858_v28 = vld [vmem:[%s4235_s3 + $0x20] ss:$12 sps:$4 sm:$0xff]  }
 0x168   : > { %3669 = vmatprep.subr.bf16.mxu1 %v3842_v15  ;;  %v3859_v29 = vld [vmem:[%s4235_s3] ss:$12 sps:$4 sm:$0xff]   ;;  %v3860_v30 = vld [vmem:[%s4235_s3 + $0x8] ss:$12 sps:$4 sm:$0xff]   ;;  %s5266_s4 = sld [smem:[#allocation4_spill]]  ;;  %vm2212_vm1 = vcmask 523264   ;;  %s5268_s3 = scalar_lea.vmem %s5227_s11, %s4212_s29 }
 0x169   : > { %1102 = vmatpush1.bf16.msra.mxu0 %v3839_v13  ;;  %vm2217_vm2 = vcmask 785408  }
 0x16a   : > { %855 = vadd.xlane.f32.xlu0 %v848_v52  ;;  %859 = vadd.xlane.f32.xlu1 %v850_v53 }
 0x16b   : > { %1103 = vmatprep.subr.bf16.mxu0 %v3840_v14  ;;  %3670 = vmatpush3.bf16.msra.mxu1 %v3842_v15  ;;  %s5262_s10 = scalar_lea.vmem %s5261_s21, %s4212_s29 }
 0x16c   : > { %3671 = vmatprep.subr.bf16.mxu1 %v3846_v18  ;;  %v3432_v45 = vld [vmem:[%s5262_s10] ss:$0 sm:$0xff]  ;;  %s5265_s19 = scalar_lea.vmem %s5264_s25, %s4212_s29 }
 0x16d   : > { %1104 = vmatpush1.bf16.msra.mxu0 %v3843_v16 }
 0x16e   : > { %1105 = vmatprep.subr.bf16.mxu0 %v3844_v17 }
 0x16f   : > { %3672 = vmatpush3.bf16.msra.mxu1 %v3846_v18 }
 0x170   : > { %3673 = vmatprep.subr.bf16.mxu1 %v3850_v21 }
 0x171   : > { %1106 = vmatpush1.bf16.msra.mxu0 %v3847_v19 }
 0x172   : > { %1107 = vmatprep.subr.bf16.mxu0 %v3848_v20 }
 0x173   : > { %3674 = vmatpush3.bf16.msra.mxu1 %v3850_v21 }
 0x174   : > { %3675 = vmatprep.subr.bf16.mxu1 %v3854_v24 }
 0x175   : > { %1108 = vmatpush1.bf16.msra.mxu0 %v3851_v22 }
 0x176   : > { %1109 = vmatprep.subr.bf16.mxu0 %v3852_v23 }
 0x177   : > { %3676 = vmatpush3.bf16.msra.mxu1 %v3854_v24 }
 0x178   : > { %3677 = vmatprep.subr.bf16.mxu1 %v3858_v28 }
 0x179   : > { %1110 = vmatpush1.bf16.msra.mxu0 %v3855_v26 }
 0x17a   : > { %1111 = vmatprep.subr.bf16.mxu0 %v3856_v27 }
 0x17b   : > { %3678 = vmatpush3.bf16.msra.mxu1 %v3858_v28 }
 0x17c   : > { %3679 = vmatprep.subr.bf16.mxu1 %v3860_v30 }
 0x17d   : > { %1112 = vmatpush1.bf16.msra.mxu0 %v3859_v29 }
 0x17f   : > { %3680 = vmatpush3.bf16.msra.mxu1 %v3860_v30 }
 0x1ef   : > { %v854_v56 = vpop.xlane.xlu0 %853  ;;  %v858_v57 = vpop.xlane.xlu1 %857 }
 0x1f0   : > { %v862_v58 = vmul.f32 0.0078125, %v854_v56  ;;  %v864_v59 = vmul.f32 0.0078125, %v858_v57 }
 0x1f2   : > { %v4325_v60 = vsub.f32 %v847_v50, %v862_v58  ;;  %v4327_v61 = vsub.f32 %v849_v51, %v864_v59  ;;  %v3433_v50 = vld [vmem:[%s5263_s2] ss:$0 sm:$0xff]  ;;  %s4106_s2 = smov 96  }
 0x1f3   : > { %v856_v62 = vpop.xlane.xlu0 %855  ;;  %v860_v63 = vpop.xlane.xlu1 %859 }
 0x1f4   : > { %v863_v0 = vmul.f32 0.0078125, %v856_v62  ;;  %v870_v1 = vmul.f32 %v4325_v60, %v4325_v60  ;;  %v865_v2 = vmul.f32 0.0078125, %v860_v63  ;;  %v872_v3 = vmul.f32 %v4327_v61, %v4327_v61 }
 0x1f6   : > { %874 = vadd.xlane.f32.xlu0 %v870_v1  ;;  %v4333_v4 = vsub.f32 %v848_v52, %v863_v0  ;;  %v4335_v5 = vsub.f32 %v850_v53, %v865_v2  ;;  %v952_v2 = vld [vmem:[%s4241_s20] sm:$0x7]  ;;  %s4108_s20 = smov 32  }
 0x1f8   : > { %v871_v6 = vmul.f32 %v4333_v4, %v4333_v4  ;;  %v873_v7 = vmul.f32 %v4335_v5, %v4335_v5 }
 0x1fa   : > { %878 = vadd.xlane.f32.xlu0 %v872_v3  ;;  %876 = vadd.xlane.f32.xlu1 %v871_v6  ;;  %v3460_v6 = vld [vmem:[%s5265_s19] ss:$0 sm:$0xff]  ;;  %s5267_s19 = scalar_lea.vmem %s5225_s9, %s4212_s29 }
 0x1fe   : > { %880 = vadd.xlane.f32.xlu1 %v873_v7 }
 0x27f   : > { %v875_v31 = vpop.xlane.xlu0 %874 }
 0x280   : > { %v882_v32 = vmul.f32 0.0078125, %v875_v31 }
 0x282   : > { %v886_v33 = vadd.f32 1e-06, %v882_v32 }
 0x283   : > { %v877_v34 = vpop.xlane.xlu1 %876  ;;  %v879_v35 = vpop.xlane.xlu0 %878 }
 0x284   : > { %3949 = vrsqrt.f32 %v886_v33  ;;  %v883_v36 = vmul.f32 0.0078125, %v877_v34  ;;  %v884_v37 = vmul.f32 0.0078125, %v879_v35 }
 0x286   : > { %v887_v38 = vadd.f32 1e-06, %v883_v36  ;;  %v888_v39 = vadd.f32 1e-06, %v884_v37 }
 0x287   : > { %v881_v40 = vpop.xlane.xlu1 %880 }
 0x288   : > { %3951 = vrsqrt.f32 %v887_v38  ;;  %v885_v41 = vmul.f32 0.0078125, %v881_v40 }
 0x289   : > { %3953 = vrsqrt.f32 %v888_v39 }
 0x28a   : > { %v889_v42 = vadd.f32 1e-06, %v885_v41 }
 0x28c   : > { %3955 = vrsqrt.f32 %v889_v42 }
 0x291   : > { %v3950_v43 = vpop.eup %3949 }
 0x292   : > { %v894_v44 = vmul.f32 %v3950_v43, %v4325_v60 }
 0x294   : > { %v904_v49 = vmul.f32 %v3432_v45, %v894_v44 }
 0x295   : > { %v3952_v46 = vpop.eup %3951 }
 0x296   : > { %v3954_v47 = vpop.eup %3953  ;;  %v895_v48 = vmul.f32 %v3952_v46, %v4333_v4  ;;  %v914_v54 = vadd.f32 %v3433_v50, %v904_v49 }
 0x297   : > { %v896_v51 = vmul.f32 %v3954_v47, %v4327_v61  ;;  %v954_v61 = vlaneseq }
 0x298   : > { %v905_v52 = vmul.f32 %v3432_v45, %v895_v48 }
 0x299   : > { %v3956_v53 = vpop.eup %3955  ;;  %v906_v57 = vmul.f32 %v3432_v45, %v896_v51  ;;  %v4379_v0 = vshrl.u32 %v954_v61, 7  ;;  %v4461_v61 = vld [vmem:[%s5266_s4 + $0x18] sm:$0xff] }
 0x29a   : > { %v915_v55 = vadd.f32 %v3433_v50, %v905_v52  ;;  %v897_v56 = vmul.f32 %v3956_v53, %v4335_v5 }
 0x29b   : > { %v916_v60 = vadd.f32 %v3433_v50, %v906_v57  ;;  %v956_v1 = vsub.s32 0, %v4379_v0  ;;  %v964_v8 = vsub.s32 2, %v4379_v0  ;;  %v960_v19 = vsub.s32 1, %v4379_v0 }
 0x29c   : > { %v918_v58 = vpack.c.bf16 %v915_v55, %v914_v54  ;;  %v907_v59 = vmul.f32 %v3432_v45, %v897_v56  ;;  %v4443_v55 = vld [vmem:[%s5266_s4] sm:$0xff]  ;;  %v4448_v56 = vld [vmem:[%s5266_s4 + $0x10] sm:$0xff] }
 0x29d   : > { %v957_v3 = vrot.slane %v952_v2, %v956_v1  ;;  %v965_v14 = vrot.slane %v952_v2, %v964_v8  ;;  %v961_v34 = vrot.slane %v952_v2, %v960_v19 }
 0x29e   : > { %1130 = vmatmul.mubr.bf16.vlgmr.msra.gmra.mxu0 %v918_v58  ;;  %3681 = vmatprep.mubr.bf16.mxu1 %v918_v58  ;;  %v917_v62 = vadd.f32 %v3433_v50, %v907_v59 }
 0x29f   : > { %1139 = vmatprep.mubr.bf16.mxu0 %v4105_v25 }
 0x2a0   : > { %v919_v63 = vpack.c.bf16 %v917_v62, %v916_v60  ;;  %v4454_v60 = vld [vmem:[%s5266_s4 + $0x8] sm:$0xff] }
 0x2a2   : > { %3682 = vmatmul.mubr.bf16.vlgmr.msra.gmra.mxu1 %v919_v63 }
 0x2a6   : > { %1140 = vmatmul.mubr.bf16.gmra.mxu0 %v919_v63 }
 0x35e   : > { %v1131_v4 = vpop.f32.mrf.mxu0 }
 0x35f   : > { %v1132_v5 = vadd.f32 %v1131_v4, %v957_v3 }
 0x360   : > { %v1133_v7 = vpop.f32.mrf.mxu0 }
 0x361   : > { %v1199_v9 = vmul.f32 0.17677669, %v1132_v5  ;;  %v1134_v46 = vadd.f32 %v1133_v7, %v961_v34 }
 0x362   : > { %v1135_v10 = vpop.f32.mrf.mxu0  ;;  %v3683_v11 = vpop.f32.mrf.mxu1 }
 0x363   : > { %v4391_v12 = vmul.f32 %v3460_v6, %v1199_v9  ;;  %v1136_v13 = vadd.f32 %v1135_v10, %v957_v3  ;;  %v1193_v26 = vadd.f32 %v3683_v11, %v965_v14 }
 0x364   : > { %v1137_v15 = vpop.f32.mrf.mxu0  ;;  %v1184_v16 = vpop.f32.mrf.mxu1 }
 0x365   : > { %v1200_v17 = vmul.f32 0.17677669, %v1136_v13  ;;  %v1287_v18 = vsel %vm1215_vm0, %v4391_v12, 0.0  ;;  %v1185_v30 = vadd.f32 %v1184_v16, %v965_v14  ;;  %v1138_v40 = vadd.f32 %v1137_v15, %v961_v34 }
 0x366   : > { %1288 = vadd.xlane.f32.xlu0 %v1287_v18  ;;  %v1141_v20 = vpop.f32.mrf.mxu0  ;;  %v3684_v21 = vpop.f32.mrf.mxu1 }
 0x367   : > { %v4398_v22 = vpack.c.bf16 %v1200_v17, %v1199_v9  ;;  %v4400_v23 = vmul.f32 %v3460_v6, %v1200_v17  ;;  %v1142_v24 = vadd.f32 %v1141_v20, %v957_v3  ;;  %v1196_v27 = vadd.f32 %v3684_v21, %v965_v14 }
 0x368   : > { %v1143_v28 = vpop.f32.mrf.mxu0  ;;  %v1187_v29 = vpop.f32.mrf.mxu1  ;;  %v4423_v49 = vpack.c.bf16 %v1138_v40, %v1134_v46 }
 0x369   : > { %v1201_v31 = vmul.f32 0.17677669, %v1142_v24  ;;  %v1188_v32 = vadd.f32 %v1187_v29, %v965_v14  ;;  %3689 = vmatprep.mubr.msk.bf16.mxu0 %vm1215_vm0, %v4398_v22  ;;  %v1290_v33 = vsel %vm1215_vm0, %v4400_v23, 0.0  ;;  %v4408_v35 = vpack.c.bf16 %v1196_v27, %v1193_v26 }
 0x36a   : > { %1291 = vadd.xlane.f32.xlu1 %v1290_v33  ;;  %v1145_v36 = vpop.f32.mrf.mxu0  ;;  %v1144_v42 = vadd.f32 %v1143_v28, %v961_v34  ;;  %v1223_v52 = vsel %vm1215_vm0, %v4423_v49, 0 }
 0x36b   : > { %v4410_v37 = vmul.f32 %v3460_v6, %v1201_v31  ;;  %v4412_v38 = vpack.c.bf16 %v1188_v32, %v1185_v30  ;;  %v1146_v39 = vadd.f32 %v1145_v36, %v957_v3  ;;  %3693 = vmatprep.subr.bf16.mxu1 %v4408_v35 }
 0x36c   : > { %v1147_v41 = vpop.f32.mrf.mxu0  ;;  %3694 = vmatpush3.bf16.msra.mxu1 %v4408_v35 }
 0x36d   : > { %v1202_v43 = vmul.f32 0.17677669, %v1146_v39  ;;  %v1148_v44 = vadd.f32 %v1147_v41, %v961_v34  ;;  %v1293_v45 = vsel %vm1215_vm0, %v4410_v37, 0.0  ;;  %3695 = vmatprep.subr.bf16.mxu1 %v4412_v38 }
 0x36e   : > { %1294 = vadd.xlane.f32.xlu0 %v1293_v45 }
 0x36f   : > { %v4419_v47 = vmul.f32 %v3460_v6, %v1202_v43  ;;  %v4421_v48 = vpack.c.bf16 %v1148_v44, %v1144_v42  ;;  %v4436_v53 = vpack.c.bf16 %v1202_v43, %v1201_v31 }
 0x370   : > { %3696 = vmatpush3.bf16.msra.mxu1 %v4412_v38 }
 0x371   : > { %3769 = vmatprep.subr.msk.bf16.mxu0 %vm1215_vm0, %v4421_v48  ;;  %v1296_v50 = vsel %vm1215_vm0, %v4419_v47, 0.0  ;;  %v1226_v51 = vsel %vm1215_vm0, %v4421_v48, 0 }
 0x372   : > { %1297 = vadd.xlane.f32.xlu1 %v1296_v50  ;;  %3686 = vmatpush3.bf16.xpose.msra.mxu0 %v1226_v51 }
 0x373   : > { %3770 = vmatprep.subr.msk.bf16.mxu0 %vm1215_vm0, %v4423_v49 }
 0x37a   : > { %3688 = vmatpush3.bf16.xpose.msra.mxu0 %v1223_v52 }
 0x381   : > { %3690 = vmatmul.mubr.msk.bf16.vlgmr.msra.gmra.mxu0 %vm1215_vm0, %v4436_v53 }
 0x3ef   : > { %v4492_v9 = vpop.xlane.xlu0 %1288 }
 0x3f3   : > { %v4494_v10 = vpop.xlane.xlu1 %1291 }
 0x3f7   : > { %v4496_v11 = vpop.xlane.xlu0 %1294 }
 0x3fb   : > { %v4498_v13 = vpop.xlane.xlu1 %1297 }
 0x441   : > { %v3691_v54 = vpop.f32.mrf.mxu0 }
 0x442   : > { %v1271_v62 = vadd.f32 %v3691_v54, %v4448_v56 }
 0x443   : > { %v1262_v57 = vpop.f32.mrf.mxu0 }
 0x444   : > { %v1263_v58 = vadd.f32 %v1262_v57, %v4443_v55  ;;  %v1305_v6 = vsel %vm1215_vm0, %v1271_v62, -inf }
 0x445   : > { %v3692_v59 = vpop.f32.mrf.mxu0 }
 0x446   : > { %v1299_v63 = vsel %vm1215_vm0, %v1263_v58, -inf  ;;  %v1274_v4 = vadd.f32 %v3692_v59, %v4461_v61 }
 0x447   : > { %v1265_v2 = vpop.f32.mrf.mxu0  ;;  %1300 = vmax.xlane.f32.xlu0 %v1299_v63 }
 0x448   : > { %v1266_v3 = vadd.f32 %v1265_v2, %v4454_v60  ;;  %v1308_v7 = vsel %vm1215_vm0, %v1274_v4, -inf }
 0x44a   : > { %v1302_v5 = vsel %vm1215_vm0, %v1266_v3, -inf }
 0x44b   : > { %1303 = vmax.xlane.f32.xlu1 %v1302_v5  ;;  %1306 = vmax.xlane.f32.xlu0 %v1305_v6 }
 0x44f   : > { %1309 = vmax.xlane.f32.xlu1 %v1308_v7 }
 0x460   : > { %1438 = vrot.lane.b32.xlu1 %v4423_v49, %s4106_s2 }
 0x461   : > { %1440 = vrot.lane.b32.xlu0 %v4421_v48, %s4106_s2 }
 0x464   : > { %1432 = vrot.lane.b32.xlu1 %v4398_v22, %s4106_s2 }
 0x465   : > { %1434 = vrot.lane.b32.xlu0 %v4436_v53, %s4106_s2 }
 0x468   : > { %1686 = vrot.lane.b32.xlu1 %v4421_v48, %s4107_s30 }
 0x469   : > { %1680 = vrot.lane.b32.xlu0 %v4398_v22, %s4107_s30 }
 0x46c   : > { %1684 = vrot.lane.b32.xlu1 %v4423_v49, %s4107_s30 }
 0x46d   : > { %1749 = vrot.lane.b32.xlu0 %v4391_v12, %s4107_s30 }
 0x470   : > { %1682 = vrot.lane.b32.xlu1 %v4436_v53, %s4107_s30 }
 0x471   : > { %1753 = vrot.lane.b32.xlu0 %v4410_v37, %s4107_s30 }
 0x474   : > { %1751 = vrot.lane.b32.xlu1 %v4400_v23, %s4107_s30 }
 0x478   : > { %1755 = vrot.lane.b32.xlu1 %v4419_v47, %s4107_s30 }
 0x4d0   : > { %v1301_v14 = vpop.xlane.xlu0 %1300 }
 0x4d1   : > { %v4501_v15 = vmax.f32 %v1301_v14, %v4492_v9 }
 0x4d3   : > { %v1315_v16 = vsub.f32 %v1263_v58, %v4501_v15 }
 0x4d4   : > { %v1304_v17 = vpop.xlane.xlu1 %1303  ;;  %v1307_v18 = vpop.xlane.xlu0 %1306 }
 0x4d5   : > { %v4505_v20 = vmax.f32 %v1304_v17, %v4494_v10  ;;  %v1313_v21 = vmax.f32 %v1307_v18, %v4496_v11  ;;  %v1319_v24 = vmul.f32 1.442695, %v1315_v16  ;;  %v1327_v17 = vsub.f32 %v4492_v9, %v4501_v15  ;;  %v4555_v9 = vld [vmem:[%s5267_s19] ss:$0 sm:$0xff]  ;;  %s5269_s19 = scalar_lea.vmem %s5228_s12, %s4212_s29 }
 0x4d7   : > { %v1316_v26 = vsub.f32 %v1266_v3, %v4505_v20  ;;  %v1317_v27 = vsub.f32 %v1271_v62, %v1313_v21  ;;  %3957 = vpow2.f32 %v1319_v24  ;;  %v1329_v16 = vsub.f32 %v4496_v11, %v1313_v21 }
 0x4d8   : > { %v1310_v28 = vpop.xlane.xlu1 %1309  ;;  %v1441_v29 = vpop.permute.xlu0 %1440 }
 0x4d9   : > { %v1321_v30 = vmul.f32 1.442695, %v1316_v26  ;;  %v1314_v31 = vmax.f32 %v1310_v28, %v4498_v13  ;;  %3771 = vmatprep.subr.msk.bf16.mxu1 %vm1215_vm0, %v1441_v29  ;;  %v1323_v32 = vmul.f32 1.442695, %v1317_v27  ;;  %v1452_v63 = vsel %vm1215_vm0, %v1441_v29, 0 }
 0x4da   : > { %v1335_v18 = vmul.f32 1.442695, %v1329_v16  ;;  %v1331_v26 = vmul.f32 1.442695, %v1327_v17  ;;  %v1328_v27 = vsub.f32 %v4494_v10, %v4505_v20 }
 0x4db   : > { %3959 = vpow2.f32 %v1321_v30  ;;  %v1318_v33 = vsub.f32 %v1274_v4, %v1314_v31  ;;  %v1330_v24 = vsub.f32 %v4498_v13, %v1314_v31 }
 0x4dc   : > { %v1439_v34 = vpop.permute.xlu1 %1438  ;;  %v1435_v36 = vpop.permute.xlu0 %1434  ;;  %3961 = vpow2.f32 %v1323_v32  ;;  %v1333_v29 = vmul.f32 1.442695, %v1328_v27 }
 0x4dd   : > { %v1325_v39 = vmul.f32 1.442695, %v1318_v33  ;;  %v1449_v6 = vsel %vm1215_vm0, %v1439_v34, 0  ;;  %v1337_v28 = vmul.f32 1.442695, %v1330_v24 }
 0x4df   : > { %3963 = vpow2.f32 %v1325_v39 }
 0x4e0   : > { %v1433_v40 = vpop.permute.xlu1 %1432  ;;  %v1681_v41 = vpop.permute.xlu0 %1680  ;;  %3965 = vpow2.f32 %v1335_v18 }
 0x4e1   : > { %3967 = vpow2.f32 %v1331_v26 }
 0x4e2   : > { %3969 = vpow2.f32 %v1337_v28 }
 0x4e3   : > { %3971 = vpow2.f32 %v1333_v29 }
 0x4e4   : > { %v1687_v42 = vpop.permute.xlu1 %1686  ;;  %v1750_v43 = vpop.permute.xlu0 %1749 }
 0x4e5   : > { %v1761_v44 = vsel %vm1215_vm0, %v1750_v43, 0.0  ;;  %v4512_v45 = vpop.eup %3957  ;;  %v1698_v7 = vsel %vm1215_vm0, %v1687_v42, 0 }
 0x4e6   : > { %1762 = vadd.xlane.f32.xlu0 %v1761_v44 }
 0x4e8   : > { %v4514_v46 = vpop.eup %3959  ;;  %v1685_v50 = vpop.permute.xlu1 %1684 }
 0x4e9   : > { %v1754_v51 = vpop.permute.xlu0 %1753  ;;  %v1359_v54 = vpack.c.bf16 %v4514_v46, %v4512_v45  ;;  %v4519_v57 = vpop.eup %3961  ;;  %v1695_v14 = vsel %vm1215_vm0, %v1685_v50, 0 }
 0x4ea   : > { %v1767_v52 = vsel %vm1215_vm0, %v1754_v51, 0.0 }
 0x4eb   : > { %1768 = vadd.xlane.f32.xlu0 %v1767_v52  ;;  %3697 = vmatprep.mubr.msk.bf16.mxu1 %vm1215_vm0, %v1359_v54 }
 0x4ec   : > { %v4522_v58 = vpop.eup %3963  ;;  %v1683_v59 = vpop.permute.xlu1 %1682 }
 0x4ed   : > { %v1360_v62 = vpack.c.bf16 %v4522_v58, %v4519_v57  ;;  %v4546_v30 = vpop.eup %3965 }
 0x4ee   : > { %v4548_v32 = vpop.eup %3967  ;;  %v1369_v11 = vmul.f32 %v4546_v30, %v4555_v9 }
 0x4ef   : > { %3698 = vmatmul.mubr.msk.bf16.vlgmr.msra.gmra.mxu1 %vm1215_vm0, %v1360_v62  ;;  %v4559_v10 = vpop.eup %3969  ;;  %v1367_v20 = vmul.f32 %v4548_v32, %v4555_v9 }
 0x4f0   : > { %3702 = vmatpush3.bf16.xpose.msra.mxu1 %v1452_v63  ;;  %v1752_v2 = vpop.permute.xlu1 %1751  ;;  %3705 = vmatprep.mubr.msk.bf16.mxu1 %vm1215_vm0, %v1433_v40  ;;  %v4565_v21 = vpop.eup %3971 }
 0x4f1   : > { %3772 = vmatprep.subr.msk.bf16.mxu1 %vm1215_vm0, %v1439_v34  ;;  %v1764_v3 = vsel %vm1215_vm0, %v1752_v2, 0.0  ;;  %v1370_v34 = vmul.f32 %v4559_v10, %v4555_v9  ;;  %v1368_v40 = vmul.f32 %v4565_v21, %v4555_v9 }
 0x4f2   : > { %1765 = vadd.xlane.f32.xlu1 %v1764_v3 }
 0x4f4   : > { %v1756_v4 = vpop.permute.xlu1 %1755 }
 0x4f5   : > { %v1770_v5 = vsel %vm1215_vm0, %v1756_v4, 0.0 }
 0x4f6   : > { %1771 = vadd.xlane.f32.xlu1 %v1770_v5 }
 0x4f8   : > { %3704 = vmatpush3.bf16.xpose.msra.mxu1 %v1449_v6 }
 0x4f9   : > { %3773 = vmatprep.subr.msk.bf16.mxu1 %vm1215_vm0, %v1687_v42 }
 0x4ff   : > { %3706 = vmatmul.mubr.msk.bf16.vlgmr.msra.gmra.mxu1 %vm1215_vm0, %v1435_v36 }
 0x500   : > { %3718 = vmatpush3.bf16.xpose.msra.mxu1 %v1698_v7  ;;  %3721 = vmatprep.mubr.msk.bf16.mxu1 %vm1215_vm0, %v1681_v41 }
 0x501   : > { %3774 = vmatprep.subr.msk.bf16.mxu1 %vm1215_vm0, %v1685_v50 }
 0x508   : > { %3720 = vmatpush3.bf16.xpose.msra.mxu1 %v1695_v14 }
 0x50f   : > { %3722 = vmatmul.mubr.msk.bf16.vlgmr.msra.gmra.mxu1 %vm1215_vm0, %v1683_v59 }
 0x5af   : > { %v3699_v13 = vpop.f32.mrf.mxu1 }
 0x5b0   : > { %v4561_v15 = vadd.f32 %v3699_v13, %v1369_v11 }
 0x5b1   : > { %v1411_v31 = vpop.f32.mrf.mxu1 }
 0x5b2   : > { %v4567_v33 = vadd.f32 %v1411_v31, %v1367_v20 }
 0x5b3   : > { %v3700_v36 = vpop.f32.mrf.mxu1 }
 0x5b4   : > { %v4571_v39 = vadd.f32 %v3700_v36, %v1370_v34 }
 0x5b5   : > { %v1414_v41 = vpop.f32.mrf.mxu1 }
 0x5b6   : > { %v4575_v42 = vadd.f32 %v1414_v41, %v1368_v40 }
 0x5bf   : > { %v4577_v43 = vpop.f32.mrf.mxu1 }
 0x5c1   : > { %v4579_v44 = vpop.f32.mrf.mxu1 }
 0x5c3   : > { %v4581_v50 = vpop.f32.mrf.mxu1 }
 0x5c5   : > { %v4583_v51 = vpop.f32.mrf.mxu1 }
 0x5cf   : > { %v3723_v52 = vpop.f32.mrf.mxu1 }
 0x5d0   : > { %v1743_v54 = vadd.f32 %v3723_v52, %v4448_v56 }
 0x5d1   : > { %v1734_v59 = vpop.f32.mrf.mxu1 }
 0x5d2   : > { %v1735_v62 = vadd.f32 %v1734_v59, %v4443_v55  ;;  %v1779_v63 = vsel %vm1215_vm0, %v1743_v54, -inf }
 0x5d3   : > { %v3724_v2 = vpop.f32.mrf.mxu1  ;;  %1780 = vmax.xlane.f32.xlu0 %v1779_v63 }
 0x5d4   : > { %v1746_v3 = vadd.f32 %v3724_v2, %v4461_v61  ;;  %v1773_v7 = vsel %vm1215_vm0, %v1735_v62, -inf  ;;  %v1489_v2 = vadd.f32 %v4579_v44, %v4443_v55 }
 0x5d5   : > { %v1737_v4 = vpop.f32.mrf.mxu1 }
 0x5d6   : > { %v1738_v5 = vadd.f32 %v1737_v4, %v4454_v60  ;;  %v1782_v6 = vsel %vm1215_vm0, %v1746_v3, -inf }
 0x5d7   : > { %1783 = vmax.xlane.f32.xlu1 %v1782_v6  ;;  %1774 = vmax.xlane.f32.xlu0 %v1773_v7  ;;  %v1531_v7 = vsel %vm1215_vm0, %v1489_v2, -inf }
 0x5d8   : > { %v1776_v14 = vsel %vm1215_vm0, %v1738_v5, -inf }
 0x5db   : > { %1777 = vmax.xlane.f32.xlu0 %v1776_v14 }
 0x5e8   : > { %1839 = vrot.lane.b32.xlu1 %v4412_v38, %s4107_s30 }
 0x5ec   : > { %1926 = vrot.lane.b32.xlu1 %v4421_v48, %s4108_s20  ;;  %v4623_v48 = vpop.xlane.xlu1 %1765 }
 0x5f0   : > { %1924 = vrot.lane.b32.xlu1 %v4423_v49, %s4108_s20 }
 0x5f1   : > { %1841 = vrot.lane.b32.xlu0 %v4408_v35, %s4107_s30 }
 0x5f4   : > { %1922 = vrot.lane.b32.xlu1 %v4436_v53, %s4108_s20  ;;  %v4627_v53 = vpop.xlane.xlu1 %1771 }
 0x5f5   : > { %1920 = vrot.lane.b32.xlu0 %v4398_v22, %s4108_s20  ;;  %v4621_v22 = vpop.xlane.xlu0 %1762 }
 0x5f8   : > { %1509 = vrot.lane.b32.xlu1 %v4400_v23, %s4106_s2 }
 0x5f9   : > { %1507 = vrot.lane.b32.xlu0 %v4391_v12, %s4106_s2  ;;  %v4625_v49 = vpop.xlane.xlu0 %1768 }
 0x5fc   : > { %1513 = vrot.lane.b32.xlu1 %v4419_v47, %s4106_s2 }
 0x5fd   : > { %1511 = vrot.lane.b32.xlu0 %v4410_v37, %s4106_s2 }
 0x600   : > { %1991 = vrot.lane.b32.xlu1 %v4400_v23, %s4108_s20 }
 0x601   : > { %1989 = vrot.lane.b32.xlu0 %v4391_v12, %s4108_s20 }
 0x604   : > { %1995 = vrot.lane.b32.xlu1 %v4419_v47, %s4108_s20 }
 0x605   : > { %1993 = vrot.lane.b32.xlu0 %v4410_v37, %s4108_s20 }
 0x65c   : > { %v1781_v16 = vpop.xlane.xlu0 %1780 }
 0x65d   : > { %v4630_v23 = vmax.f32 %v1781_v16, %v4625_v49 }
 0x65f   : > { %v1803_v12 = vsub.f32 %v4625_v49, %v4630_v23  ;;  %v1791_v28 = vsub.f32 %v1743_v54, %v4630_v23 }
 0x660   : > { %v1784_v17 = vpop.xlane.xlu1 %1783  ;;  %v1775_v47 = vpop.xlane.xlu0 %1774 }
 0x661   : > { %v4635_v18 = vmax.f32 %v1784_v17, %v4627_v53  ;;  %v4638_v37 = vmax.f32 %v1775_v47, %v4621_v22  ;;  %v1797_v36 = vmul.f32 1.442695, %v1791_v28 }
 0x663   : > { %v1792_v24 = vsub.f32 %v1746_v3, %v4635_v18  ;;  %v1804_v26 = vsub.f32 %v4627_v53, %v4635_v18  ;;  %v1789_v27 = vsub.f32 %v1735_v62, %v4638_v37 }
 0x664   : > { %v1840_v29 = vpop.permute.xlu1 %1839  ;;  %v1778_v11 = vpop.xlane.xlu0 %1777 }
 0x665   : > { %v1799_v13 = vmul.f32 1.442695, %v1792_v24  ;;  %v4646_v20 = vmax.f32 %v1778_v11, %v4623_v48  ;;  %v1793_v31 = vmul.f32 1.442695, %v1789_v27  ;;  %v1500_v24 = vadd.f32 %v4581_v50, %v4461_v61 }
 0x667   : > { %v1790_v34 = vsub.f32 %v1738_v5, %v4646_v20  ;;  %3973 = vpow2.f32 %v1799_v13  ;;  %v1492_v5 = vadd.f32 %v4583_v51, %v4454_v60  ;;  %v1540_v50 = vsel %vm1215_vm0, %v1500_v24, -inf }
 0x668   : > { %v1927_v40 = vpop.permute.xlu1 %1926  ;;  %v1842_v41 = vpop.permute.xlu0 %1841  ;;  %3975 = vpow2.f32 %v1793_v31 }
 0x669   : > { %v1795_v52 = vmul.f32 1.442695, %v1790_v34  ;;  %3725 = vmatprep.subr.bf16.mxu1 %v1842_v41  ;;  %v1534_v27 = vsel %vm1215_vm0, %v1492_v5, -inf  ;;  %v1938_v13 = vsel %vm1215_vm0, %v1927_v40, 0  ;;  %v1497_v34 = vadd.f32 %v4577_v43, %v4448_v56 }
 0x66a   : > { %3726 = vmatpush3.bf16.msra.mxu1 %v1842_v41 }
 0x66b   : > { %3977 = vpow2.f32 %v1795_v52  ;;  %3727 = vmatprep.subr.bf16.mxu1 %v1840_v29 }
 0x66c   : > { %3979 = vpow2.f32 %v1797_v36  ;;  %v1925_v54 = vpop.permute.xlu1 %1924  ;;  %v1921_v59 = vpop.permute.xlu0 %1920 }
 0x66e   : > { %3728 = vmatpush3.bf16.msra.mxu1 %v1840_v29 }
 0x66f   : > { %3775 = vmatprep.subr.msk.bf16.mxu1 %vm1215_vm0, %v1927_v40 }
 0x670   : > { %v1923_v62 = vpop.permute.xlu1 %1922  ;;  %v1508_v63 = vpop.permute.xlu0 %1507 }
 0x671   : > { %v1519_v3 = vsel %vm1215_vm0, %v1508_v63, 0.0  ;;  %v1537_v63 = vsel %vm1215_vm0, %v1497_v34, -inf }
 0x672   : > { %1520 = vadd.xlane.f32.xlu0 %v1519_v3 }
 0x674   : > { %v1510_v4 = vpop.permute.xlu1 %1509  ;;  %v4657_v14 = vpop.eup %3973 }
 0x675   : > { %v1522_v6 = vsel %vm1215_vm0, %v1510_v4, 0.0  ;;  %v4659_v16 = vpop.eup %3975  ;;  %v1512_v11 = vpop.permute.xlu0 %1511 }
 0x676   : > { %1523 = vadd.xlane.f32.xlu1 %v1522_v6  ;;  %1532 = vmax.xlane.f32.xlu0 %v1531_v7  ;;  %v1525_v36 = vsel %vm1215_vm0, %v1512_v11, 0.0 }
 0x678   : > { %v4661_v17 = vpop.eup %3977  ;;  %v1514_v44 = vpop.permute.xlu1 %1513 }
 0x679   : > { %v4663_v47 = vpop.eup %3979  ;;  %v1528_v51 = vsel %vm1215_vm0, %v1514_v44, 0.0  ;;  %v1833_v28 = vpack.c.bf16 %v4661_v17, %v4659_v16  ;;  %v1990_v41 = vpop.permute.xlu0 %1989 }
 0x67a   : > { %1529 = vadd.xlane.f32.xlu1 %v1528_v51  ;;  %1535 = vmax.xlane.f32.xlu0 %v1534_v27  ;;  %v1834_v29 = vpack.c.bf16 %v4657_v14, %v4663_v47  ;;  %v2001_v43 = vsel %vm1215_vm0, %v1990_v41, 0.0 }
 0x67b   : > { %3729 = vmatprep.mubr.msk.bf16.mxu1 %vm1215_vm0, %v1833_v28 }
 0x67c   : > { %v1992_v31 = vpop.permute.xlu1 %1991  ;;  %3730 = vmatmul.mubr.msk.bf16.vlgmr.msra.gmra.mxu1 %vm1215_vm0, %v1834_v29 }
 0x67d   : > { %3734 = vmatpush3.bf16.xpose.msra.mxu1 %v1938_v13  ;;  %3737 = vmatprep.mubr.msk.bf16.mxu1 %vm1215_vm0, %v1921_v59  ;;  %v2004_v40 = vsel %vm1215_vm0, %v1992_v31, 0.0  ;;  %v1935_v59 = vsel %vm1215_vm0, %v1925_v54, 0  ;;  %v1994_v4 = vpop.permute.xlu0 %1993 }
 0x67e   : > { %3776 = vmatprep.subr.msk.bf16.mxu1 %vm1215_vm0, %v1925_v54  ;;  %1541 = vmax.xlane.f32.xlu1 %v1540_v50  ;;  %v2007_v6 = vsel %vm1215_vm0, %v1994_v4, 0.0 }
 0x67f   : > { %1526 = vadd.xlane.f32.xlu0 %v1525_v36 }
 0x680   : > { %v1996_v52 = vpop.permute.xlu1 %1995 }
 0x681   : > { %v2010_v3 = vsel %vm1215_vm0, %v1996_v52, 0.0 }
 0x682   : > { %2005 = vadd.xlane.f32.xlu1 %v2004_v40 }
 0x683   : > { %1538 = vmax.xlane.f32.xlu0 %v1537_v63 }
 0x685   : > { %3736 = vmatpush3.bf16.xpose.msra.mxu1 %v1935_v59 }
 0x686   : > { %2011 = vadd.xlane.f32.xlu1 %v2010_v3 }
 0x687   : > { %2002 = vadd.xlane.f32.xlu0 %v2001_v43 }
 0x68b   : > { %2008 = vadd.xlane.f32.xlu0 %v2007_v6 }
 0x68c   : > { %3738 = vmatmul.mubr.msk.bf16.vlgmr.msra.gmra.mxu1 %vm1215_vm0, %v1923_v62 }
 0x68d   : > { %2662 = vmatprep.mubr.bf16.mxu1 %v4105_v25 }
 0x697   : > { %1599 = vrot.lane.b32.xlu1 %v4412_v38, %s4106_s2 }
 0x69b   : > { %2081 = vrot.lane.b32.xlu1 %v4408_v35, %s4108_s20 }
 0x6fb   : > { %v4694_v54 = vpop.xlane.xlu0 %1520 }
 0x6ff   : > { %v1524_v7 = vpop.xlane.xlu1 %1523  ;;  %v1533_v44 = vpop.xlane.xlu0 %1532 }
 0x700   : > { %v4697_v51 = vmax.f32 %v1533_v44, %v4694_v54 }
 0x702   : > { %v1547_v27 = vsub.f32 %v1489_v2, %v4697_v51  ;;  %v1559_v62 = vsub.f32 %v4694_v54, %v4697_v51 }
 0x703   : > { %v4702_v28 = vpop.xlane.xlu1 %1529  ;;  %v1536_v29 = vpop.xlane.xlu0 %1535 }
 0x704   : > { %v1544_v11 = vmax.f32 %v1536_v29, %v1524_v7  ;;  %v1551_v13 = vmul.f32 1.442695, %v1547_v27 }
 0x706   : > { %v1548_v31 = vsub.f32 %v1492_v5, %v1544_v11  ;;  %v1560_v50 = vsub.f32 %v1524_v7, %v1544_v11  ;;  %3981 = vpow2.f32 %v1551_v13 }
 0x707   : > { %v1542_v36 = vpop.xlane.xlu1 %1541 }
 0x708   : > { %v1553_v41 = vmul.f32 1.442695, %v1548_v31  ;;  %v1546_v40 = vmax.f32 %v1542_v36, %v4702_v28  ;;  %v1527_v52 = vpop.xlane.xlu0 %1526 }
 0x70a   : > { %3983 = vpow2.f32 %v1553_v41  ;;  %v1550_v63 = vsub.f32 %v1500_v24, %v1546_v40 }
 0x70c   : > { %v1539_v59 = vpop.xlane.xlu0 %1538  ;;  %v1557_v3 = vmul.f32 1.442695, %v1550_v63 }
 0x70d   : > { %v1545_v2 = vmax.f32 %v1539_v59, %v1527_v52 }
 0x70e   : > { %3985 = vpow2.f32 %v1557_v3 }
 0x70f   : > { %v1549_v43 = vsub.f32 %v1497_v34, %v1545_v2 }
 0x711   : > { %v1555_v4 = vmul.f32 1.442695, %v1549_v43 }
 0x713   : > { %3987 = vpow2.f32 %v1555_v4  ;;  %v3982_v6 = vpop.eup %3981 }
 0x717   : > { %v3984_v44 = vpop.eup %3983 }
 0x718   : > { %v1591_v27 = vpack.c.bf16 %v3984_v44, %v3982_v6 }
 0x71a   : > { %3713 = vmatprep.mubr.msk.bf16.mxu0 %vm1215_vm0, %v1591_v27 }
 0x71b   : > { %v4706_v5 = vpop.eup %3985 }
 0x720   : > { %v4708_v7 = vpop.eup %3987 }
 0x721   : > { %v1592_v29 = vpack.c.bf16 %v4706_v5, %v4708_v7 }
 0x73c   : > { %v4712_v24 = vpop.f32.mrf.mxu1 }
 0x73e   : > { %v4714_v11 = vpop.f32.mrf.mxu1 }
 0x740   : > { %v4716_v34 = vpop.f32.mrf.mxu1 }
 0x742   : > { %v4718_v13 = vpop.f32.mrf.mxu1 }
 0x74c   : > { %v3739_v31 = vpop.f32.mrf.mxu1 }
 0x74d   : > { %v4721_v36 = vadd.f32 %v3739_v31, %v4448_v56 }
 0x74e   : > { %v1974_v41 = vpop.f32.mrf.mxu1 }
 0x74f   : > { %v4724_v63 = vadd.f32 %v1974_v41, %v4443_v55  ;;  %v2019_v59 = vsel %vm1215_vm0, %v4721_v36, -inf  ;;  %v1577_v41 = vsel %vm1215_vm0, %v4708_v7, 0.0 }
 0x750   : > { %v3740_v3 = vpop.f32.mrf.mxu1  ;;  %2020 = vmax.xlane.f32.xlu0 %v2019_v59  ;;  %v1565_v59 = vmul.f32 1.442695, %v1560_v50 }
 0x751   : > { %v4729_v43 = vadd.f32 %v3740_v3, %v4461_v61  ;;  %v2013_v31 = vsel %vm1215_vm0, %v4724_v63, -inf  ;;  %v1574_v61 = vsel %vm1215_vm0, %v3984_v44, 0.0  ;;  %v1561_v3 = vsub.f32 %v1527_v52, %v1545_v2 }
 0x752   : > { %v1977_v4 = vpop.f32.mrf.mxu1  ;;  %3989 = vpow2.f32 %v1565_v59  ;;  %v1819_v52 = vsel %vm1215_vm0, %v4663_v47, 0.0  ;;  %v4814_v59 = vpop.xlane.xlu0 %2002 }
 0x753   : > { %v4732_v27 = vadd.f32 %v1977_v4, %v4454_v60  ;;  %v2022_v56 = vsel %vm1215_vm0, %v4729_v43, -inf  ;;  %v1571_v60 = vsel %vm1215_vm0, %v3982_v6, 0.0  ;;  %v1816_v4 = vsel %vm1215_vm0, %v4661_v17, 0.0 }
 0x754   : > { %2023 = vmax.xlane.f32.xlu1 %v2022_v56  ;;  %2014 = vmax.xlane.f32.xlu0 %v2013_v31  ;;  %v1562_v6 = vsub.f32 %v4702_v28, %v1546_v40  ;;  %v1567_v44 = vmul.f32 1.442695, %v1561_v3  ;;  %v1813_v56 = vsel %vm1215_vm0, %v4659_v16, 0.0  ;;  %v1802_v17 = vsub.f32 %v4623_v48, %v4646_v20 }
 0x755   : > { %v2016_v55 = vsel %vm1215_vm0, %v4732_v27, -inf  ;;  %v1563_v28 = vmul.f32 1.442695, %v1559_v62  ;;  %v1811_v48 = vmul.f32 1.442695, %v1804_v26 }
 0x756   : > { %v1569_v50 = vmul.f32 1.442695, %v1562_v6  ;;  %3991 = vpow2.f32 %v1567_v44  ;;  %v1807_v40 = vmul.f32 1.442695, %v1802_v17 }
 0x758   : > { %2017 = vmax.xlane.f32.xlu1 %v2016_v55  ;;  %3993 = vpow2.f32 %v1569_v50 }
 0x759   : > { %3995 = vpow2.f32 %v1563_v28 }
 0x75a   : > { %3997 = vpow2.f32 %v1807_v40 }
 0x75f   : > { %v4769_v20 = vpop.eup %3989 }
 0x763   : > { %v4776_v47 = vpop.eup %3991 }
 0x764   : > { %v1595_v53 = vmul.f32 %v4776_v47, %v4555_v9 }
 0x765   : > { %v4781_v18 = vpop.eup %3993 }
 0x766   : > { %v4783_v26 = vpop.eup %3995  ;;  %v1596_v49 = vmul.f32 %v4781_v18, %v4555_v9 }
 0x767   : > { %v4788_v23 = vpop.eup %3997 }
 0x768   : > { %v1836_v51 = vmul.f32 %v4788_v23, %v4555_v9 }
 0x769   : > { %2079 = vrot.lane.b32.xlu1 %v4412_v38, %s4108_s20  ;;  %v1580_v38 = vsel %vm1215_vm0, %v4706_v5, 0.0 }
 0x76a   : > { %1601 = vrot.lane.b32.xlu0 %v4408_v35, %s4106_s2  ;;  %v1822_v35 = vsel %vm1215_vm0, %v4657_v14, 0.0  ;;  %v1801_v14 = vsub.f32 %v4621_v22, %v4638_v37  ;;  %v1809_v22 = vmul.f32 1.442695, %v1803_v12  ;;  %v1594_v37 = vmul.f32 %v4769_v20, %v4555_v9 }
 0x76b   : > { %v1593_v12 = vmul.f32 %v4783_v26, %v4555_v9 }
 0x76c   : > { %v1805_v16 = vmul.f32 1.442695, %v1801_v14 }
 0x76e   : > { %3999 = vpow2.f32 %v1805_v16 }
 0x76f   : > { %4001 = vpow2.f32 %v1811_v48 }
 0x770   : > { %4003 = vpow2.f32 %v1809_v22 }
 0x77b   : > { %v4792_v54 = vpop.eup %3999 }
 0x77c   : > { %v4798_v62 = vpop.eup %4001  ;;  %v1835_v2 = vmul.f32 %v4792_v54, %v4555_v9 }
 0x77d   : > { %v4802_v31 = vpop.eup %4003  ;;  %v1838_v55 = vmul.f32 %v4798_v62, %v4555_v9 }
 0x789   : > { %1572 = vadd.xlane.f32.xlu0 %v1571_v60  ;;  %v1837_v60 = vmul.f32 %v4802_v31, %v4555_v9 }
 0x78d   : > { %1575 = vadd.xlane.f32.xlu1 %v1574_v61  ;;  %1578 = vadd.xlane.f32.xlu0 %v1577_v41  ;;  %v4812_v61 = vpop.xlane.xlu1 %2005 }
 0x791   : > { %1817 = vadd.xlane.f32.xlu1 %v1816_v4  ;;  %1581 = vadd.xlane.f32.xlu0 %v1580_v38  ;;  %v2012_v41 = vpop.xlane.xlu1 %2011  ;;  %v2009_v4 = vpop.xlane.xlu0 %2008 }
 0x795   : > { %1823 = vadd.xlane.f32.xlu1 %v1822_v35  ;;  %1814 = vadd.xlane.f32.xlu0 %v1813_v56  ;;  %v1600_v3 = vpop.permute.xlu1 %1599 }
 0x799   : > { %1820 = vadd.xlane.f32.xlu0 %v1819_v52  ;;  %v2082_v38 = vpop.permute.xlu1 %2081 }
 0x7a6   : > { %1611 = vrot.lane.b32.xlu1 %v1594_v37, %s4106_s2 }
 0x7aa   : > { %1613 = vrot.lane.b32.xlu1 %v1595_v53, %s4106_s2 }
 0x7ae   : > { %1615 = vrot.lane.b32.xlu1 %v1596_v49, %s4106_s2 }
 0x7af   : > { %1609 = vrot.lane.b32.xlu0 %v1593_v12, %s4106_s2 }
 0x7b2   : > { %1851 = vrot.lane.b32.xlu1 %v1836_v51, %s4107_s30 }
 0x7b3   : > { %1849 = vrot.lane.b32.xlu0 %v1835_v2, %s4107_s30 }
 0x7b6   : > { %1855 = vrot.lane.b32.xlu1 %v1838_v55, %s4107_s30 }
 0x7b7   : > { %1853 = vrot.lane.b32.xlu0 %v1837_v60, %s4107_s30 }
 0x7d9   : > { %v2021_v35 = vpop.xlane.xlu0 %2020 }
 0x7da   : > { %v2027_v6 = vmax.f32 %v2021_v35, %v2009_v4 }
 0x7dc   : > { %v2031_v44 = vsub.f32 %v4721_v36, %v2027_v6 }
 0x7dd   : > { %v2024_v56 = vpop.xlane.xlu1 %2023  ;;  %v2015_v17 = vpop.xlane.xlu0 %2014 }
 0x7de   : > { %v2037_v50 = vmul.f32 1.442695, %v2031_v44  ;;  %v2028_v52 = vmax.f32 %v2024_v56, %v2012_v41  ;;  %v2025_v14 = vmax.f32 %v2015_v17, %v4814_v59 }
 0x7e0   : > { %4005 = vpow2.f32 %v2037_v50  ;;  %v2032_v28 = vsub.f32 %v4729_v43, %v2028_v52  ;;  %v2029_v40 = vsub.f32 %v4724_v63, %v2025_v14  ;;  %v2044_v43 = vsub.f32 %v2012_v41, %v2028_v52 }
 0x7e1   : > { %v2018_v16 = vpop.xlane.xlu1 %2017  ;;  %v1602_v48 = vpop.permute.xlu0 %1601  ;;  %v2043_v63 = vsub.f32 %v2009_v4, %v2027_v6  ;;  %v2041_v56 = vsub.f32 %v4814_v59, %v2025_v14  ;;  %v1339_v14 = vsel %vm1215_vm0, %v4512_v45, 0.0 }
 0x7e2   : > { %v2039_v22 = vmul.f32 1.442695, %v2032_v28  ;;  %v2026_v37 = vmax.f32 %v2018_v16, %v4812_v61  ;;  %3709 = vmatprep.subr.bf16.mxu0 %v1602_v48  ;;  %v2033_v53 = vmul.f32 1.442695, %v2029_v40  ;;  %v2051_v2 = vmul.f32 1.442695, %v2044_v43 }
 0x7e3   : > { %3710 = vmatpush3.bf16.msra.mxu0 %v1602_v48  ;;  %v2049_v55 = vmul.f32 1.442695, %v2043_v63  ;;  %v2045_v52 = vmul.f32 1.442695, %v2041_v56  ;;  %v1342_v48 = vsel %vm1215_vm0, %v4514_v46, 0.0 }
 0x7e4   : > { %4007 = vpow2.f32 %v2039_v22  ;;  %v2030_v36 = vsub.f32 %v4732_v27, %v2026_v37  ;;  %3711 = vmatprep.subr.bf16.mxu0 %v1600_v3  ;;  %v2042_v44 = vsub.f32 %v4812_v61, %v2026_v37  ;;  %v1345_v22 = vsel %vm1215_vm0, %v4519_v57, 0.0  ;;  %v3861_v37 = vld [vmem:[%s4246_s23 + $0x38] sm:$0xff]  }
 0x7e5   : > { %4009 = vpow2.f32 %v2033_v53  ;;  %v2080_v12 = vpop.permute.xlu1 %2079  ;;  %v3862_v53 = vld [vmem:[%s4246_s23 + $0x30] sm:$0xff]  }
 0x7e6   : > { %v2035_v49 = vmul.f32 1.442695, %v2030_v36  ;;  %v2047_v17 = vmul.f32 1.442695, %v2042_v44  ;;  %v3863_v36 = vld [vmem:[%s4246_s23 + $0x28] sm:$0xff]  }
 0x7e7   : > { %3712 = vmatpush3.bf16.msra.mxu0 %v1600_v3 }
 0x7e8   : > { %4011 = vpow2.f32 %v2035_v49  ;;  %3741 = vmatprep.subr.bf16.mxu0 %v2082_v38 }
 0x7e9   : > { %4013 = vpow2.f32 %v2051_v2 }
 0x7ea   : > { %3714 = vmatmul.mubr.msk.bf16.vlgmr.msra.gmra.mxu0 %vm1215_vm0, %v1592_v29  ;;  %4015 = vpow2.f32 %v2049_v55 }
 0x7eb   : > { %3742 = vmatpush3.bf16.msra.mxu0 %v2082_v38  ;;  %4017 = vpow2.f32 %v2047_v17 }
 0x7ec   : > { %3743 = vmatprep.subr.bf16.mxu0 %v2080_v12  ;;  %4019 = vpow2.f32 %v2045_v52  ;;  %v3864_v52 = vld [vmem:[%s4246_s23 + $0x20] sm:$0xff]  }
 0x7ed   : > { %v4006_v51 = vpop.eup %4005 }
 0x7ee   : > { %v2059_v27 = vsel %vm1215_vm0, %v4006_v51, 0.0 }
 0x7ef   : > { %2060 = vadd.xlane.f32.xlu0 %v2059_v27  ;;  %3744 = vmatpush3.bf16.msra.mxu0 %v2080_v12 }
 0x7f0   : > { %3749 = vmatprep.subr.bf16.mxu0 %v3861_v37 }
 0x7f1   : > { %v4008_v60 = vpop.eup %4007 }
 0x7f2   : > { %v2062_v41 = vsel %vm1215_vm0, %v4008_v60, 0.0  ;;  %v4010_v5 = vpop.eup %4009  ;;  %v2074_v3 = vpack.c.bf16 %v4008_v60, %v4006_v51 }
 0x7f3   : > { %2063 = vadd.xlane.f32.xlu1 %v2062_v41  ;;  %v2053_v50 = vsel %vm1215_vm0, %v4010_v5, 0.0 }
 0x7f5   : > { %v4012_v7 = vpop.eup %4011 }
 0x7f6   : > { %v2073_v29 = vpack.c.bf16 %v4012_v7, %v4010_v5  ;;  %v4830_v4 = vpop.eup %4013  ;;  %v2056_v28 = vsel %vm1215_vm0, %v4012_v7, 0.0 }
 0x7f7   : > { %v4832_v38 = vpop.eup %4015  ;;  %v2078_v35 = vmul.f32 %v4830_v4, %v4555_v9 }
 0x7f8   : > { %3745 = vmatprep.mubr.msk.bf16.mxu0 %vm1215_vm0, %v2073_v29  ;;  %v2077_v6 = vmul.f32 %v4832_v38, %v4555_v9  ;;  %v4844_v40 = vpop.eup %4017 }
 0x7f9   : > { %3746 = vmatmul.mubr.msk.bf16.vlgmr.msra.gmra.mxu0 %vm1215_vm0, %v2074_v3  ;;  %v4846_v16 = vpop.eup %4019  ;;  %v2076_v61 = vmul.f32 %v4844_v40, %v4555_v9 }
 0x7fa   : > { %v2075_v59 = vmul.f32 %v4846_v16, %v4555_v9  ;;  %v1348_v9 = vsel %vm1215_vm0, %v4522_v58, 0.0  ;;  %3750 = vmatpush3.bf16.msra.mxu0 %v3861_v37  ;;  %v3865_v37 = vld [vmem:[%s4246_s23 + $0x18] sm:$0xff]  }
 0x7fb   : > { %3751 = vmatprep.subr.bf16.mxu0 %v3862_v53 }
 0x7fe   : > { %3752 = vmatpush3.bf16.msra.mxu0 %v3862_v53 }
 0x7ff   : > { %3753 = vmatprep.subr.bf16.mxu0 %v3863_v36 }
 0x802   : > { %3754 = vmatpush3.bf16.msra.mxu0 %v3863_v36 }
 0x803   : > { %3755 = vmatprep.subr.bf16.mxu0 %v3864_v52 }
 0x804   : > { %2095 = vrot.lane.b32.xlu1 %v2078_v35, %s4108_s20 }
 0x805   : > { %2093 = vrot.lane.b32.xlu0 %v2077_v6, %s4108_s20 }
 0x806   : > { %3756 = vmatpush3.bf16.msra.mxu0 %v3864_v52 }
 0x807   : > { %3757 = vmatprep.subr.bf16.mxu0 %v3865_v37 }
 0x80a   : > { %3758 = vmatpush3.bf16.msra.mxu0 %v3865_v37 }
 0x812   : > { %v1573_v45 = vpop.xlane.xlu0 %1572 }
 0x813   : > { %v1583_v41 = vadd.f32 %v4783_v26, %v1573_v45 }
 0x815   : > { %4021 = vrcp.f32 %v1583_v41 }
 0x816   : > { %v1576_v46 = vpop.xlane.xlu1 %1575  ;;  %v1579_v49 = vpop.xlane.xlu0 %1578 }
 0x817   : > { %v1584_v5 = vadd.f32 %v4769_v20, %v1576_v46  ;;  %v1585_v29 = vadd.f32 %v4776_v47, %v1579_v49 }
 0x819   : > { %4023 = vrcp.f32 %v1584_v5 }
 0x81a   : > { %v1818_v43 = vpop.xlane.xlu1 %1817  ;;  %v1582_v57 = vpop.xlane.xlu0 %1581  ;;  %4025 = vrcp.f32 %v1585_v29 }
 0x81b   : > { %v1586_v3 = vadd.f32 %v4781_v18, %v1582_v57  ;;  %v1826_v6 = vadd.f32 %v4788_v23, %v1818_v43 }
 0x81d   : > { %4027 = vrcp.f32 %v1586_v3 }
 0x81e   : > { %v1824_v63 = vpop.xlane.xlu1 %1823  ;;  %v1815_v12 = vpop.xlane.xlu0 %1814  ;;  %4029 = vrcp.f32 %v1826_v6 }
 0x81f   : > { %v1825_v44 = vadd.f32 %v4792_v54, %v1815_v12  ;;  %v1828_v20 = vadd.f32 %v4798_v62, %v1824_v63 }
 0x821   : > { %4031 = vrcp.f32 %v1825_v44 }
 0x822   : > { %v1612_v51 = vpop.permute.xlu1 %1611  ;;  %v1821_v2 = vpop.xlane.xlu0 %1820  ;;  %4033 = vrcp.f32 %v1828_v20 }
 0x823   : > { %v1827_v47 = vadd.f32 %v4802_v31, %v1821_v2 }
 0x824   : > { %2054 = vadd.xlane.f32.xlu0 %v2053_v50 }
 0x825   : > { %4035 = vrcp.f32 %v1827_v47 }
 0x826   : > { %v1614_v58 = vpop.permute.xlu1 %1613  ;;  %v1610_v27 = vpop.permute.xlu0 %1609 }
 0x828   : > { %2057 = vadd.xlane.f32.xlu1 %v2056_v28  ;;  %v4022_v28 = vpop.eup %4021 }
 0x82a   : > { %v1616_v55 = vpop.permute.xlu1 %1615  ;;  %v1850_v60 = vpop.permute.xlu0 %1849 }
 0x82e   : > { %v1852_v7 = vpop.permute.xlu1 %1851  ;;  %v4869_v35 = vpop.permute.xlu0 %1853 }
 0x82f   : > { %v1905_v31 = vadd.f32 %v4718_v13, %v1852_v7 }
 0x832   : > { %v1856_v56 = vpop.permute.xlu1 %1855 }
 0x839   : > { %2091 = vrot.lane.b32.xlu1 %v2076_v61, %s4108_s20 }
 0x83a   : > { %2089 = vrot.lane.b32.xlu0 %v2075_v59, %s4108_s20 }
 0x859   : > { %1340 = vadd.xlane.f32.xlu0 %v1339_v14 }
 0x85d   : > { %1343 = vadd.xlane.f32.xlu1 %v1342_v48  ;;  %1346 = vadd.xlane.f32.xlu0 %v1345_v22  ;;  %v4024_v48 = vpop.eup %4023 }
 0x85e   : > { %v4026_v53 = vpop.eup %4025 }
 0x85f   : > { %v4028_v45 = vpop.eup %4027 }
 0x860   : > { %v4030_v46 = vpop.eup %4029 }
 0x861   : > { %1349 = vadd.xlane.f32.xlu0 %v1348_v9  ;;  %v4032_v63 = vpop.eup %4031  ;;  %v1917_v12 = vmul.f32 %v4030_v46, %v1905_v31 }
 0x878   : > { %v2061_v26 = vpop.xlane.xlu0 %2060 }
 0x879   : > { %v2067_v50 = vadd.f32 %v4832_v38, %v2061_v26 }
 0x87b   : > { %4037 = vrcp.f32 %v2067_v50 }
 0x87c   : > { %v2064_v18 = vpop.xlane.xlu1 %2063  ;;  %v2094_v17 = vpop.permute.xlu0 %2093 }
 0x87d   : > { %v2068_v61 = vadd.f32 %v4830_v4, %v2064_v18 }
 0x87f   : > { %4039 = vrcp.f32 %v2068_v61 }
 0x880   : > { %v4878_v59 = vpop.permute.xlu1 %2095 }
 0x8aa   : > { %v3715_v23 = vpop.f32.mrf.mxu0 }
 0x8ab   : > { %v1670_v14 = vadd.f32 %v3715_v23, %v1614_v58  ;;  %v3866_v58 = vld [vmem:[%s4246_s23 + $0x10] sm:$0xff]  }
 0x8ac   : > { %v1661_v54 = vpop.f32.mrf.mxu0  ;;  %3759 = vmatprep.subr.bf16.mxu0 %v3866_v58 }
 0x8ad   : > { %v2055_v62 = vpop.xlane.xlu0 %2054  ;;  %v1662_v36 = vadd.f32 %v1661_v54, %v1610_v27  ;;  %v1678_v49 = vmul.f32 %v4026_v53, %v1670_v14  ;;  %v1913_v27 = vadd.f32 %v4716_v34, %v1856_v56  ;;  %3760 = vmatpush3.bf16.msra.mxu0 %v3866_v58  ;;  %v3867_v34 = vld [vmem:[%s4246_s23 + $0x8] sm:$0xff]   ;;  %v3868_v56 = vld [vmem:[%s4246_s23] sm:$0xff]  }
 0x8ae   : > { %v2065_v22 = vadd.f32 %v4846_v16, %v2055_v62  ;;  %v3716_v9 = vpop.f32.mrf.mxu0  ;;  %v1902_v16 = vadd.f32 %v4714_v11, %v1850_v60  ;;  %3761 = vmatprep.subr.bf16.mxu0 %v3867_v34 }
 0x8af   : > { %v1673_v38 = vadd.f32 %v3716_v9, %v1616_v55  ;;  %v1676_v55 = vmul.f32 %v4022_v28, %v1662_v36 }
 0x8b0   : > { %v1664_v4 = vpop.f32.mrf.mxu0  ;;  %4041 = vrcp.f32 %v2065_v22  ;;  %v1916_v7 = vmul.f32 %v4032_v63, %v1902_v16 }
 0x8b1   : > { %v1679_v43 = vmul.f32 %v4028_v45, %v1673_v38  ;;  %v1665_v57 = vadd.f32 %v1664_v4, %v1612_v51  ;;  %v2058_v13 = vpop.xlane.xlu1 %2057  ;;  %v4034_v51 = vpop.eup %4033  ;;  %3762 = vmatpush3.bf16.msra.mxu0 %v3867_v34 }
 0x8b2   : > { %v2066_v2 = vadd.f32 %v4844_v40, %v2058_v13  ;;  %v4036_v11 = vpop.eup %4035  ;;  %v3809_v60 = vpack.i.bf16 %v1917_v12, %v1916_v7  ;;  %v1910_v40 = vadd.f32 %v4712_v24, %v4869_v35  ;;  %v1919_v3 = vmul.f32 %v4034_v51, %v1913_v27  ;;  %3763 = vmatprep.subr.bf16.mxu0 %v3868_v56  ;;  %v2090_v23 = vpop.permute.xlu0 %2089 }
 0x8b3   : > { %v3804_v41 = vpack.i.bf16 %v1679_v43, %v1678_v49  ;;  %v1677_v5 = vmul.f32 %v4024_v48, %v1665_v57  ;;  %v4038_v18 = vpop.eup %4037 }
 0x8b4   : > { %4043 = vrcp.f32 %v2066_v2  ;;  %v1918_v6 = vmul.f32 %v4036_v11, %v1910_v40  ;;  %v4040_v24 = vpop.eup %4039 }
 0x8b5   : > { %v3799_v29 = vpack.i.bf16 %v1677_v5, %v1676_v55  ;;  %3805 = vrot.lane.b32.xlu1 %v3804_v41, %s4108_s20  ;;  %v2092_v28 = vpop.permute.xlu1 %2091  ;;  %3764 = vmatpush3.bf16.msra.mxu0 %v3868_v56 }
 0x8b6   : > { %v3814_v26 = vpack.i.bf16 %v1919_v3, %v1918_v6 }
 0x8b7   : > { %3800 = vrot.lane.b32.xlu0 %v3799_v29, %s4108_s20 }
 0x8b9   : > { %v3747_v44 = vpop.f32.mrf.mxu0  ;;  %3810 = vrot.lane.b32.xlu1 %v3809_v60, %s4107_s30 }
 0x8ba   : > { %v2150_v47 = vadd.f32 %v3747_v44, %v2094_v17 }
 0x8bb   : > { %v2141_v20 = vpop.f32.mrf.mxu0 }
 0x8bc   : > { %v2142_v35 = vadd.f32 %v2141_v20, %v2090_v23  ;;  %v2158_v14 = vmul.f32 %v4038_v18, %v2150_v47 }
 0x8bd   : > { %v3748_v50 = vpop.f32.mrf.mxu0  ;;  %3815 = vrot.lane.b32.xlu1 %v3814_v26, %s4107_s30  ;;  %v4042_v52 = vpop.eup %4041 }
 0x8be   : > { %v2153_v54 = vadd.f32 %v3748_v50, %v4878_v59  ;;  %v2156_v22 = vmul.f32 %v4042_v52, %v2142_v35 }
 0x8bf   : > { %v2144_v61 = vpop.f32.mrf.mxu0 }
 0x8c0   : > { %v2159_v62 = vmul.f32 %v4040_v24, %v2153_v54  ;;  %v2145_v48 = vadd.f32 %v2144_v61, %v2092_v28  ;;  %v3476_v28 = vld [vmem:[%s5268_s3] ss:$0 sm:$0xff] }
 0x8c1   : > { %v4044_v31 = vpop.eup %4043 }
 0x8c2   : > { %v3824_v17 = vpack.i.bf16 %v2159_v62, %v2158_v14  ;;  %v2157_v9 = vmul.f32 %v4044_v31, %v2145_v48  ;;  %v4093_v31 = vld [vmem:[%s5260_s24] sm:$0xff] }
 0x8c4   : > { %v3819_v37 = vpack.i.bf16 %v2157_v9, %v2156_v22  ;;  %3825 = vrot.lane.b32.xlu1 %v3824_v17, %s4106_s2 }
 0x8c6   : > { %3820 = vrot.lane.b32.xlu0 %v3819_v37, %s4106_s2  ;;  %v4094_v37 = vld [vmem:[%s5260_s24 + $0x10] sm:$0xff] }
 0x8e2   : > { %v1341_v53 = vpop.xlane.xlu0 %1340 }
 0x8e3   : > { %v1351_v36 = vadd.f32 %v4548_v32, %v1341_v53 }
 0x8e5   : > { %4045 = vrcp.f32 %v1351_v36 }
 0x8e6   : > { %v1344_v59 = vpop.xlane.xlu1 %1343  ;;  %v1347_v38 = vpop.xlane.xlu0 %1346 }
 0x8e7   : > { %v1352_v45 = vadd.f32 %v4565_v21, %v1344_v59  ;;  %v1353_v4 = vadd.f32 %v4546_v30, %v1347_v38  ;;  %v4095_v59 = vld [vmem:[%s5260_s24 + $0x8] sm:$0xff] }
 0x8e9   : > { %4047 = vrcp.f32 %v1352_v45  ;;  %v4096_v45 = vld [vmem:[%s5260_s24 + $0x18] sm:$0xff] }
 0x8ea   : > { %4049 = vrcp.f32 %v1353_v4  ;;  %v1350_v46 = vpop.xlane.xlu0 %1349 }
 0x8eb   : > { %v1354_v49 = vadd.f32 %v4559_v10, %v1350_v46  ;;  %v3869_v46 = vld [vmem:[%s4264_s7 + $0xe0] ss:$16 sps:$4 sm:$0xff]  }
 0x8ed   : > { %4051 = vrcp.f32 %v1354_v49  ;;  %v3871_v49 = vld [vmem:[%s4264_s7 + $0xe4] ss:$16 sps:$4 sm:$0xff]  }
 0x8ee   : > { %2630 = vmatprep.subr.bf16.mxu1 %v3871_v49 }
 0x8ef   : > { %2631 = vmatpush1.bf16.msra.mxu1 %v3869_v46 }
 0x8f2   : > { %v4046_v43 = vpop.eup %4045 }
 0x8f3   : > { %v1426_v57 = vmul.f32 %v4046_v43, %v4567_v33  ;;  %v3872_v43 = vld [vmem:[%s4264_s7 + $0xe8] ss:$16 sps:$4 sm:$0xff]  }
 0x8f6   : > { %v4048_v13 = vpop.eup %4047 }
 0x8f7   : > { %v4050_v63 = vpop.eup %4049  ;;  %v1427_v32 = vmul.f32 %v4048_v13, %v4575_v42 }
 0x8f8   : > { %v1428_v16 = vmul.f32 %v4050_v63, %v4561_v15 }
 0x8fa   : > { %v4052_v12 = vpop.eup %4051 }
 0x8fb   : > { %v1429_v21 = vmul.f32 %v4052_v12, %v4571_v39 }
 0x927   : > { %v3806_v2 = vpop.permute.xlu1 %3805 }
 0x928   : > { %v3808_v55 = vunpack.i.h.bf16 %v3806_v2  ;;  %v3807_v41 = vunpack.i.l.bf16 %v3806_v2 }
 0x929   : > { %v3801_v58 = vpop.permute.xlu0 %3800 }
 0x92a   : > { %v3803_v10 = vunpack.i.h.bf16 %v3801_v58  ;;  %v3802_v5 = vunpack.i.l.bf16 %v3801_v58  ;;  %v2210_v33 = vsel %vm1215_vm0, %v1428_v16, %v3807_v41  ;;  %v2211_v42 = vsel %vm1215_vm0, %v1429_v21, %v3808_v55 }
 0x92b   : > { %v3811_v30 = vpop.permute.xlu1 %3810 }
 0x92c   : > { %v3813_v15 = vunpack.i.h.bf16 %v3811_v30  ;;  %v3812_v29 = vunpack.i.l.bf16 %v3811_v30  ;;  %v2209_v39 = vsel %vm1215_vm0, %v1427_v32, %v3803_v10  ;;  %v2208_v60 = vsel %vm1215_vm0, %v1426_v57, %v3802_v5  ;;  %v3874_v57 = vld [vmem:[%s4264_s7 + $0xec] ss:$16 sps:$4 sm:$0xff]  }
 0x92d   : > { %2683 = vmatprep.subr.bf16.mxu0 %v3874_v57 }
 0x92e   : > { %v2213_v18 = vsel %vm2212_vm1, %v2208_v60, %v3812_v29  ;;  %v2214_v23 = vsel %vm2212_vm1, %v2209_v39, %v3813_v15  ;;  %v3875_v15 = vld [vmem:[%s4264_s7 + $0xc0] ss:$16 sps:$4 sm:$0xff]   ;;  %v3878_v29 = vld [vmem:[%s4264_s7 + $0xc8] ss:$16 sps:$4 sm:$0xff]   ;;  %v3886_v39 = vld [vmem:[%s4264_s7 + $0xac] ss:$16 sps:$4 sm:$0xff]  }
 0x92f   : > { %v3816_v27 = vpop.permute.xlu1 %3815  ;;  %v3881_v60 = vld [vmem:[%s4264_s7 + $0xa0] ss:$16 sps:$4 sm:$0xff]  }
 0x930   : > { %v3818_v51 = vunpack.i.h.bf16 %v3816_v27  ;;  %v3817_v7 = vunpack.i.l.bf16 %v3816_v27 }
 0x932   : > { %v2215_v34 = vsel %vm2212_vm1, %v2210_v33, %v3817_v7  ;;  %v2216_v6 = vsel %vm2212_vm1, %v2211_v42, %v3818_v51  ;;  %v3877_v33 = vld [vmem:[%s4264_s7 + $0xc4] ss:$16 sps:$4 sm:$0xff]   ;;  %v3880_v42 = vld [vmem:[%s4264_s7 + $0xcc] ss:$16 sps:$4 sm:$0xff]  }
 0x933   : > { %2632 = vmatprep.subr.bf16.mxu1 %v3877_v33 }
 0x934   : > { %2633 = vmatpush1.bf16.msra.mxu1 %v3875_v15 }
 0x936   : > { %v3826_v11 = vpop.permute.xlu1 %3825 }
 0x937   : > { %v3828_v40 = vunpack.i.h.bf16 %v3826_v11  ;;  %v3827_v3 = vunpack.i.l.bf16 %v3826_v11  ;;  %v3883_v11 = vld [vmem:[%s4264_s7 + $0xa4] ss:$16 sps:$4 sm:$0xff]  }
 0x938   : > { %v3821_v44 = vpop.permute.xlu0 %3820  ;;  %2634 = vmatprep.subr.bf16.mxu1 %v3883_v11 }
 0x939   : > { %v2220_v56 = vsel %vm2217_vm2, %v2215_v34, %v3827_v3  ;;  %v2221_v26 = vsel %vm2217_vm2, %v2216_v6, %v3828_v40  ;;  %v3823_v20 = vunpack.i.h.bf16 %v3821_v44  ;;  %v3822_v47 = vunpack.i.l.bf16 %v3821_v44  ;;  %v3884_v40 = vld [vmem:[%s4264_s7 + $0xa8] ss:$16 sps:$4 sm:$0xff]   ;;  %2635 = vmatpush1.bf16.msra.mxu1 %v3881_v60  ;;  %v3889_v3 = vld [vmem:[%s4264_s7 + $0x84] ss:$16 sps:$4 sm:$0xff]   ;;  %v3892_v34 = vld [vmem:[%s4264_s7 + $0x8c] ss:$16 sps:$4 sm:$0xff]  }
 0x93a   : > { %v2223_v50 = vpack.c.bf16 %v2221_v26, %v2220_v56  ;;  %v3887_v6 = vld [vmem:[%s4264_s7 + $0x80] ss:$16 sps:$4 sm:$0xff]   ;;  %v3890_v44 = vld [vmem:[%s4264_s7 + $0x88] ss:$16 sps:$4 sm:$0xff]   ;;  %2636 = vmatprep.subr.bf16.mxu1 %v3889_v3  ;;  %v3895_v56 = vld [vmem:[%s4264_s7 + $0x64] ss:$16 sps:$4 sm:$0xff]  }
 0x93b   : > { %v2218_v24 = vsel %vm2217_vm2, %v2213_v18, %v3822_v47  ;;  %v2219_v35 = vsel %vm2217_vm2, %v2214_v23, %v3823_v20  ;;  %v3898_v26 = vld [vmem:[%s4264_s7 + $0x6c] ss:$16 sps:$4 sm:$0xff]   ;;  %v3893_v20 = vld [vmem:[%s4264_s7 + $0x60] ss:$16 sps:$4 sm:$0xff]   ;;  %v3896_v47 = vld [vmem:[%s4264_s7 + $0x68] ss:$16 sps:$4 sm:$0xff]  }
 0x93c   : > { %v2222_v54 = vpack.c.bf16 %v2219_v35, %v2218_v24  ;;  %v3901_v18 = vld [vmem:[%s4264_s7 + $0x44] ss:$16 sps:$4 sm:$0xff]   ;;  %v3904_v23 = vld [vmem:[%s4264_s7 + $0x4c] ss:$16 sps:$4 sm:$0xff]   ;;  %v3902_v24 = vld [vmem:[%s4264_s7 + $0x48] ss:$16 sps:$4 sm:$0xff]  }
 0x93d   : > { %2637 = vmatpush1.bf16.msra.mxu1 %v3887_v6  ;;  %v3907_v35 = vld [vmem:[%s4264_s7 + $0x24] ss:$16 sps:$4 sm:$0xff]   ;;  %v3918_v60 = vld [vmem:[%s4275_s0 + $0xf8] sm:$0xff]  }
 0x93e   : > { %3765 = vmatprep.mubr.bf16.mxu0 %v2222_v54  ;;  %2638 = vmatprep.subr.bf16.mxu1 %v3895_v56  ;;  %v3910_v54 = vld [vmem:[%s4264_s7 + $0x2c] ss:$16 sps:$4 sm:$0xff]   ;;  %v3923_v6 = vld [vmem:[%s4275_s0 + $0x30] sm:$0xff]  }
 0x93f   : > { %3766 = vmatmul.mubr.bf16.vlgmr.msra.gmra.mxu0 %v2223_v50  ;;  %v3899_v50 = vld [vmem:[%s4264_s7 + $0x40] ss:$16 sps:$4 sm:$0xff]   ;;  %v3920_v3 = vld [vmem:[%s4275_s0 + $0xb8] sm:$0xff]   ;;  %v3925_v56 = vld [vmem:[%s4275_s0 + $0x68] sm:$0xff]  }
 0x940   : > { %2715 = vmatprep.mubr.bf16.mxu0 %v4105_v25  ;;  %2684 = vmatpush1.bf16.msra.mxu0 %v3872_v43 }
 0x941   : > { %2685 = vmatprep.subr.bf16.mxu0 %v3880_v42  ;;  %2639 = vmatpush1.bf16.msra.mxu1 %v3893_v20  ;;  %v3927_v20 = vld [vmem:[%s4275_s0 + $0x28] sm:$0xff]  }
 0x942   : > { %2640 = vmatprep.subr.bf16.mxu1 %v3901_v18  ;;  %v3929_v18 = vld [vmem:[%s4275_s0 + $0x60] sm:$0xff]  }
 0x944   : > { %2686 = vmatpush1.bf16.msra.mxu0 %v3878_v29 }
 0x945   : > { %2687 = vmatprep.subr.bf16.mxu0 %v3886_v39  ;;  %2641 = vmatpush1.bf16.msra.mxu1 %v3899_v50  ;;  %v3931_v50 = vld [vmem:[%s4275_s0 + $0x20] sm:$0xff]  }
 0x946   : > { %2642 = vmatprep.subr.bf16.mxu1 %v3907_v35  ;;  %v3933_v35 = vld [vmem:[%s4275_s0 + $0x58] sm:$0xff]  }
 0x948   : > { %2688 = vmatpush1.bf16.msra.mxu0 %v3884_v40  ;;  %v3919_v40 = vld [vmem:[%s4275_s0 + $0x38] sm:$0xff]  }
 0x949   : > { %2689 = vmatprep.subr.bf16.mxu0 %v3892_v34  ;;  %v3922_v34 = vld [vmem:[%s4275_s0 + $0xf0] sm:$0xff]  }
 0x94c   : > { %2690 = vmatpush1.bf16.msra.mxu0 %v3890_v44  ;;  %v3924_v44 = vld [vmem:[%s4275_s0 + $0xb0] sm:$0xff]  }
 0x94d   : > { %2691 = vmatprep.subr.bf16.mxu0 %v3898_v26  ;;  %v3926_v26 = vld [vmem:[%s4275_s0 + $0xe8] sm:$0xff]  }
 0x950   : > { %2692 = vmatpush1.bf16.msra.mxu0 %v3896_v47  ;;  %v3928_v47 = vld [vmem:[%s4275_s0 + $0xa8] sm:$0xff]  }
 0x951   : > { %2693 = vmatprep.subr.bf16.mxu0 %v3904_v23  ;;  %v3930_v23 = vld [vmem:[%s4275_s0 + $0xe0] sm:$0xff]  }
 0x954   : > { %2694 = vmatpush1.bf16.msra.mxu0 %v3902_v24  ;;  %v3932_v24 = vld [vmem:[%s4275_s0 + $0xa0] sm:$0xff]  }
 0x955   : > { %2695 = vmatprep.subr.bf16.mxu0 %v3910_v54  ;;  %v3934_v54 = vld [vmem:[%s4275_s0 + $0xd8] sm:$0xff]  }
 0x9ff   : > { %v3767_v52 = vpop.f32.mrf.mxu0 }
 0xa00   : > { %v2338_v48 = vadd.f32 %v3767_v52, %v3476_v28  ;;  %v3905_v52 = vld [vmem:[%s4264_s7 + $0x20] ss:$16 sps:$4 sm:$0xff]  }
 0xa01   : > { %v2329_v61 = vpop.f32.mrf.mxu0  ;;  %2643 = vmatpush1.bf16.msra.mxu1 %v3905_v52  ;;  %v3935_v52 = vld [vmem:[%s4275_s0 + $0x18] sm:$0xff]  }
 0xa02   : > { %v2330_v14 = vadd.f32 %v3476_v28, %v2329_v61  ;;  %v4933_v53 = vadd.f32 %v4094_v37, %v2338_v48  ;;  %v3913_v61 = vld [vmem:[%s4264_s7 + $0x4] ss:$16 sps:$4 sm:$0xff]   ;;  %v3914_v48 = vld [vmem:[%s4264_s7 + $0x8] ss:$16 sps:$4 sm:$0xff]  }
 0xa03   : > { %v3768_v62 = vpop.f32.mrf.mxu0  ;;  %2644 = vmatprep.subr.bf16.mxu1 %v3913_v61  ;;  %v3937_v61 = vld [vmem:[%s4275_s0 + $0x50] sm:$0xff]  }
 0xa04   : > { %v4927_v22 = vadd.f32 %v4093_v31, %v2330_v14  ;;  %v2341_v36 = vadd.f32 %v3768_v62, %v3476_v28  ;;  %v3916_v14 = vld [vmem:[%s4264_s7 + $0xc] ss:$16 sps:$4 sm:$0xff]   ;;  %v3911_v62 = vld [vmem:[%s4264_s7] ss:$16 sps:$4 sm:$0xff]  }
 0xa05   : > { %v2332_v17 = vpop.f32.mrf.mxu0  ;;  %2645 = vmatpush1.bf16.msra.mxu1 %v3911_v62  ;;  %v3939_v62 = vld [vmem:[%s4275_s0 + $0x10] sm:$0xff]  }
 0xa06   : > { %v2333_v9 = vadd.f32 %v3476_v28, %v2332_v17  ;;  %2350 = vadd.xlane.f32.xlu0 %v4927_v22  ;;  %v4945_v4 = vadd.f32 %v4096_v45, %v2341_v36  ;;  %v3908_v28 = vld [vmem:[%s4264_s7 + $0x28] ss:$16 sps:$4 sm:$0xff]  }
 0xa07   : > { %2696 = vmatpush1.bf16.msra.mxu0 %v3908_v28  ;;  %v3936_v28 = vld [vmem:[%s4275_s0 + $0x98] sm:$0xff]  }
 0xa08   : > { %v4938_v38 = vadd.f32 %v4095_v59, %v2333_v9  ;;  %2697 = vmatprep.subr.bf16.mxu0 %v3916_v14  ;;  %v3938_v14 = vld [vmem:[%s4275_s0 + $0xd0] sm:$0xff]  }
 0xa0a   : > { %2352 = vadd.xlane.f32.xlu1 %v4938_v38  ;;  %2354 = vadd.xlane.f32.xlu0 %v4933_v53 }
 0xa0b   : > { %2698 = vmatpush1.bf16.msra.mxu0 %v3914_v48  ;;  %v3940_v48 = vld [vmem:[%s4275_s0 + $0x90] sm:$0xff]  }
 0xa0c   : > { %3637 = vmatprep.subr.bf16.mxu0 %v3918_v60 }
 0xa0e   : > { %2356 = vadd.xlane.f32.xlu0 %v4945_v4 }
 0xa8f   : > { %v2351_v13 = vpop.xlane.xlu0 %2350 }
 0xa90   : > { %v2358_v63 = vmul.f32 0.0078125, %v2351_v13 }
 0xa92   : > { %v4953_v32 = vsub.f32 %v4927_v22, %v2358_v63 }
 0xa93   : > { %v2353_v16 = vpop.xlane.xlu1 %2352  ;;  %v2355_v12 = vpop.xlane.xlu0 %2354 }
 0xa94   : > { %v2359_v21 = vmul.f32 0.0078125, %v2353_v16  ;;  %v2360_v2 = vmul.f32 0.0078125, %v2355_v12  ;;  %v2366_v30 = vmul.f32 %v4953_v32, %v4953_v32  ;;  %v3485_v12 = vld [vmem:[%s5269_s19] ss:$0 sm:$0xff] }
 0xa96   : > { %v4958_v58 = vsub.f32 %v4938_v38, %v2359_v21  ;;  %v4961_v27 = vsub.f32 %v4933_v53, %v2360_v2  ;;  %2370 = vadd.xlane.f32.xlu0 %v2366_v30 }
 0xa97   : > { %v2357_v55 = vpop.xlane.xlu0 %2356 }
 0xa98   : > { %v2361_v41 = vmul.f32 0.0078125, %v2357_v55  ;;  %v2367_v10 = vmul.f32 %v4958_v58, %v4958_v58  ;;  %v2368_v5 = vmul.f32 %v4961_v27, %v4961_v27 }
 0xa9a   : > { %v4968_v51 = vsub.f32 %v4945_v4, %v2361_v41  ;;  %2372 = vadd.xlane.f32.xlu1 %v2367_v10  ;;  %2374 = vadd.xlane.f32.xlu0 %v2368_v5  ;;  %v3486_v41 = vld [vmem:[%s5270_s26] ss:$0 sm:$0xff] }
 0xa9c   : > { %v2369_v7 = vmul.f32 %v4968_v51, %v4968_v51 }
 0xa9e   : > { %2376 = vadd.xlane.f32.xlu1 %v2369_v7 }
 0xb1f   : > { %v2371_v31 = vpop.xlane.xlu0 %2370 }
 0xb20   : > { %v2378_v17 = vmul.f32 0.0078125, %v2371_v31  ;;  %v3941_v31 = vld [vmem:[%s4275_s0 + $0x48] sm:$0xff]  }
 0xb22   : > { %v2382_v9 = vadd.f32 1e-06, %v2378_v17  ;;  %v3942_v17 = vld [vmem:[%s4275_s0 + $0xc8] sm:$0xff]  }
 0xb23   : > { %v2373_v37 = vpop.xlane.xlu1 %2372  ;;  %v2375_v36 = vpop.xlane.xlu0 %2374 }
 0xb24   : > { %4053 = vrsqrt.f32 %v2382_v9  ;;  %v2379_v59 = vmul.f32 0.0078125, %v2373_v37  ;;  %v2380_v45 = vmul.f32 0.0078125, %v2375_v36  ;;  %v3943_v9 = vld [vmem:[%s4275_s0 + $0x8] sm:$0xff]   ;;  %v3945_v36 = vld [vmem:[%s4275_s0 + $0x40] sm:$0xff]  }
 0xb25   : > { %v3944_v37 = vld [vmem:[%s4275_s0 + $0x88] sm:$0xff]  }
 0xb26   : > { %v2383_v46 = vadd.f32 1e-06, %v2379_v59  ;;  %v2384_v49 = vadd.f32 1e-06, %v2380_v45  ;;  %v3946_v59 = vld [vmem:[%s4275_s0 + $0xc0] sm:$0xff]  }
 0xb27   : > { %v2377_v43 = vpop.xlane.xlu1 %2376  ;;  %v3947_v45 = vld [vmem:[%s4275_s0] sm:$0xff]  }
 0xb28   : > { %4055 = vrsqrt.f32 %v2383_v46  ;;  %v2381_v57 = vmul.f32 0.0078125, %v2377_v43  ;;  %v3948_v46 = vld [vmem:[%s4275_s0 + $0x80] sm:$0xff]   ;;  %v2464_v43 = vsub.s32 3, %v4379_v0 }
 0xb29   : > { %4057 = vrsqrt.f32 %v2384_v49  ;;  %v2448_v49 = vld [vmem:[%s4270_s8] sm:$0xf] }
 0xb2a   : > { %v2385_v13 = vadd.f32 1e-06, %v2381_v57  ;;  %v5052_v57 = vrot.slane %v2448_v49, %v956_v1 }
 0xb2c   : > { %4059 = vrsqrt.f32 %v2385_v13  ;;  %v5056_v13 = vrot.slane %v2448_v49, %v964_v8 }
 0xb31   : > { %v4054_v63 = vpop.eup %4053 }
 0xb32   : > { %v2390_v16 = vmul.f32 %v4054_v63, %v4953_v32  ;;  %v5060_v63 = vrot.slane %v2448_v49, %v960_v19 }
 0xb34   : > { %v2400_v30 = vmul.f32 %v3485_v12, %v2390_v16  ;;  %v5062_v16 = vrot.slane %v2448_v49, %v2464_v43 }
 0xb35   : > { %v4056_v21 = vpop.eup %4055 }
 0xb36   : > { %v2391_v2 = vmul.f32 %v4056_v21, %v4958_v58  ;;  %v4058_v55 = vpop.eup %4057  ;;  %v2410_v7 = vadd.f32 %v3486_v41, %v2400_v30 }
 0xb37   : > { %v2392_v33 = vmul.f32 %v4058_v55, %v4961_v27 }
 0xb38   : > { %v2401_v10 = vmul.f32 %v3485_v12, %v2391_v2 }
 0xb39   : > { %v4060_v5 = vpop.eup %4059  ;;  %v2402_v29 = vmul.f32 %v3485_v12, %v2392_v33 }
 0xb3a   : > { %v2411_v32 = vadd.f32 %v3486_v41, %v2401_v10  ;;  %v2393_v42 = vmul.f32 %v4060_v5, %v4968_v51  ;;  %v3917_v51 = vld [vmem:[%s4275_s0 + $0x78] sm:$0xff]  }
 0xb3b   : > { %v2412_v39 = vadd.f32 %v3486_v41, %v2402_v29  ;;  %3609 = vmatprep.subr.bf16.mxu1 %v3917_v51 }
 0xb3c   : > { %v2414_v58 = vpack.c.bf16 %v2411_v32, %v2410_v7  ;;  %v2403_v15 = vmul.f32 %v3485_v12, %v2393_v42 }
 0xb3e   : > { %2663 = vmatmul.mubr.bf16.vlgmr.msra.gmra.mxu1 %v2414_v58  ;;  %2716 = vmatmul.mubr.bf16.vlgmr.msra.gmra.mxu0 %v2414_v58  ;;  %v2413_v11 = vadd.f32 %v3486_v41, %v2403_v15 }
 0xb3f   : > { %2672 = vmatprep.mubr.bf16.mxu1 %v4105_v25  ;;  %2725 = vmatprep.mubr.bf16.mxu0 %v4105_v25  ;;  %v3921_v25 = vld [vmem:[%s4275_s0 + $0x70] sm:$0xff]  }
 0xb40   : > { %v2415_v27 = vpack.c.bf16 %v2413_v11, %v2412_v39  ;;  %3610 = vmatpush3.bf16.msra.mxu1 %v3919_v40  ;;  %3638 = vmatpush3.bf16.msra.mxu0 %v3920_v3 }
 0xb41   : > { %3611 = vmatprep.subr.bf16.mxu1 %v3921_v25  ;;  %3639 = vmatprep.subr.bf16.mxu0 %v3922_v34 }
 0xb44   : > { %3612 = vmatpush3.bf16.msra.mxu1 %v3923_v6  ;;  %3640 = vmatpush3.bf16.msra.mxu0 %v3924_v44 }
 0xb45   : > { %3613 = vmatprep.subr.bf16.mxu1 %v3925_v56  ;;  %3641 = vmatprep.subr.bf16.mxu0 %v3926_v26 }
 0xb46   : > { %2673 = vmatmul.mubr.bf16.gmra.mxu1 %v2415_v27  ;;  %2726 = vmatmul.mubr.bf16.gmra.mxu0 %v2415_v27 }
 0xb48   : > { %3614 = vmatpush3.bf16.msra.mxu1 %v3927_v20  ;;  %3642 = vmatpush3.bf16.msra.mxu0 %v3928_v47 }
 0xb49   : > { %3615 = vmatprep.subr.bf16.mxu1 %v3929_v18  ;;  %3643 = vmatprep.subr.bf16.mxu0 %v3930_v23 }
 0xb4c   : > { %3616 = vmatpush3.bf16.msra.mxu1 %v3931_v50  ;;  %3644 = vmatpush3.bf16.msra.mxu0 %v3932_v24 }
 0xb4d   : > { %3617 = vmatprep.subr.bf16.mxu1 %v3933_v35  ;;  %3645 = vmatprep.subr.bf16.mxu0 %v3934_v54 }
 0xb50   : > { %3618 = vmatpush3.bf16.msra.mxu1 %v3935_v52  ;;  %3646 = vmatpush3.bf16.msra.mxu0 %v3936_v28 }
 0xb51   : > { %3619 = vmatprep.subr.bf16.mxu1 %v3937_v61  ;;  %3647 = vmatprep.subr.bf16.mxu0 %v3938_v14 }
 0xb54   : > { %3620 = vmatpush3.bf16.msra.mxu1 %v3939_v62  ;;  %3648 = vmatpush3.bf16.msra.mxu0 %v3940_v48 }
 0xb55   : > { %3621 = vmatprep.subr.bf16.mxu1 %v3941_v31  ;;  %3649 = vmatprep.subr.bf16.mxu0 %v3942_v17 }
 0xb58   : > { %3622 = vmatpush3.bf16.msra.mxu1 %v3943_v9  ;;  %3650 = vmatpush3.bf16.msra.mxu0 %v3944_v37 }
 0xb59   : > { %3623 = vmatprep.subr.bf16.mxu1 %v3945_v36  ;;  %3651 = vmatprep.subr.bf16.mxu0 %v3946_v59 }
 0xb5c   : > { %3624 = vmatpush3.bf16.msra.mxu1 %v3947_v45  ;;  %3652 = vmatpush3.bf16.msra.mxu0 %v3948_v46 }
 0xbfe   : > { %v2664_v12 = vpop.f32.mrf.mxu1  ;;  %v2717_v21 = vpop.f32.mrf.mxu0 }
 0xbff   : > { %v5065_v2 = vadd.f32 %v2664_v12, %v5052_v57  ;;  %v5068_v30 = vadd.f32 %v2717_v21, %v5056_v13 }
 0xc00   : > { %v2666_v1 = vpop.f32.mrf.mxu1  ;;  %v2719_v55 = vpop.f32.mrf.mxu0 }
 0xc01   : > { %v2736_v8 = vmul.f32 %v5065_v2, %v5065_v2  ;;  %v2738_v0 = vmul.f32 %v5068_v30, %v5068_v30  ;;  %v5075_v19 = vadd.f32 %v2666_v1, %v5060_v63  ;;  %v5078_v41 = vadd.f32 %v2719_v55, %v5062_v16 }
 0xc02   : > { %v2668_v10 = vpop.f32.mrf.mxu1  ;;  %v2721_v5 = vpop.f32.mrf.mxu0 }
 0xc03   : > { %v2752_v7 = vmul.f32 %v2736_v8, %v5065_v2  ;;  %v2754_v32 = vmul.f32 %v2738_v0, %v5068_v30  ;;  %v2737_v33 = vmul.f32 %v5075_v19, %v5075_v19  ;;  %v2739_v42 = vmul.f32 %v5078_v41, %v5078_v41 }
 0xc04   : > { %v5087_v58 = vadd.f32 %v2668_v10, %v5052_v57  ;;  %v5090_v15 = vadd.f32 %v2721_v5, %v5056_v13  ;;  %v2670_v29 = vpop.f32.mrf.mxu1  ;;  %v2723_v11 = vpop.f32.mrf.mxu0 }
 0xc05   : > { %v2768_v39 = vmul.f32 0.044715, %v2752_v7  ;;  %v2770_v27 = vmul.f32 0.044715, %v2754_v32  ;;  %v2753_v51 = vmul.f32 %v2737_v33, %v5075_v19  ;;  %v2755_v60 = vmul.f32 %v2739_v42, %v5078_v41 }
 0xc06   : > { %v2740_v40 = vmul.f32 %v5087_v58, %v5087_v58  ;;  %v2742_v3 = vmul.f32 %v5090_v15, %v5090_v15  ;;  %v5099_v25 = vadd.f32 %v2670_v29, %v5060_v63  ;;  %v5102_v34 = vadd.f32 %v2723_v11, %v5062_v16  ;;  %v2674_v6 = vpop.f32.mrf.mxu1  ;;  %v2727_v44 = vpop.f32.mrf.mxu0 }
 0xc07   : > { %v2784_v56 = vadd.f32 %v2768_v39, %v5065_v2  ;;  %v2786_v26 = vadd.f32 %v2770_v27, %v5068_v30  ;;  %v2769_v20 = vmul.f32 0.044715, %v2753_v51  ;;  %v2771_v47 = vmul.f32 0.044715, %v2755_v60 }
 0xc08   : > { %v2756_v18 = vmul.f32 %v2740_v40, %v5087_v58  ;;  %v2758_v23 = vmul.f32 %v2742_v3, %v5090_v15  ;;  %v2741_v50 = vmul.f32 %v5099_v25, %v5099_v25  ;;  %v2743_v24 = vmul.f32 %v5102_v34, %v5102_v34  ;;  %v2676_v61 = vpop.f32.mrf.mxu1  ;;  %v2729_v17 = vpop.f32.mrf.mxu0 }
 0xc09   : > { %v2800_v35 = vmul.f32 0.7978846, %v2784_v56  ;;  %v2802_v54 = vmul.f32 0.7978846, %v2786_v26  ;;  %v2785_v52 = vadd.f32 %v2769_v20, %v5075_v19  ;;  %v2787_v28 = vadd.f32 %v2771_v47, %v5078_v41 }
 0xc0a   : > { %v2772_v14 = vmul.f32 0.044715, %v2756_v18  ;;  %v2774_v62 = vmul.f32 0.044715, %v2758_v23  ;;  %v2757_v48 = vmul.f32 %v2741_v50, %v5099_v25  ;;  %v2759_v31 = vmul.f32 %v2743_v24, %v5102_v34  ;;  %v2678_v21 = vpop.f32.mrf.mxu1  ;;  %v2731_v0 = vpop.f32.mrf.mxu0 }
 0xc0b   : > { %4061 = vtanh.f32 %v2800_v35  ;;  %v2801_v9 = vmul.f32 0.7978846, %v2785_v52  ;;  %v2803_v37 = vmul.f32 0.7978846, %v2787_v28  ;;  %v5117_v36 = vadd.f32 %v2674_v6, %v5052_v57 }
 0xc0c   : > { %4063 = vtanh.f32 %v2802_v54  ;;  %v2788_v59 = vadd.f32 %v2772_v14, %v5087_v58  ;;  %v2790_v45 = vadd.f32 %v2774_v62, %v5090_v15  ;;  %v2773_v46 = vmul.f32 0.044715, %v2757_v48  ;;  %v2680_v51 = vpop.f32.mrf.mxu1  ;;  %v2733_v6 = vpop.f32.mrf.mxu0 }
 0xc0d   : > { %4065 = vtanh.f32 %v2801_v9  ;;  %v2775_v49 = vmul.f32 0.044715, %v2759_v31  ;;  %v2744_v43 = vmul.f32 %v5117_v36, %v5117_v36  ;;  %v5124_v12 = vadd.f32 %v2727_v44, %v5056_v13 }
 0xc0e   : > { %4067 = vtanh.f32 %v2803_v37  ;;  %v2804_v1 = vmul.f32 0.7978846, %v2788_v59  ;;  %v2806_v55 = vmul.f32 0.7978846, %v2790_v45  ;;  %v2789_v8 = vadd.f32 %v2773_v46, %v5099_v25 }
 0xc0f   : > { %v2791_v10 = vadd.f32 %v2775_v49, %v5102_v34  ;;  %v2760_v5 = vmul.f32 %v2744_v43, %v5117_v36  ;;  %v2746_v7 = vmul.f32 %v5124_v12, %v5124_v12  ;;  %v5132_v32 = vadd.f32 %v2676_v61, %v5060_v63 }
 0xc10   : > { %4069 = vtanh.f32 %v2804_v1  ;;  %v2805_v33 = vmul.f32 0.7978846, %v2789_v8  ;;  %v5135_v42 = vadd.f32 %v2729_v17, %v5062_v16  ;;  %v5138_v29 = vadd.f32 %v2678_v21, %v5052_v57 }
 0xc11   : > { %4071 = vtanh.f32 %v2806_v55  ;;  %v2807_v11 = vmul.f32 0.7978846, %v2791_v10  ;;  %v2776_v39 = vmul.f32 0.044715, %v2760_v5  ;;  %v2762_v27 = vmul.f32 %v2746_v7, %v5124_v12 }
 0xc12   : > { %4073 = vtanh.f32 %v2805_v33  ;;  %v2745_v60 = vmul.f32 %v5132_v32, %v5132_v32  ;;  %v2747_v40 = vmul.f32 %v5135_v42, %v5135_v42  ;;  %v2748_v3 = vmul.f32 %v5138_v29, %v5138_v29 }
 0xc13   : > { %4075 = vtanh.f32 %v2807_v11  ;;  %v2792_v57 = vadd.f32 %v2776_v39, %v5117_v36  ;;  %v2778_v44 = vmul.f32 0.044715, %v2762_v27  ;;  %v5149_v56 = vadd.f32 %v2731_v0, %v5056_v13 }
 0xc14   : > { %v2761_v26 = vmul.f32 %v2745_v60, %v5132_v32  ;;  %v2763_v20 = vmul.f32 %v2747_v40, %v5135_v42  ;;  %v2764_v47 = vmul.f32 %v2748_v3, %v5138_v29  ;;  %v5155_v18 = vadd.f32 %v2680_v51, %v5060_v63 }
 0xc15   : > { %v2808_v23 = vmul.f32 0.7978846, %v2792_v57  ;;  %v2794_v50 = vadd.f32 %v2778_v44, %v5124_v12  ;;  %v2750_v24 = vmul.f32 %v5149_v56, %v5149_v56  ;;  %v5161_v35 = vadd.f32 %v2733_v6, %v5062_v16 }
 0xc16   : > { %v2777_v13 = vmul.f32 0.044715, %v2761_v26  ;;  %v2779_v54 = vmul.f32 0.044715, %v2763_v20  ;;  %v2780_v52 = vmul.f32 0.044715, %v2764_v47  ;;  %v2749_v28 = vmul.f32 %v5155_v18, %v5155_v18 }
 0xc17   : > { %v2810_v61 = vmul.f32 0.7978846, %v2794_v50  ;;  %v2766_v14 = vmul.f32 %v2750_v24, %v5149_v56  ;;  %v2751_v63 = vmul.f32 %v5161_v35, %v5161_v35  ;;  %4077 = vtanh.f32 %v2808_v23 }
 0xc18   : > { %v4062_v62 = vpop.eup %4061  ;;  %v2793_v48 = vadd.f32 %v2777_v13, %v5132_v32  ;;  %v2795_v31 = vadd.f32 %v2779_v54, %v5135_v42  ;;  %v2796_v16 = vadd.f32 %v2780_v52, %v5138_v29  ;;  %v2765_v17 = vmul.f32 %v2749_v28, %v5155_v18 }
 0xc19   : > { %v4064_v9 = vpop.eup %4063  ;;  %v2782_v37 = vmul.f32 0.044715, %v2766_v14  ;;  %v2767_v59 = vmul.f32 %v2751_v63, %v5161_v35  ;;  %4079 = vtanh.f32 %v2810_v61  ;;  %v2832_v5 = vadd.f32 1.0, %v4062_v62 }
 0xc1a   : > { %v4066_v45 = vpop.eup %4065  ;;  %v2809_v46 = vmul.f32 0.7978846, %v2793_v48  ;;  %v2811_v49 = vmul.f32 0.7978846, %v2795_v31  ;;  %v2812_v21 = vmul.f32 0.7978846, %v2796_v16 }
 0xc1b   : > { %v4068_v43 = vpop.eup %4067  ;;  %v2798_v1 = vadd.f32 %v2782_v37, %v5149_v56  ;;  %v2781_v55 = vmul.f32 0.044715, %v2765_v17  ;;  %v2783_v8 = vmul.f32 0.044715, %v2767_v59  ;;  %v2833_v0 = vadd.f32 1.0, %v4066_v45 }
 0xc1c   : > { %4081 = vtanh.f32 %v2809_v46  ;;  %v2834_v39 = vadd.f32 1.0, %v4064_v9  ;;  %v2835_v47 = vadd.f32 1.0, %v4068_v43  ;;  %v2848_v23 = vmul.f32 0.5, %v2832_v5 }
 0xc1d   : > { %v4070_v10 = vpop.eup %4069  ;;  %4083 = vtanh.f32 %v2811_v49  ;;  %v2814_v7 = vmul.f32 0.7978846, %v2798_v1  ;;  %v2797_v33 = vadd.f32 %v2781_v55, %v5155_v18  ;;  %v2799_v51 = vadd.f32 %v2783_v8, %v5161_v35 }
 0xc1e   : > { %v4072_v11 = vpop.eup %4071  ;;  %v2836_v27 = vadd.f32 1.0, %v4070_v10  ;;  %4085 = vtanh.f32 %v2812_v21  ;;  %v2849_v6 = vmul.f32 0.5, %v2833_v0  ;;  %v2850_v13 = vmul.f32 0.5, %v2834_v39 }
 0xc1f   : > { %v4074_v60 = vpop.eup %4073  ;;  %v2838_v40 = vadd.f32 1.0, %v4072_v11  ;;  %4087 = vtanh.f32 %v2814_v7  ;;  %v2813_v3 = vmul.f32 0.7978846, %v2797_v33  ;;  %v2815_v26 = vmul.f32 0.7978846, %v2799_v51 }
 0xc20   : > { %v4076_v57 = vpop.eup %4075  ;;  %v2852_v44 = vmul.f32 0.5, %v2836_v27  ;;  %v2837_v20 = vadd.f32 1.0, %v4074_v60  ;;  %v2851_v52 = vmul.f32 0.5, %v2835_v47  ;;  %v2865_v63 = vmul.f32 %v2849_v6, %v5075_v19 }
 0xc21   : > { %v2854_v50 = vmul.f32 0.5, %v2838_v40  ;;  %4089 = vtanh.f32 %v2813_v3  ;;  %v2839_v24 = vadd.f32 1.0, %v4076_v57  ;;  %v2864_v48 = vmul.f32 %v2848_v23, %v5065_v2 }
 0xc22   : > { %4091 = vtanh.f32 %v2815_v26  ;;  %v2853_v54 = vmul.f32 0.5, %v2837_v20  ;;  %v2868_v28 = vmul.f32 %v2852_v44, %v5087_v58  ;;  %v2867_v31 = vmul.f32 %v2851_v52, %v5078_v41 }
 0xc23   : > { %v2855_v61 = vmul.f32 0.5, %v2839_v24  ;;  %v2870_v14 = vmul.f32 %v2854_v50, %v5090_v15  ;;  %v2866_v17 = vmul.f32 %v2850_v13, %v5068_v30 }
 0xc24   : > { %v2869_v62 = vmul.f32 %v2853_v54, %v5099_v25  ;;  %v4078_v37 = vpop.eup %4077  ;;  %v2880_v59 = vpack.c.bf16 %v2868_v28, %v2864_v48 }
 0xc25   : > { %v2871_v16 = vmul.f32 %v2855_v61, %v5102_v34  ;;  %v2882_v46 = vpack.c.bf16 %v2870_v14, %v2866_v17  ;;  %v2840_v43 = vadd.f32 1.0, %v4078_v37 }
 0xc26   : > { %v2881_v9 = vpack.c.bf16 %v2869_v62, %v2865_v63  ;;  %v4080_v58 = vpop.eup %4079 }
 0xc27   : > { %v2883_v45 = vpack.c.bf16 %v2871_v16, %v2867_v31  ;;  %v2842_v21 = vadd.f32 1.0, %v4080_v58  ;;  %v2856_v11 = vmul.f32 0.5, %v2840_v43 }
 0xc28   : > { %3183 = vmatprep.mubr.bf16.mxu1 %v2881_v9 }
 0xc29   : > { %v4082_v15 = vpop.eup %4081  ;;  %3232 = vmatprep.mubr.bf16.mxu0 %v2883_v45  ;;  %3184 = vmatmul.mubr.bf16.vlgmr.msra.gmra.mxu1 %v2880_v59  ;;  %v2858_v27 = vmul.f32 0.5, %v2842_v21  ;;  %v2872_v26 = vmul.f32 %v2856_v11, %v5117_v36 }
 0xc2a   : > { %v4084_v19 = vpop.eup %4083  ;;  %3233 = vmatmul.mubr.bf16.vlgmr.msra.gmra.mxu0 %v2882_v46  ;;  %v2841_v2 = vadd.f32 1.0, %v4082_v15 }
 0xc2b   : > { %v4086_v25 = vpop.eup %4085  ;;  %v2843_v41 = vadd.f32 1.0, %v4084_v19  ;;  %v2874_v47 = vmul.f32 %v2858_v27, %v5124_v12 }
 0xc2c   : > { %v4088_v49 = vpop.eup %4087  ;;  %v2844_v34 = vadd.f32 1.0, %v4086_v25  ;;  %v2857_v10 = vmul.f32 0.5, %v2841_v2 }
 0xc2d   : > { %v2846_v30 = vadd.f32 1.0, %v4088_v49  ;;  %v2859_v33 = vmul.f32 0.5, %v2843_v41 }
 0xc2e   : > { %v4090_v1 = vpop.eup %4089  ;;  %v2860_v55 = vmul.f32 0.5, %v2844_v34  ;;  %v2873_v40 = vmul.f32 %v2857_v10, %v5132_v32 }
 0xc2f   : > { %v4092_v8 = vpop.eup %4091  ;;  %v2845_v0 = vadd.f32 1.0, %v4090_v1  ;;  %v2862_v5 = vmul.f32 0.5, %v2846_v30  ;;  %v2875_v57 = vmul.f32 %v2859_v33, %v5135_v42  ;;  %v3519_v42 = vld [vmem:[%s766_s22] ss:$0 sm:$0xff] }
 0xc30   : > { %v2847_v7 = vadd.f32 1.0, %v4092_v8  ;;  %v2876_v60 = vmul.f32 %v2860_v55, %v5138_v29 }
 0xc31   : > { %v2861_v39 = vmul.f32 0.5, %v2845_v0  ;;  %v2878_v6 = vmul.f32 %v2862_v5, %v5149_v56 }
 0xc32   : > { %v2863_v51 = vmul.f32 0.5, %v2847_v7  ;;  %v2884_v50 = vpack.c.bf16 %v2876_v60, %v2872_v26 }
 0xc33   : > { %v2877_v3 = vmul.f32 %v2861_v39, %v5155_v18  ;;  %v2886_v29 = vpack.c.bf16 %v2878_v6, %v2874_v47 }
 0xc34   : > { %v2879_v44 = vmul.f32 %v2863_v51, %v5161_v35 }
 0xc35   : > { %v2885_v20 = vpack.c.bf16 %v2877_v3, %v2873_v40 }
 0xc36   : > { %v2887_v23 = vpack.c.bf16 %v2879_v44, %v2875_v57 }
 0xc37   : > { %3191 = vmatprep.mubr.bf16.mxu1 %v2885_v20 }
 0xc38   : > { %3240 = vmatprep.mubr.bf16.mxu0 %v2887_v23  ;;  %3192 = vmatmul.mubr.bf16.gmra.mxu1 %v2884_v50 }
 0xc39   : > { %3241 = vmatmul.mubr.bf16.gmra.mxu0 %v2886_v29 }
 0xce9   : > { %v3625_v32 = vpop.f32.mrf.mxu1 }
 0xcea   : > { %v3653_v18 = vpop.f32.mrf.mxu0 }
 0xceb   : > { %v3626_v56 = vpop.f32.mrf.mxu1 }
 0xcec   : > { %v3627_v35 = vadd.f32 %v3626_v56, %v3625_v32  ;;  %v3654_v36 = vpop.f32.mrf.mxu0 }
 0xced   : > { %v3628_v24 = vpop.f32.mrf.mxu1  ;;  %v3655_v12 = vadd.f32 %v3654_v36, %v3653_v18 }
 0xcee   : > { %v3186_v13 = vadd.f32 %v3627_v35, %v3519_v42  ;;  %v3656_v54 = vpop.f32.mrf.mxu0 }
 0xcef   : > { %v3629_v52 = vpop.f32.mrf.mxu1 }
 0xcf0   : > { %v3235_v28 = vadd.f32 %v3655_v12, %v3186_v13  ;;  %v3630_v61 = vadd.f32 %v3629_v52, %v3628_v24  ;;  %v3657_v14 = vpop.f32.mrf.mxu0 }
 0xcf1   : > { %v3658_v48 = vadd.f32 %v3657_v14, %v3656_v54 }
 0xcf2   : > { %v3249_v63 = vadd.f32 %v3235_v28, %v4927_v22  ;;  %v3189_v62 = vadd.f32 %v3630_v61, %v3519_v42 }
 0xcf4   : > { %3253 = vst [vmem:[%s5260_s24] sm:$0xff] %v3249_v63  ;;  %v3238_v31 = vadd.f32 %v3658_v48, %v3189_v62 }
 0xcf6   : > { %v3250_v16 = vadd.f32 %v3238_v31, %v4938_v38 }
 0xcf8   : > { %3254 = vst [vmem:[%s5260_s24 + $0x8] sm:$0xff] %v3250_v16  ;;  %v3631_v17 = vpop.f32.mrf.mxu1 }
 0xcf9   : > { %v3659_v9 = vpop.f32.mrf.mxu0 }
 0xcfa   : > { %v3632_v37 = vpop.f32.mrf.mxu1 }
 0xcfb   : > { %v3633_v59 = vadd.f32 %v3632_v37, %v3631_v17  ;;  %v3660_v45 = vpop.f32.mrf.mxu0 }
 0xcfc   : > { %v3634_v58 = vpop.f32.mrf.mxu1  ;;  %v3661_v46 = vadd.f32 %v3660_v45, %v3659_v9 }
 0xcfd   : > { %v3194_v22 = vadd.f32 %v3633_v59, %v3519_v42  ;;  %v3662_v15 = vpop.f32.mrf.mxu0 }
 0xcfe   : > { %v3635_v19 = vpop.f32.mrf.mxu1 }
 0xcff   : > { %v3243_v25 = vadd.f32 %v3661_v46, %v3194_v22  ;;  %v3636_v2 = vadd.f32 %v3635_v19, %v3634_v58  ;;  %v3663_v49 = vpop.f32.mrf.mxu0 }
 0xd00   : > { %v3664_v43 = vadd.f32 %v3663_v49, %v3662_v15 }
 0xd01   : > { %v3251_v41 = vadd.f32 %v3243_v25, %v4933_v53  ;;  %v3197_v38 = vadd.f32 %v3636_v2, %v3519_v42 }
 0xd03   : > { %3255 = vst [vmem:[%s5260_s24 + $0x10] sm:$0xff] %v3251_v41  ;;  %v3246_v34 = vadd.f32 %v3664_v43, %v3197_v38 }
 0xd05   : > { %v3252_v21 = vadd.f32 %v3246_v34, %v4945_v4 }
 0xd07   : > { %3256 = vst [vmem:[%s5260_s24 + $0x18] sm:$0xff] %v3252_v21 }
 0xd08 PF: > { %s5271_s2 = sld [smem:[#allocation2_spill]] }
 0xd0e   : > { %s28_s27 = sadd.s32 1, %s5271_s2  }
 0xd0f   : > { %p25_p5 = scmp.ge.s32.totalorder %s28_s27, 4  }
 0xd11   :  { %27 = sbr.rel (!%p25_p5) target bundleno = 11 (0xb), region = 161 }

</bundles_post_ra>
